<compile_context>
chip_gen: v6e
topology: v6e:2x2x1
jax: 0.10.0
libtpu: 0.0.40
codegen_flags: <defaults>
</compile_context>

<pallas_src>
import functools

import jax
import jax.numpy as jnp
from jax import lax
from jax.experimental import pallas as pl
from jax.experimental.pallas import tpu as pltpu

_HIGHEST = lax.Precision.HIGHEST


def _dot(a, b):
    return jnp.dot(a, b, precision=_HIGHEST, preferred_element_type=jnp.float32)


# ----------------------------------------------------------------------------
# One fused bidirectional RNN layer (values only, no refs except the inputs)
# ----------------------------------------------------------------------------
def _bidir_layer(T, Bp, H, in_val, w_ih, w_hh, b, need_seq):
    """in_val: (T*Bp, D_in) time-major (rows t*Bp..(t+1)*Bp-1 = batch @ time t)
    w_ih: (D_in, 2H) [fwd | bwd];  w_hh: (2H, 2H) block-diag [fwd ; bwd]
    b:    (1, 2H) combined b_ih + b_hh
    Returns (seq, h_final):
      seq (T*Bp, 2H) time-major [h_fwd(t) | h_bwd(t)]  (None if not needed)
      h_final (Bp, 2H) == cat(h_fwd(T-1), h_bwd(0)) == torch h_n of this layer
    """
    # Hoisted input projection for BOTH directions: one big matmul + bias.
    xb = _dot(in_val, w_ih) + b                                  # (T*Bp, 2H)

    # Assemble the step-ordered drive ONCE, off the carry critical path:
    # fwd half stays in time order, bwd half is time-reversed so step t reads
    # a single aligned 8-row block for both directions (no per-step concat).
    bwd_rev = jnp.concatenate(
        [xb[(T - 1 - t) * Bp:(T - t) * Bp, H:] for t in range(T)], axis=0)
    u = jnp.concatenate([xb[:, :H], bwd_rev], axis=-1)           # (T*Bp, 2H)

    h = jnp.zeros((Bp, 2 * H), dtype=jnp.float32)
    hs = []
    # Fully unrolled time loop (small static T): serial path per step is one
    # fused (Bp,2H)x(2H,2H) matmul + add + tanh.
    for t in range(T):
        h = jnp.tanh(u[t * Bp:(t + 1) * Bp, :] + _dot(h, w_hh))
        if need_seq:
            hs.append(h)

    seq = None
    if need_seq:
        # Next-layer input assembled as a value (lives in vregs / compiler-
        # managed VMEM); no scratch stores + reloads between layers.
        seq = jnp.concatenate(
            [jnp.concatenate([hs[t][:, :H] for t in range(T)], axis=0),
             jnp.concatenate([hs[T - 1 - t][:, H:] for t in range(T)], axis=0)],
            axis=-1)                                             # (T*Bp, 2H)
    return seq, h


# ----------------------------------------------------------------------------
# Fused kernel: all RNN layers (both directions) + final Linear
# ----------------------------------------------------------------------------
def _birnn_fc_kernel(*args, num_layers, seq_len, batch_pad, hidden):
    """args = (x, [w_ih, w_hh, b] * num_layers, fc_w_t, fc_b, out)."""
    n_w = 3 * num_layers
    x_ref = args[0]
    layer_refs = args[1:1 + n_w]
    fc_w_ref = args[1 + n_w]
    fc_b_ref = args[2 + n_w]
    out_ref = args[3 + n_w]

    cur = x_ref[...]
    h = None
    for l in range(num_layers):
        w_ih, w_hh, b = (r[...] for r in layer_refs[3 * l:3 * l + 3])
        need_seq = l != num_layers - 1
        cur, h = _bidir_layer(seq_len, batch_pad, hidden, cur, w_ih, w_hh, b,
                              need_seq)
        # TODO(synk): nn.RNN inter-layer dropout is training-only; identity here.

    # Final carry h == cat(h_n_fwd, h_n_bwd) of the last layer -> fused FC.
    out_ref[...] = _dot(h, fc_w_ref[...]) + fc_b_ref[...]


# ----------------------------------------------------------------------------
# Wrapper: one pallas_call for the whole model forward
# ----------------------------------------------------------------------------
def birnn_classifier_forward(x, params, num_layers, hidden_size, num_classes):
    """x: (B, T, input_size) — PyTorch batch_first convention."""
    B, T, D = x.shape
    H = hidden_size
    Bp = max(8, ((B + 7) // 8) * 8)  # pad batch to the 8-row sublane group

    # Time-major + batch-padded so every per-step slice in the kernel is a
    # sublane-aligned 8-row block; padded rows are independent junk, sliced
    # off after the kernel.
    x_t = jnp.transpose(x, (1, 0, 2)).astype(jnp.float32)        # (T, B, D)
    x_t = jnp.pad(x_t, ((0, 0), (0, Bp - B), (0, 0)))            # (T, Bp, D)
    x2 = x_t.reshape(T * Bp, D)

    vmem = pl.BlockSpec(memory_space=pltpu.MemorySpace.VMEM)

    inputs = [x2]
    for l in range(num_layers):
        p = params["rnn"][l]
        inputs += [p["w_ih"], p["w_hh"], p["b"]]
    inputs += [params["fc_w_t"], params["fc_b"]]

    # VMEM budget guard (matters on v7x: 64 MiB physical / 32 MiB scoped).
    vmem_limit = 32 * 1024 * 1024
    est = sum(int(a.size) * 4 for a in inputs) + Bp * num_classes * 4
    est += num_layers * 3 * (T * Bp * 2 * H) * 4   # xb / u / seq live values
    assert est <= vmem_limit, (
        f"config too large for single-invocation kernel ({est} bytes); chunk "
        "the input projection over time blocks / add a grid for v7x")
    # TODO(synk): for large B, add a batch-parallel grid axis
    # (dimension_semantics=("parallel",)) to reach v7x's second TensorCore.

    kernel = functools.partial(
        _birnn_fc_kernel, num_layers=num_layers, seq_len=T, batch_pad=Bp,
        hidden=H)
    out = pl.pallas_call(
        kernel,
        out_shape=jax.ShapeDtypeStruct((Bp, num_classes), jnp.float32),
        in_specs=[vmem] * len(inputs),
        out_specs=vmem,
        compiler_params=pltpu.CompilerParams(vmem_limit_bytes=vmem_limit),
    )(*inputs)
    return out[:B]


# ----------------------------------------------------------------------------
# Pure-JAX reference (mirrors torch nn.RNN bidirectional + Linear, inference)
# ----------------------------------------------------------------------------
def birnn_classifier_reference(x, params, num_layers, hidden_size):
    H = hidden_size
    B = x.shape[0]
    layer_in = jnp.transpose(x, (1, 0, 2)).astype(jnp.float32)   # (T, B, D)

    h_f = h_b = None
    for l in range(num_layers):
        p = params["rnn"][l]
        w_ih_f, w_ih_b = p["w_ih"][:, :H], p["w_ih"][:, H:]
        w_hh_f, w_hh_b = p["w_hh"][:H, :H], p["w_hh"][H:, H:]
        b_f, b_b = p["b"][:, :H], p["b"][:, H:]

        def run_dir(seq, w_ih, w_hh, b):
            def step(h, x_t):
                h_new = jnp.tanh(
                    jnp.dot(x_t, w_ih, precision=_HIGHEST)
                    + jnp.dot(h, w_hh, precision=_HIGHEST) + b)
                return h_new, h_new
            h_last, outs = lax.scan(step, jnp.zeros((B, H), jnp.float32), seq)
            return outs, h_last

        seq_f, h_f = run_dir(layer_in, w_ih_f, w_hh_f, b_f)
        seq_b_rev, h_b = run_dir(jnp.flip(layer_in, 0), w_ih_b, w_hh_b, b_b)
        layer_in = jnp.concatenate([seq_f, jnp.flip(seq_b_rev, 0)], axis=-1)

    h_cat = jnp.concatenate([h_f, h_b], axis=-1)                 # h_n last layer
    return jnp.dot(h_cat, params["fc_w_t"], precision=_HIGHEST) + params["fc_b"]


# ----------------------------------------------------------------------------
# Deterministic parameter init (PyTorch-shaped weights, fused kernel layout)
# ----------------------------------------------------------------------------
def init_params(key, input_size, hidden_size, num_layers, num_classes):
    H = hidden_size
    scale = 1.0 / jnp.sqrt(jnp.float32(H))
    params = {"rnn": []}
    for l in range(num_layers):
        d_in = input_size if l == 0 else 2 * H
        keys = jax.random.split(key, 9)
        key = keys[0]
        w_ih_f = jax.random.uniform(keys[1], (H, d_in), jnp.float32, -scale, scale)
        w_hh_f = jax.random.uniform(keys[2], (H, H), jnp.float32, -scale, scale)
        b_ih_f = jax.random.uniform(keys[3], (H,), jnp.float32, -scale, scale)
        b_hh_f = jax.random.uniform(keys[4], (H,), jnp.float32, -scale, scale)
        w_ih_b = jax.random.uniform(keys[5], (H, d_in), jnp.float32, -scale, scale)
        w_hh_b = jax.random.uniform(keys[6], (H, H), jnp.float32, -scale, scale)
        b_ih_b = jax.random.uniform(keys[7], (H,), jnp.float32, -scale, scale)
        b_hh_b = jax.random.uniform(keys[8], (H,), jnp.float32, -scale, scale)
        # Fused layouts consumed by the kernel:
        w_ih = jnp.concatenate([w_ih_f.T, w_ih_b.T], axis=1)           # (d_in, 2H)
        w_hh = jnp.zeros((2 * H, 2 * H), jnp.float32)
        w_hh = w_hh.at[:H, :H].set(w_hh_f.T).at[H:, H:].set(w_hh_b.T)  # block-diag
        b = jnp.concatenate([b_ih_f + b_hh_f, b_ih_b + b_hh_b])[None, :]  # (1, 2H)
        params["rnn"].append(dict(w_ih=w_ih, w_hh=w_hh, b=b))

    k1, k2 = jax.random.split(key)
    fc_scale = 1.0 / jnp.sqrt(jnp.float32(2 * H))
    fc_w = jax.random.uniform(k1, (num_classes, 2 * H), jnp.float32,
                              -fc_scale, fc_scale)
    fc_b = jax.random.uniform(k2, (num_classes,), jnp.float32,
                              -fc_scale, fc_scale)
    params["fc_w_t"] = fc_w.T          # (2H, C)
    params["fc_b"] = fc_b[None, :]     # (1, C)
    return params


# ----------------------------------------------------------------------------
if __name__ == "__main__":
    batch = 2
    seq_len = 8
    input_size = 16
    hidden_size = 32
    num_layers = 2
    num_classes = 5
    dropout = 0.25  # inference: no-op

    root = jax.random.PRNGKey(0)
    k_x, k_p = jax.random.split(root)
    x = jax.random.normal(k_x, (batch, seq_len, input_size), jnp.float32)
    params = init_params(k_p, input_size, hidden_size, num_layers, num_classes)

    fwd = jax.jit(functools.partial(
        birnn_classifier_forward,
        num_layers=num_layers, hidden_size=hidden_size, num_classes=num_classes))

    logits = jax.block_until_ready(fwd(x, params))
    ref = jax.block_until_ready(
        birnn_classifier_reference(x, params, num_layers, hidden_size))

    assert logits.shape == (batch, num_classes), logits.shape
    assert jnp.allclose(logits, ref, atol=1e-4, rtol=1e-4), (
        "mismatch vs pure-JAX reference"
    )
    print("KERNEL_OK")
</pallas_src>

<mosaic_0001>
module attributes {stable_mosaic.version = 11 : i64} {
  func.func @_birnn_fc_kernel(%arg0: memref<64x16xf32, #tpu.memory_space<vmem>>, %arg1: memref<16x64xf32, #tpu.memory_space<vmem>>, %arg2: memref<64x64xf32, #tpu.memory_space<vmem>>, %arg3: memref<1x64xf32, #tpu.memory_space<vmem>>, %arg4: memref<64x64xf32, #tpu.memory_space<vmem>>, %arg5: memref<64x64xf32, #tpu.memory_space<vmem>>, %arg6: memref<1x64xf32, #tpu.memory_space<vmem>>, %arg7: memref<64x5xf32, #tpu.memory_space<vmem>>, %arg8: memref<1x5xf32, #tpu.memory_space<vmem>>, %arg9: memref<8x5xf32, #tpu.memory_space<vmem>>) attributes {dimension_semantics = [], scalar_prefetch = 0 : i64, scratch_operands = 0 : i64, tpu.core_type = #tpu.core_type<tc>} {
    %c0 = arith.constant 0 : index
    %c0_0 = arith.constant 0 : index
    %0 = vector.load %arg0[%c0, %c0_0] : memref<64x16xf32, #tpu.memory_space<vmem>>, vector<64x16xf32>
    %c0_1 = arith.constant 0 : index
    %c0_2 = arith.constant 0 : index
    %1 = vector.load %arg1[%c0_1, %c0_2] : memref<16x64xf32, #tpu.memory_space<vmem>>, vector<16x64xf32>
    %c0_3 = arith.constant 0 : index
    %c0_4 = arith.constant 0 : index
    %2 = vector.load %arg2[%c0_3, %c0_4] : memref<64x64xf32, #tpu.memory_space<vmem>>, vector<64x64xf32>
    %c0_5 = arith.constant 0 : index
    %c0_6 = arith.constant 0 : index
    %3 = vector.load %arg3[%c0_5, %c0_6] : memref<1x64xf32, #tpu.memory_space<vmem>>, vector<1x64xf32>
    %cst = arith.constant dense<0.000000e+00> : vector<64x64xf32>
    %4 = tpu.matmul %0, %1, %cst {dimension_numbers = #tpu.dot_dimension_numbers<[1], [0], [0], [1], [0, 0, 1, 1], [], []>, precision = #tpu.contract_precision<fp32>} : vector<64x16xf32>, vector<16x64xf32>, vector<64x64xf32> -> vector<64x64xf32>
    %5 = vector.broadcast %3 : vector<1x64xf32> to vector<64x64xf32>
    %6 = arith.addf %4, %5 : vector<64x64xf32>
    %7 = vector.extract_strided_slice %6 {offsets = [56, 32], sizes = [8, 32], strides = [1, 1]} : vector<64x64xf32> to vector<8x32xf32>
    %8 = vector.extract_strided_slice %6 {offsets = [48, 32], sizes = [8, 32], strides = [1, 1]} : vector<64x64xf32> to vector<8x32xf32>
    %9 = vector.extract_strided_slice %6 {offsets = [40, 32], sizes = [8, 32], strides = [1, 1]} : vector<64x64xf32> to vector<8x32xf32>
    %10 = vector.extract_strided_slice %6 {offsets = [32, 32], sizes = [8, 32], strides = [1, 1]} : vector<64x64xf32> to vector<8x32xf32>
    %11 = vector.extract_strided_slice %6 {offsets = [24, 32], sizes = [8, 32], strides = [1, 1]} : vector<64x64xf32> to vector<8x32xf32>
    %12 = vector.extract_strided_slice %6 {offsets = [16, 32], sizes = [8, 32], strides = [1, 1]} : vector<64x64xf32> to vector<8x32xf32>
    %13 = vector.extract_strided_slice %6 {offsets = [8, 32], sizes = [8, 32], strides = [1, 1]} : vector<64x64xf32> to vector<8x32xf32>
    %14 = vector.extract_strided_slice %6 {offsets = [0, 32], sizes = [8, 32], strides = [1, 1]} : vector<64x64xf32> to vector<8x32xf32>
    %15 = tpu.concatenate %7, %8, %9, %10, %11, %12, %13, %14 in 0 : vector<8x32xf32>, vector<8x32xf32>, vector<8x32xf32>, vector<8x32xf32>, vector<8x32xf32>, vector<8x32xf32>, vector<8x32xf32>, vector<8x32xf32> -> vector<64x32xf32>
    %16 = vector.extract_strided_slice %6 {offsets = [0, 0], sizes = [64, 32], strides = [1, 1]} : vector<64x64xf32> to vector<64x32xf32>
    %17 = tpu.concatenate %16, %15 in 1 : vector<64x32xf32>, vector<64x32xf32> -> vector<64x64xf32>
    %cst_7 = arith.constant 0.000000e+00 : f32
    %18 = vector.broadcast %cst_7 : f32 to vector<8x64xf32>
    %19 = vector.extract_strided_slice %17 {offsets = [0, 0], sizes = [8, 64], strides = [1, 1]} : vector<64x64xf32> to vector<8x64xf32>
    %cst_8 = arith.constant dense<0.000000e+00> : vector<8x64xf32>
    %20 = tpu.matmul %18, %2, %cst_8 {dimension_numbers = #tpu.dot_dimension_numbers<[1], [0], [0], [1], [0, 0, 1, 1], [], []>, precision = #tpu.contract_precision<fp32>} : vector<8x64xf32>, vector<64x64xf32>, vector<8x64xf32> -> vector<8x64xf32>
    %21 = arith.addf %19, %20 : vector<8x64xf32>
    %22 = math.tanh %21 : vector<8x64xf32>
    %23 = vector.extract_strided_slice %17 {offsets = [8, 0], sizes = [8, 64], strides = [1, 1]} : vector<64x64xf32> to vector<8x64xf32>
    %cst_9 = arith.constant dense<0.000000e+00> : vector<8x64xf32>
    %24 = tpu.matmul %22, %2, %cst_9 {dimension_numbers = #tpu.dot_dimension_numbers<[1], [0], [0], [1], [0, 0, 1, 1], [], []>, precision = #tpu.contract_precision<fp32>} : vector<8x64xf32>, vector<64x64xf32>, vector<8x64xf32> -> vector<8x64xf32>
    %25 = arith.addf %23, %24 : vector<8x64xf32>
    %26 = math.tanh %25 : vector<8x64xf32>
    %27 = vector.extract_strided_slice %17 {offsets = [16, 0], sizes = [8, 64], strides = [1, 1]} : vector<64x64xf32> to vector<8x64xf32>
    %cst_10 = arith.constant dense<0.000000e+00> : vector<8x64xf32>
    %28 = tpu.matmul %26, %2, %cst_10 {dimension_numbers = #tpu.dot_dimension_numbers<[1], [0], [0], [1], [0, 0, 1, 1], [], []>, precision = #tpu.contract_precision<fp32>} : vector<8x64xf32>, vector<64x64xf32>, vector<8x64xf32> -> vector<8x64xf32>
    %29 = arith.addf %27, %28 : vector<8x64xf32>
    %30 = math.tanh %29 : vector<8x64xf32>
    %31 = vector.extract_strided_slice %17 {offsets = [24, 0], sizes = [8, 64], strides = [1, 1]} : vector<64x64xf32> to vector<8x64xf32>
    %cst_11 = arith.constant dense<0.000000e+00> : vector<8x64xf32>
    %32 = tpu.matmul %30, %2, %cst_11 {dimension_numbers = #tpu.dot_dimension_numbers<[1], [0], [0], [1], [0, 0, 1, 1], [], []>, precision = #tpu.contract_precision<fp32>} : vector<8x64xf32>, vector<64x64xf32>, vector<8x64xf32> -> vector<8x64xf32>
    %33 = arith.addf %31, %32 : vector<8x64xf32>
    %34 = math.tanh %33 : vector<8x64xf32>
    %35 = vector.extract_strided_slice %17 {offsets = [32, 0], sizes = [8, 64], strides = [1, 1]} : vector<64x64xf32> to vector<8x64xf32>
    %cst_12 = arith.constant dense<0.000000e+00> : vector<8x64xf32>
    %36 = tpu.matmul %34, %2, %cst_12 {dimension_numbers = #tpu.dot_dimension_numbers<[1], [0], [0], [1], [0, 0, 1, 1], [], []>, precision = #tpu.contract_precision<fp32>} : vector<8x64xf32>, vector<64x64xf32>, vector<8x64xf32> -> vector<8x64xf32>
    %37 = arith.addf %35, %36 : vector<8x64xf32>
    %38 = math.tanh %37 : vector<8x64xf32>
    %39 = vector.extract_strided_slice %17 {offsets = [40, 0], sizes = [8, 64], strides = [1, 1]} : vector<64x64xf32> to vector<8x64xf32>
    %cst_13 = arith.constant dense<0.000000e+00> : vector<8x64xf32>
    %40 = tpu.matmul %38, %2, %cst_13 {dimension_numbers = #tpu.dot_dimension_numbers<[1], [0], [0], [1], [0, 0, 1, 1], [], []>, precision = #tpu.contract_precision<fp32>} : vector<8x64xf32>, vector<64x64xf32>, vector<8x64xf32> -> vector<8x64xf32>
    %41 = arith.addf %39, %40 : vector<8x64xf32>
    %42 = math.tanh %41 : vector<8x64xf32>
    %43 = vector.extract_strided_slice %17 {offsets = [48, 0], sizes = [8, 64], strides = [1, 1]} : vector<64x64xf32> to vector<8x64xf32>
    %cst_14 = arith.constant dense<0.000000e+00> : vector<8x64xf32>
    %44 = tpu.matmul %42, %2, %cst_14 {dimension_numbers = #tpu.dot_dimension_numbers<[1], [0], [0], [1], [0, 0, 1, 1], [], []>, precision = #tpu.contract_precision<fp32>} : vector<8x64xf32>, vector<64x64xf32>, vector<8x64xf32> -> vector<8x64xf32>
    %45 = arith.addf %43, %44 : vector<8x64xf32>
    %46 = math.tanh %45 : vector<8x64xf32>
    %47 = vector.extract_strided_slice %17 {offsets = [56, 0], sizes = [8, 64], strides = [1, 1]} : vector<64x64xf32> to vector<8x64xf32>
    %cst_15 = arith.constant dense<0.000000e+00> : vector<8x64xf32>
    %48 = tpu.matmul %46, %2, %cst_15 {dimension_numbers = #tpu.dot_dimension_numbers<[1], [0], [0], [1], [0, 0, 1, 1], [], []>, precision = #tpu.contract_precision<fp32>} : vector<8x64xf32>, vector<64x64xf32>, vector<8x64xf32> -> vector<8x64xf32>
    %49 = arith.addf %47, %48 : vector<8x64xf32>
    %50 = math.tanh %49 : vector<8x64xf32>
    %51 = vector.extract_strided_slice %22 {offsets = [0, 0], sizes = [8, 32], strides = [1, 1]} : vector<8x64xf32> to vector<8x32xf32>
    %52 = vector.extract_strided_slice %26 {offsets = [0, 0], sizes = [8, 32], strides = [1, 1]} : vector<8x64xf32> to vector<8x32xf32>
    %53 = vector.extract_strided_slice %30 {offsets = [0, 0], sizes = [8, 32], strides = [1, 1]} : vector<8x64xf32> to vector<8x32xf32>
    %54 = vector.extract_strided_slice %34 {offsets = [0, 0], sizes = [8, 32], strides = [1, 1]} : vector<8x64xf32> to vector<8x32xf32>
    %55 = vector.extract_strided_slice %38 {offsets = [0, 0], sizes = [8, 32], strides = [1, 1]} : vector<8x64xf32> to vector<8x32xf32>
    %56 = vector.extract_strided_slice %42 {offsets = [0, 0], sizes = [8, 32], strides = [1, 1]} : vector<8x64xf32> to vector<8x32xf32>
    %57 = vector.extract_strided_slice %46 {offsets = [0, 0], sizes = [8, 32], strides = [1, 1]} : vector<8x64xf32> to vector<8x32xf32>
    %58 = vector.extract_strided_slice %50 {offsets = [0, 0], sizes = [8, 32], strides = [1, 1]} : vector<8x64xf32> to vector<8x32xf32>
    %59 = tpu.concatenate %51, %52, %53, %54, %55, %56, %57, %58 in 0 : vector<8x32xf32>, vector<8x32xf32>, vector<8x32xf32>, vector<8x32xf32>, vector<8x32xf32>, vector<8x32xf32>, vector<8x32xf32>, vector<8x32xf32> -> vector<64x32xf32>
    %60 = vector.extract_strided_slice %50 {offsets = [0, 32], sizes = [8, 32], strides = [1, 1]} : vector<8x64xf32> to vector<8x32xf32>
    %61 = vector.extract_strided_slice %46 {offsets = [0, 32], sizes = [8, 32], strides = [1, 1]} : vector<8x64xf32> to vector<8x32xf32>
    %62 = vector.extract_strided_slice %42 {offsets = [0, 32], sizes = [8, 32], strides = [1, 1]} : vector<8x64xf32> to vector<8x32xf32>
    %63 = vector.extract_strided_slice %38 {offsets = [0, 32], sizes = [8, 32], strides = [1, 1]} : vector<8x64xf32> to vector<8x32xf32>
    %64 = vector.extract_strided_slice %34 {offsets = [0, 32], sizes = [8, 32], strides = [1, 1]} : vector<8x64xf32> to vector<8x32xf32>
    %65 = vector.extract_strided_slice %30 {offsets = [0, 32], sizes = [8, 32], strides = [1, 1]} : vector<8x64xf32> to vector<8x32xf32>
    %66 = vector.extract_strided_slice %26 {offsets = [0, 32], sizes = [8, 32], strides = [1, 1]} : vector<8x64xf32> to vector<8x32xf32>
    %67 = vector.extract_strided_slice %22 {offsets = [0, 32], sizes = [8, 32], strides = [1, 1]} : vector<8x64xf32> to vector<8x32xf32>
    %68 = tpu.concatenate %60, %61, %62, %63, %64, %65, %66, %67 in 0 : vector<8x32xf32>, vector<8x32xf32>, vector<8x32xf32>, vector<8x32xf32>, vector<8x32xf32>, vector<8x32xf32>, vector<8x32xf32>, vector<8x32xf32> -> vector<64x32xf32>
    %69 = tpu.concatenate %59, %68 in 1 : vector<64x32xf32>, vector<64x32xf32> -> vector<64x64xf32>
    %c0_16 = arith.constant 0 : index
    %c0_17 = arith.constant 0 : index
    %70 = vector.load %arg4[%c0_16, %c0_17] : memref<64x64xf32, #tpu.memory_space<vmem>>, vector<64x64xf32>
    %c0_18 = arith.constant 0 : index
    %c0_19 = arith.constant 0 : index
    %71 = vector.load %arg5[%c0_18, %c0_19] : memref<64x64xf32, #tpu.memory_space<vmem>>, vector<64x64xf32>
    %c0_20 = arith.constant 0 : index
    %c0_21 = arith.constant 0 : index
    %72 = vector.load %arg6[%c0_20, %c0_21] : memref<1x64xf32, #tpu.memory_space<vmem>>, vector<1x64xf32>
    %cst_22 = arith.constant dense<0.000000e+00> : vector<64x64xf32>
    %73 = tpu.matmul %69, %70, %cst_22 {dimension_numbers = #tpu.dot_dimension_numbers<[1], [0], [0], [1], [0, 0, 1, 1], [], []>, precision = #tpu.contract_precision<fp32>} : vector<64x64xf32>, vector<64x64xf32>, vector<64x64xf32> -> vector<64x64xf32>
    %74 = vector.broadcast %72 : vector<1x64xf32> to vector<64x64xf32>
    %75 = arith.addf %73, %74 : vector<64x64xf32>
    %76 = vector.extract_strided_slice %75 {offsets = [56, 32], sizes = [8, 32], strides = [1, 1]} : vector<64x64xf32> to vector<8x32xf32>
    %77 = vector.extract_strided_slice %75 {offsets = [48, 32], sizes = [8, 32], strides = [1, 1]} : vector<64x64xf32> to vector<8x32xf32>
    %78 = vector.extract_strided_slice %75 {offsets = [40, 32], sizes = [8, 32], strides = [1, 1]} : vector<64x64xf32> to vector<8x32xf32>
    %79 = vector.extract_strided_slice %75 {offsets = [32, 32], sizes = [8, 32], strides = [1, 1]} : vector<64x64xf32> to vector<8x32xf32>
    %80 = vector.extract_strided_slice %75 {offsets = [24, 32], sizes = [8, 32], strides = [1, 1]} : vector<64x64xf32> to vector<8x32xf32>
    %81 = vector.extract_strided_slice %75 {offsets = [16, 32], sizes = [8, 32], strides = [1, 1]} : vector<64x64xf32> to vector<8x32xf32>
    %82 = vector.extract_strided_slice %75 {offsets = [8, 32], sizes = [8, 32], strides = [1, 1]} : vector<64x64xf32> to vector<8x32xf32>
    %83 = vector.extract_strided_slice %75 {offsets = [0, 32], sizes = [8, 32], strides = [1, 1]} : vector<64x64xf32> to vector<8x32xf32>
    %84 = tpu.concatenate %76, %77, %78, %79, %80, %81, %82, %83 in 0 : vector<8x32xf32>, vector<8x32xf32>, vector<8x32xf32>, vector<8x32xf32>, vector<8x32xf32>, vector<8x32xf32>, vector<8x32xf32>, vector<8x32xf32> -> vector<64x32xf32>
    %85 = vector.extract_strided_slice %75 {offsets = [0, 0], sizes = [64, 32], strides = [1, 1]} : vector<64x64xf32> to vector<64x32xf32>
    %86 = tpu.concatenate %85, %84 in 1 : vector<64x32xf32>, vector<64x32xf32> -> vector<64x64xf32>
    %cst_23 = arith.constant 0.000000e+00 : f32
    %87 = vector.broadcast %cst_23 : f32 to vector<8x64xf32>
    %88 = vector.extract_strided_slice %86 {offsets = [0, 0], sizes = [8, 64], strides = [1, 1]} : vector<64x64xf32> to vector<8x64xf32>
    %cst_24 = arith.constant dense<0.000000e+00> : vector<8x64xf32>
    %89 = tpu.matmul %87, %71, %cst_24 {dimension_numbers = #tpu.dot_dimension_numbers<[1], [0], [0], [1], [0, 0, 1, 1], [], []>, precision = #tpu.contract_precision<fp32>} : vector<8x64xf32>, vector<64x64xf32>, vector<8x64xf32> -> vector<8x64xf32>
    %90 = arith.addf %88, %89 : vector<8x64xf32>
    %91 = math.tanh %90 : vector<8x64xf32>
    %92 = vector.extract_strided_slice %86 {offsets = [8, 0], sizes = [8, 64], strides = [1, 1]} : vector<64x64xf32> to vector<8x64xf32>
    %cst_25 = arith.constant dense<0.000000e+00> : vector<8x64xf32>
    %93 = tpu.matmul %91, %71, %cst_25 {dimension_numbers = #tpu.dot_dimension_numbers<[1], [0], [0], [1], [0, 0, 1, 1], [], []>, precision = #tpu.contract_precision<fp32>} : vector<8x64xf32>, vector<64x64xf32>, vector<8x64xf32> -> vector<8x64xf32>
    %94 = arith.addf %92, %93 : vector<8x64xf32>
    %95 = math.tanh %94 : vector<8x64xf32>
    %96 = vector.extract_strided_slice %86 {offsets = [16, 0], sizes = [8, 64], strides = [1, 1]} : vector<64x64xf32> to vector<8x64xf32>
    %cst_26 = arith.constant dense<0.000000e+00> : vector<8x64xf32>
    %97 = tpu.matmul %95, %71, %cst_26 {dimension_numbers = #tpu.dot_dimension_numbers<[1], [0], [0], [1], [0, 0, 1, 1], [], []>, precision = #tpu.contract_precision<fp32>} : vector<8x64xf32>, vector<64x64xf32>, vector<8x64xf32> -> vector<8x64xf32>
    %98 = arith.addf %96, %97 : vector<8x64xf32>
    %99 = math.tanh %98 : vector<8x64xf32>
    %100 = vector.extract_strided_slice %86 {offsets = [24, 0], sizes = [8, 64], strides = [1, 1]} : vector<64x64xf32> to vector<8x64xf32>
    %cst_27 = arith.constant dense<0.000000e+00> : vector<8x64xf32>
    %101 = tpu.matmul %99, %71, %cst_27 {dimension_numbers = #tpu.dot_dimension_numbers<[1], [0], [0], [1], [0, 0, 1, 1], [], []>, precision = #tpu.contract_precision<fp32>} : vector<8x64xf32>, vector<64x64xf32>, vector<8x64xf32> -> vector<8x64xf32>
    %102 = arith.addf %100, %101 : vector<8x64xf32>
    %103 = math.tanh %102 : vector<8x64xf32>
    %104 = vector.extract_strided_slice %86 {offsets = [32, 0], sizes = [8, 64], strides = [1, 1]} : vector<64x64xf32> to vector<8x64xf32>
    %cst_28 = arith.constant dense<0.000000e+00> : vector<8x64xf32>
    %105 = tpu.matmul %103, %71, %cst_28 {dimension_numbers = #tpu.dot_dimension_numbers<[1], [0], [0], [1], [0, 0, 1, 1], [], []>, precision = #tpu.contract_precision<fp32>} : vector<8x64xf32>, vector<64x64xf32>, vector<8x64xf32> -> vector<8x64xf32>
    %106 = arith.addf %104, %105 : vector<8x64xf32>
    %107 = math.tanh %106 : vector<8x64xf32>
    %108 = vector.extract_strided_slice %86 {offsets = [40, 0], sizes = [8, 64], strides = [1, 1]} : vector<64x64xf32> to vector<8x64xf32>
    %cst_29 = arith.constant dense<0.000000e+00> : vector<8x64xf32>
    %109 = tpu.matmul %107, %71, %cst_29 {dimension_numbers = #tpu.dot_dimension_numbers<[1], [0], [0], [1], [0, 0, 1, 1], [], []>, precision = #tpu.contract_precision<fp32>} : vector<8x64xf32>, vector<64x64xf32>, vector<8x64xf32> -> vector<8x64xf32>
    %110 = arith.addf %108, %109 : vector<8x64xf32>
    %111 = math.tanh %110 : vector<8x64xf32>
    %112 = vector.extract_strided_slice %86 {offsets = [48, 0], sizes = [8, 64], strides = [1, 1]} : vector<64x64xf32> to vector<8x64xf32>
    %cst_30 = arith.constant dense<0.000000e+00> : vector<8x64xf32>
    %113 = tpu.matmul %111, %71, %cst_30 {dimension_numbers = #tpu.dot_dimension_numbers<[1], [0], [0], [1], [0, 0, 1, 1], [], []>, precision = #tpu.contract_precision<fp32>} : vector<8x64xf32>, vector<64x64xf32>, vector<8x64xf32> -> vector<8x64xf32>
    %114 = arith.addf %112, %113 : vector<8x64xf32>
    %115 = math.tanh %114 : vector<8x64xf32>
    %116 = vector.extract_strided_slice %86 {offsets = [56, 0], sizes = [8, 64], strides = [1, 1]} : vector<64x64xf32> to vector<8x64xf32>
    %cst_31 = arith.constant dense<0.000000e+00> : vector<8x64xf32>
    %117 = tpu.matmul %115, %71, %cst_31 {dimension_numbers = #tpu.dot_dimension_numbers<[1], [0], [0], [1], [0, 0, 1, 1], [], []>, precision = #tpu.contract_precision<fp32>} : vector<8x64xf32>, vector<64x64xf32>, vector<8x64xf32> -> vector<8x64xf32>
    %118 = arith.addf %116, %117 : vector<8x64xf32>
    %119 = math.tanh %118 : vector<8x64xf32>
    %c0_32 = arith.constant 0 : index
    %c0_33 = arith.constant 0 : index
    %120 = vector.load %arg7[%c0_32, %c0_33] : memref<64x5xf32, #tpu.memory_space<vmem>>, vector<64x5xf32>
    %cst_34 = arith.constant dense<0.000000e+00> : vector<8x5xf32>
    %121 = tpu.matmul %119, %120, %cst_34 {dimension_numbers = #tpu.dot_dimension_numbers<[1], [0], [0], [1], [0, 0, 1, 1], [], []>, precision = #tpu.contract_precision<fp32>} : vector<8x64xf32>, vector<64x5xf32>, vector<8x5xf32> -> vector<8x5xf32>
    %c0_35 = arith.constant 0 : index
    %c0_36 = arith.constant 0 : index
    %122 = vector.load %arg8[%c0_35, %c0_36] : memref<1x5xf32, #tpu.memory_space<vmem>>, vector<1x5xf32>
    %123 = vector.broadcast %122 : vector<1x5xf32> to vector<8x5xf32>
    %124 = arith.addf %121, %123 : vector<8x5xf32>
    %c0_37 = arith.constant 0 : index
    %c0_38 = arith.constant 0 : index
    %125 = vector.load %arg9[%c0_37, %c0_38] : memref<8x5xf32, #tpu.memory_space<vmem>>, vector<8x5xf32>
    tpu.vector_store %arg9[%c0_37, %c0_38], %124 {strides = array<i32>} : memref<8x5xf32, #tpu.memory_space<vmem>>, vector<8x5xf32>,
    return
  }
}

</mosaic_0001>

<bundles_post_ra>
// kernel: birnn_classifier_forward.1
= control target key start
LH: loop header
LB: loop body
LE: loop exit
PB: predicated region body
PF: predicated region fallthrough
CT: control target
= control target key end

     0   :  { %14 = vsyncpa [#allocation3], 0  ;;  %s17317_s0 = inlined_call_operand.vmem [shape: f32[64,16], index: 0, kind: input, shape index: {}]   ;;  %s17318_s1 = inlined_call_operand.hbm [shape: f32[16,64], index: 1, kind: input, shape index: {}]   ;;  %s17319_s2 = inlined_call_operand.vmem [shape: f32[64,64], index: 2, kind: input, shape index: {}]   ;;  %s17320_s3 = inlined_call_operand.vmem [shape: f32[1,64], index: 3, kind: input, shape index: {}]   ;;  %s17321_s4 = inlined_call_operand.vmem [shape: f32[64,64], index: 4, kind: input, shape index: {}]   ;;  %s17322_s5 = inlined_call_operand.vmem [shape: f32[64,64], index: 5, kind: input, shape index: {}]   ;;  %s17323_s6 = inlined_call_operand.vmem [shape: f32[1,64], index: 6, kind: input, shape index: {}]   ;;  %s17324_s7 = inlined_call_operand.vmem [shape: f32[64,5], index: 7, kind: input, shape index: {}]   ;;  %s17325_s8 = inlined_call_operand.hbm [shape: f32[1,5], index: 8, kind: input, shape index: {}]   ;;  %s17326_s9 = inlined_call_operand.vmem [shape: f32[8,5], index: 9, kind: output, shape index: {}]  }
   0x1   :  { %15 = vsyncpa [#allocation5], 0  ;;  %s14372_s30 = smov [#allocation2]  }
   0x2   :  { %s23_s10 = sshll.u32 %s14372_s30, 4  ;;  %s24_s10 = int_to_ptr.vmem [resolvable:$true] %s23_s10 }
   0x3   :  { %s14336_s11 = scalar_lea.vmem %s24_s10, 256  ;;  %p14341_p1 = scmp.lt.s32.totalorder %s24_s10, %s24_s10 }
   0x4   :  { %p14337_p0 = scmp.ne.s32.totalorder %s24_s10, %s14336_s11  ;;  %p14342_p2 = scmp.lt.s32.totalorder %s14336_s11, %s14336_s11 }
   0x6   :  { %p14343_p3 = por %p14342_p2, %p14341_p1 }
   0x8   :  { %p14344_p4 = pnand %p14343_p3, %p14337_p0 }
   0xa   :  { %14347 = shalt.err (!%p14344_p4)
}
   0xb   :  { %s14373_s12 = smov 128   ;;  %s14374_s13 = smov 8  }
   0xc   :  { %29 = dma.hbm_to_vmem [thread:$0]  %s17318_s1, 256, %s24_s10, [#allocation3], %s14373_s12, %s14373_s12, %s14374_s13  }
   0xd   :  { %s14375_s16 = smov [#allocation4]  }
   0xe   :  { %s48_s17 = sshll.u32 %s14375_s16, 4  ;;  %s49_s17 = int_to_ptr.vmem [resolvable:$true] %s48_s17 }
   0xf   :  { %s14356_s18 = scalar_lea.vmem %s49_s17, 16  ;;  %s14360_s19 = scalar_lea.vmem %s49_s17, 32 }
  0x10   :  { %p14357_p5 = scmp.ne.s32.totalorder %s49_s17, %s14356_s18  ;;  %p14361_p6 = scmp.lt.s32.totalorder %s49_s17, %s49_s17 }
  0x11   :  { %p14362_p7 = scmp.lt.s32.totalorder %s14360_s19, %s14356_s18 }
  0x13   :  { %p14363_p8 = por %p14362_p7, %p14361_p6 }
  0x15   :  { %p14364_p9 = pnand %p14363_p8, %p14357_p5 }
  0x17   :  { %14367 = shalt.err (!%p14364_p9)
}
  0x18   :  { %51 = dma.hbm_to_vmem [thread:$0]  %s17325_s8, 16, %s49_s17, [#allocation5]  }
  0x19   :  { %14368 = dma.done.wait [#allocation3], 256  }
  0x1a   :  { %14369 = vsyncadd [#allocation3], 4294967040 }
  0x1b   :  { %14370 = dma.done.wait [#allocation5], 16  }
  0x1c   :  { %14371 = vsyncadd [#allocation5], 4294967280  ;;  %vm83_vm0 = vcmask 130048   ;;  %v67_v0 = vld [vmem:[#allocation2 + $0x8] sm:$0xff]  ;;  %v66_v1 = vld [vmem:[#allocation2] sm:$0xff]  ;;  %vm14377_vm1 = vmmov 0  }
  0x1d   :  { %v58_v2 = vld [vmem:[%s17317_s0] sm:$0xff]  ;;  %v14437_v3 = vand.u32 4294901760, %v67_v0  ;;  %v14439_v4 = vand.u32 4294901760, %v66_v1  ;;  %v59_v6 = vld [vmem:[%s17317_s0 + $0x8] sm:$0xff]  ;;  %v60_v7 = vld [vmem:[%s17317_s0 + $0x10] sm:$0xff]  ;;  %vm868_vm2 = vcmask 261120  }
  0x1e   :  { %v85_v5 = vsel %vm83_vm0, %v58_v2, 0  ;;  %v61_v8 = vld [vmem:[%s17317_s0 + $0x18] sm:$0xff]  ;;  %v88_v10 = vsel %vm83_vm0, %v59_v6, 0  ;;  %v91_v11 = vsel %vm83_vm0, %v60_v7, 0  ;;  %v62_v13 = vld [vmem:[%s17317_s0 + $0x20] sm:$0xff]  ;;  %v63_v14 = vld [vmem:[%s17317_s0 + $0x28] sm:$0xff] }
  0x1f   :  { %v14451_v9 = vand.u32 4294901760, %v85_v5  ;;  %v94_v12 = vsel %vm83_vm0, %v61_v8, 0  ;;  %12088 = vmatprep.subr.mxu0 %v14437_v3  ;;  %v285_v15 = vsub.f32 %v67_v0, %v14437_v3  ;;  %v14464_v16 = vand.u32 4294901760, %v88_v10  ;;  %v64_v39 = vld [vmem:[%s17317_s0 + $0x30] sm:$0xff]  ;;  %v65_v40 = vld [vmem:[%s17317_s0 + $0x38] sm:$0xff] }
  0x20   :  { %v14467_v17 = vsub.f32 %v66_v1, %v14439_v4  ;;  %v14469_v18 = vand.u32 4294901760, %v91_v11  ;;  %12089 = vmatpush3.msra.mxu0 %v14437_v3  ;;  %v14476_v20 = vand.u32 4294901760, %v94_v12  ;;  %v97_v21 = vsel %vm83_vm0, %v62_v13, 0  ;;  %v75_v6 = vld [vmem:[%s17319_s2 + $0x38] sm:$0xff]  ;;  %v74_v7 = vld [vmem:[%s17319_s2 + $0x30] sm:$0xff]  ;;  %v72_v13 = vld [vmem:[%s17319_s2 + $0x20] sm:$0xff] }
  0x21   :  { %v14473_v19 = vsub.f32 %v85_v5, %v14451_v9  ;;  %12108 = vmatprep.mubr.f32.mxu1 %v14451_v9  ;;  %v100_v22 = vsel %vm83_vm0, %v63_v14, 0  ;;  %12090 = vmatprep.subr.mxu0 %v14439_v4  ;;  %v14481_v23 = vand.u32 4294901760, %v285_v15  ;;  %v14484_v24 = vsub.f32 %v88_v10, %v14464_v16 }
  0x22   :  { %v14487_v25 = vand.u32 4294901760, %v14467_v17  ;;  %v14490_v26 = vsub.f32 %v91_v11, %v14469_v18  ;;  %12091 = vmatpush3.msra.mxu0 %v14439_v4  ;;  %v14495_v28 = vsub.f32 %v94_v12, %v14476_v20  ;;  %v14497_v29 = vand.u32 4294901760, %v97_v21  ;;  %v73_v11 = vld [vmem:[%s17319_s2 + $0x28] sm:$0xff] }
  0x23   :  { %v177_v27 = vand.u32 4294901760, %v14473_v19  ;;  %v14499_v30 = vand.u32 4294901760, %v100_v22  ;;  %v287_v31 = vsub.f32 %v285_v15, %v14481_v23  ;;  %v187_v32 = vand.u32 4294901760, %v14484_v24  ;;  %12120 = vmatprep.subr.mxu0 %v285_v15 }
  0x24   :  { %v294_v33 = vsub.f32 %v14467_v17, %v14487_v25  ;;  %v197_v34 = vand.u32 4294901760, %v14490_v26  ;;  %v207_v36 = vand.u32 4294901760, %v14495_v28  ;;  %v14511_v37 = vsub.f32 %v97_v21, %v14497_v29  ;;  %v71_v21 = vld [vmem:[%s17319_s2 + $0x18] sm:$0xff] }
  0x25   :  { %v178_v35 = vsub.f32 %v14473_v19, %v177_v27  ;;  %v14514_v38 = vsub.f32 %v100_v22, %v14499_v30  ;;  %v288_v41 = vand.u32 4294901760, %v287_v31  ;;  %v188_v42 = vsub.f32 %v14484_v24, %v187_v32 }
  0x26   :  { %v295_v43 = vand.u32 4294901760, %v294_v33  ;;  %v198_v44 = vsub.f32 %v14490_v26, %v197_v34  ;;  %v208_v46 = vsub.f32 %v14495_v28, %v207_v36  ;;  %v217_v47 = vand.u32 4294901760, %v14511_v37 }
  0x27   :  { %v179_v45 = vand.u32 4294901760, %v178_v35  ;;  %v227_v48 = vand.u32 4294901760, %v14514_v38  ;;  %12104 = vmatprep.subr.mxu1 %v288_v41  ;;  %v189_v49 = vand.u32 4294901760, %v188_v42  ;;  %v103_v50 = vsel %vm83_vm0, %v64_v39, 0 }
  0x28   :  { %v106_v51 = vsel %vm83_vm0, %v65_v40, 0  ;;  %12105 = vmatpush3.msra.mxu1 %v288_v41  ;;  %v199_v52 = vand.u32 4294901760, %v198_v44  ;;  %v218_v53 = vsub.f32 %v14511_v37, %v217_v47  ;;  %v14538_v54 = vand.u32 4294901760, %v103_v50 }
  0x29   :  { %12092 = vmatprep.mubr.f32.mxu0 %v179_v45  ;;  %12106 = vmatprep.subr.mxu1 %v295_v43  ;;  %v209_v55 = vand.u32 4294901760, %v208_v46  ;;  %v228_v56 = vsub.f32 %v14514_v38, %v227_v48  ;;  %v14543_v57 = vand.u32 4294901760, %v106_v51  ;;  %v14581_v8 = vand.u32 4294901760, %v75_v6 }
  0x2a   :  { %12093 = vmatmul.mubr.f32.vlgmr.msra.gmra.mxu0 %v189_v49  ;;  %12107 = vmatpush3.msra.mxu1 %v295_v43  ;;  %v219_v58 = vand.u32 4294901760, %v218_v53  ;;  %v14546_v59 = vsub.f32 %v103_v50, %v14538_v54  ;;  %v14586_v10 = vand.u32 4294901760, %v74_v7  ;;  %v14607_v14 = vand.u32 4294901760, %v73_v11  ;;  %v11011_v53 = vld [vmem:[%s17320_s3] ss:$0 sm:$0xff] }
  0x2b   :  { %12121 = vmatpush3.msra.mxu0 %v285_v15  ;;  %12109 = vmatmul.mubr.f32.vlgmr.msra.gmra.mxu1 %v14464_v16  ;;  %v14551_v60 = vsub.f32 %v106_v51, %v14543_v57  ;;  %v229_v62 = vand.u32 4294901760, %v228_v56  ;;  %v14598_v12 = vsub.f32 %v75_v6, %v14581_v8  ;;  %v17327_v15 = vmov 0.0  }
  0x2c   :  { %12136 = vmatprep.subr.mxu1 %v14437_v3  ;;  %12095 = vmatprep.mubr.f32.mxu0 %v199_v52  ;;  %v237_v61 = vand.u32 4294901760, %v14546_v59  ;;  %vm877_vm3 = vcmask 523264   ;;  %vm11003_vm4 = vcmask 39936  }
  0x2d   :  { %12137 = vmatpush3.msra.mxu1 %v14437_v3  ;;  %12111 = vmatprep.mubr.f32.mxu1 %v14469_v18  ;;  %v247_v63 = vand.u32 4294901760, %v14551_v60 }
  0x2e   :  { %12096 = vmatmul.mubr.f32.gmra.mxu0 %v209_v55  ;;  %12122 = vmatprep.subr.mxu0 %v14467_v17  ;;  %v238_v0 = vsub.f32 %v14546_v59, %v237_v61 }
  0x2f   :  { %12098 = vmatprep.mubr.f32.mxu0 %v219_v58  ;;  %12112 = vmatmul.mubr.f32.gmra.mxu1 %v14476_v20  ;;  %v248_v1 = vsub.f32 %v14551_v60, %v247_v63 }
  0x30   :  { %12123 = vmatpush3.msra.mxu0 %v14467_v17  ;;  %12114 = vmatprep.mubr.f32.mxu1 %v14497_v29  ;;  %v239_v2 = vand.u32 4294901760, %v238_v0  ;;  %v14619_v17 = vand.u32 4294901760, %v14598_v12 }
  0x31   :  { %12138 = vmatprep.subr.mxu1 %v14439_v4  ;;  %v249_v5 = vand.u32 4294901760, %v248_v1  ;;  %12152 = vmatprep.subr.mxu0 %v14481_v23 }
  0x32   :  { %12099 = vmatmul.mubr.f32.gmra.mxu0 %v229_v62  ;;  %12139 = vmatpush3.msra.mxu1 %v14439_v4 }
  0x33   :  { %12101 = vmatprep.mubr.f32.mxu0 %v239_v2  ;;  %12115 = vmatmul.mubr.f32.gmra.mxu1 %v14499_v30 }
  0x34   :  { %12168 = vmatprep.subr.mxu1 %v14437_v3  ;;  %12117 = vmatprep.mubr.f32.mxu1 %v14538_v54 }
  0x36   :  { %12102 = vmatmul.mubr.f32.gmra.mxu0 %v249_v5 }
  0x37   :  { %12124 = vmatprep.mubr.f32.mxu0 %v14473_v19  ;;  %12118 = vmatmul.mubr.f32.gmra.mxu1 %v14543_v57  ;;  %v14621_v19 = vand.u32 4294901760, %v72_v13 }
  0x38   :  { %12140 = vmatprep.mubr.f32.mxu1 %v177_v27 }
  0x3a   :  { %12125 = vmatmul.mubr.f32.vlgmr.msra.gmra.mxu0 %v14484_v24  ;;  %v984_v24 = vsub.f32 %v14598_v12, %v14619_v17 }
  0x3b   :  { %12153 = vmatpush3.msra.mxu0 %v14481_v23  ;;  %12127 = vmatprep.mubr.f32.mxu0 %v14490_v26  ;;  %v70_v23 = vld [vmem:[%s17319_s2 + $0x10] sm:$0xff]  ;;  %v14645_v26 = vsub.f32 %v72_v13, %v14621_v19 }
  0x3c   :  { %12141 = vmatmul.mubr.f32.vlgmr.msra.gmra.mxu1 %v187_v32  ;;  %12154 = vmatprep.subr.mxu0 %v14487_v25  ;;  %v14654_v31 = vand.u32 4294901760, %v70_v23  ;;  %v69_v32 = vld [vmem:[%s17319_s2 + $0x8] sm:$0xff]  ;;  %v14662_v33 = vand.u32 4294901760, %v984_v24 }
  0x3d   :  { %12169 = vmatpush3.msra.mxu1 %v14437_v3  ;;  %12143 = vmatprep.mubr.f32.mxu1 %v197_v34  ;;  %v14610_v3 = vsub.f32 %v74_v7, %v14586_v10  ;;  %v14665_v34 = vand.u32 4294901760, %v14645_v26 }
  0x3e   :  { %12128 = vmatmul.mubr.f32.gmra.mxu0 %v14495_v28  ;;  %12170 = vmatprep.subr.mxu1 %v14439_v4  ;;  %17374 = vst [vmem:[#allocation9_spill] sm:$0xff] %v14662_v33  ;;  %v14683_v39 = vsub.f32 %v70_v23, %v14654_v31 }
  0x3f   :  { %12130 = vmatprep.mubr.f32.mxu0 %v14511_v37  ;;  %12155 = vmatpush3.msra.mxu0 %v14487_v25  ;;  %v14630_v22 = vand.u32 4294901760, %v14610_v3  ;;  %v14642_v25 = vand.u32 4294901760, %v71_v21  ;;  %17375 = vst [vmem:[#allocation10_spill] sm:$0xff] %v14665_v34  ;;  %v1005_v40 = vsub.f32 %v14645_v26, %v14665_v34 }
  0x40   :  { %12144 = vmatmul.mubr.f32.gmra.mxu1 %v207_v36  ;;  %12184 = vmatprep.subr.mxu0 %v17327_v15  ;;  %v68_v36 = vld [vmem:[%s17319_s2] sm:$0xff]  ;;  %v14703_v43 = vand.u32 4294901760, %v14683_v39 }
  0x41   :  { %12146 = vmatprep.mubr.f32.mxu1 %v217_v47  ;;  %12171 = vmatpush3.msra.mxu1 %v14439_v4  ;;  %v14633_v4 = vsub.f32 %v73_v11, %v14607_v14  ;;  %v991_v27 = vsub.f32 %v14610_v3, %v14630_v22  ;;  %v14668_v35 = vsub.f32 %v71_v21, %v14642_v25  ;;  %v14694_v42 = vand.u32 4294901760, %v68_v36 }
  0x42   :  { %12131 = vmatmul.mubr.f32.gmra.mxu0 %v14514_v38  ;;  %12203 = vmatprep.subr.mxu1 %v17327_v15  ;;  %v14680_v38 = vand.u32 4294901760, %v69_v32  ;;  %17379 = vst [vmem:[#allocation14_spill] sm:$0xff] %v14703_v43  ;;  %v14712_v45 = vand.u32 4294901760, %v1005_v40 }
  0x43   :  { %12133 = vmatprep.mubr.f32.mxu0 %v14546_v59  ;;  %v14652_v28 = vand.u32 4294901760, %v14633_v4  ;;  %v14676_v37 = vand.u32 4294901760, %v991_v27  ;;  %v14692_v41 = vand.u32 4294901760, %v14668_v35  ;;  %v14717_v47 = vsub.f32 %v68_v36, %v14694_v42 }
  0x44   :  { %12147 = vmatmul.mubr.f32.gmra.mxu1 %v227_v48  ;;  %v14706_v44 = vsub.f32 %v69_v32, %v14680_v38  ;;  %17380 = vst [vmem:[#allocation15_spill] sm:$0xff] %v14712_v45 }
  0x45   :  { %12149 = vmatprep.mubr.f32.mxu1 %v237_v61  ;;  %17373 = vst [vmem:[#allocation8_spill] sm:$0xff] %v14652_v28  ;;  %17376 = vst [vmem:[#allocation11_spill] sm:$0xff] %v14676_v37  ;;  %v1012_v46 = vsub.f32 %v14668_v35, %v14692_v41  ;;  %v14735_v49 = vand.u32 4294901760, %v14717_v47 }
  0x46   :  { %12134 = vmatmul.mubr.f32.gmra.mxu0 %v14551_v60  ;;  %17377 = vst [vmem:[#allocation12_spill] sm:$0xff] %v14692_v41  ;;  %v14726_v48 = vand.u32 4294901760, %v14706_v44 }
  0x47   :  { %12156 = vmatprep.mubr.f32.mxu0 %v14451_v9  ;;  %17383 = vst [vmem:[#allocation18_spill] sm:$0xff] %v14735_v49 }
  0x48   :  { %12150 = vmatmul.mubr.f32.gmra.mxu1 %v247_v63  ;;  %17381 = vst [vmem:[#allocation16_spill] sm:$0xff] %v14726_v48  ;;  %v1026_v51 = vsub.f32 %v14706_v44, %v14726_v48 }
  0x49   :  { %12172 = vmatprep.mubr.f32.mxu1 %v14451_v9  ;;  %v998_v9 = vsub.f32 %v14633_v4, %v14652_v28 }
  0x4a   :  { %12157 = vmatmul.mubr.f32.vlgmr.msra.gmra.mxu0 %v14464_v16  ;;  %v14755_v52 = vand.u32 4294901760, %v1026_v51 }
  0x4b   :  { %12185 = vmatpush3.msra.mxu0 %v14581_v8  ;;  %12159 = vmatprep.mubr.f32.mxu0 %v14469_v18 }
  0x4c   :  { %12186 = vmatprep.subr.mxu0 %v17327_v15  ;;  %12173 = vmatmul.mubr.f32.vlgmr.msra.gmra.mxu1 %v14464_v16  ;;  %v14700_v16 = vand.u32 4294901760, %v998_v9  ;;  %17385 = vst [vmem:[#allocation20_spill] sm:$0xff] %v14755_v52 }
  0x4d   :  { %12187 = vmatpush3.msra.mxu0 %v14586_v10  ;;  %12204 = vmatpush3.msra.mxu1 %v14662_v33 }
  0x4e   :  { %12188 = vmatprep.subr.mxu0 %v17327_v15  ;;  %12205 = vmatprep.subr.mxu1 %v17327_v15  ;;  %17378 = vst [vmem:[#allocation13_spill] sm:$0xff] %v14700_v16 }
  0x4f   :  { %12160 = vmatmul.mubr.f32.gmra.mxu0 %v14476_v20  ;;  %12206 = vmatpush3.msra.mxu1 %v14676_v37 }
  0x50   :  { %12189 = vmatpush3.msra.mxu0 %v14607_v14  ;;  %12175 = vmatprep.mubr.f32.mxu1 %v14469_v18  ;;  %v1019_v18 = vsub.f32 %v14683_v39, %v14703_v43 }
  0x51   :  { %12190 = vmatprep.subr.mxu0 %v17327_v15  ;;  %12207 = vmatprep.subr.mxu1 %v17327_v15 }
  0x52   :  { %12176 = vmatmul.mubr.f32.gmra.mxu1 %v14476_v20  ;;  %12191 = vmatpush3.msra.mxu0 %v14621_v19  ;;  %v14732_v20 = vand.u32 4294901760, %v1012_v46  ;;  %v14741_v50 = vand.u32 4294901760, %v1019_v18 }
  0x53   :  { %12208 = vmatpush3.msra.mxu1 %v14700_v16  ;;  %12162 = vmatprep.mubr.f32.mxu0 %v14497_v29 }
  0x54   :  { %12192 = vmatprep.subr.mxu0 %v17327_v15  ;;  %12209 = vmatprep.subr.mxu1 %v17327_v15  ;;  %17382 = vst [vmem:[#allocation17_spill] sm:$0xff] %v14732_v20  ;;  %17384 = vst [vmem:[#allocation19_spill] sm:$0xff] %v14741_v50 }
  0x55   :  { %12163 = vmatmul.mubr.f32.gmra.mxu0 %v14499_v30  ;;  %12210 = vmatpush3.msra.mxu1 %v14712_v45 }
  0x56   :  { %12193 = vmatpush3.msra.mxu0 %v14642_v25  ;;  %12178 = vmatprep.mubr.f32.mxu1 %v14497_v29  ;;  %v1033_v29 = vsub.f32 %v14717_v47, %v14735_v49 }
  0x57   :  { %12194 = vmatprep.subr.mxu0 %v17327_v15  ;;  %12211 = vmatprep.subr.mxu1 %v17327_v15 }
  0x58   :  { %12179 = vmatmul.mubr.f32.gmra.mxu1 %v14499_v30  ;;  %12195 = vmatpush3.msra.mxu0 %v14654_v31  ;;  %v14761_v30 = vand.u32 4294901760, %v1033_v29 }
  0x59   :  { %12212 = vmatpush3.msra.mxu1 %v14732_v20  ;;  %12165 = vmatprep.mubr.f32.mxu0 %v14538_v54 }
  0x5a   :  { %12196 = vmatprep.subr.mxu0 %v17327_v15  ;;  %12213 = vmatprep.subr.mxu1 %v17327_v15  ;;  %17386 = vst [vmem:[#allocation21_spill] sm:$0xff] %v14761_v30 }
  0x5b   :  { %12166 = vmatmul.mubr.f32.gmra.mxu0 %v14543_v57  ;;  %12214 = vmatpush3.msra.mxu1 %v14741_v50 }
  0x5c   :  { %12197 = vmatpush3.msra.mxu0 %v14680_v38  ;;  %12181 = vmatprep.mubr.f32.mxu1 %v14538_v54 }
  0x5d   :  { %12198 = vmatprep.subr.mxu0 %v17327_v15  ;;  %12215 = vmatprep.subr.mxu1 %v17327_v15 }
  0x5e   :  { %12182 = vmatmul.mubr.f32.gmra.mxu1 %v14543_v57  ;;  %12199 = vmatpush3.msra.mxu0 %v14694_v42 }
  0x5f   :  { %12216 = vmatpush3.msra.mxu1 %v14755_v52  ;;  %12200 = vmatprep.mubr.msk.f32.mxu0 %vm14377_vm1, %v17327_v15 }
  0x60   :  { %12217 = vmatprep.subr.mxu1 %v17327_v15  ;;  %12222 = vmatprep.subr.mxu0 %v17327_v15 }
  0x61   :  { %12201 = vmatmul.mubr.f32.vlgmr.msra.gmra.mxu0 %v17327_v15  ;;  %12218 = vmatpush3.msra.mxu1 %v14761_v30 }
  0x62   :  { %12223 = vmatpush3.msra.mxu0 %v14598_v12  ;;  %12219 = vmatprep.mubr.msk.f32.mxu1 %vm14377_vm1, %v17327_v15 }
  0x63   :  { %12224 = vmatprep.subr.mxu0 %v17327_v15  ;;  %12241 = vmatprep.subr.mxu1 %v17327_v15 }
  0x64   :  { %12220 = vmatmul.mubr.f32.vlgmr.msra.gmra.mxu1 %v17327_v15  ;;  %12225 = vmatpush3.msra.mxu0 %v14610_v3 }
  0x65   :  { %12242 = vmatpush3.msra.mxu1 %v14581_v8  ;;  %12226 = vmatprep.subr.mxu0 %v17327_v15 }
  0x66   :  { %12243 = vmatprep.subr.mxu1 %v17327_v15  ;;  %12227 = vmatpush3.msra.mxu0 %v14633_v4 }
  0x67   :  { %12244 = vmatpush3.msra.mxu1 %v14586_v10  ;;  %12228 = vmatprep.subr.mxu0 %v17327_v15 }
  0x68   :  { %12245 = vmatprep.subr.mxu1 %v17327_v15  ;;  %12229 = vmatpush3.msra.mxu0 %v14645_v26 }
  0x69   :  { %12246 = vmatpush3.msra.mxu1 %v14607_v14  ;;  %12230 = vmatprep.subr.mxu0 %v17327_v15 }
  0x6a   :  { %12247 = vmatprep.subr.mxu1 %v17327_v15  ;;  %12231 = vmatpush3.msra.mxu0 %v14668_v35 }
  0x6b   :  { %12248 = vmatpush3.msra.mxu1 %v14621_v19  ;;  %12232 = vmatprep.subr.mxu0 %v17327_v15 }
  0x6c   :  { %12249 = vmatprep.subr.mxu1 %v17327_v15  ;;  %12233 = vmatpush3.msra.mxu0 %v14683_v39 }
  0x6d   :  { %12250 = vmatpush3.msra.mxu1 %v14642_v25  ;;  %12234 = vmatprep.subr.mxu0 %v17327_v15 }
  0x6e   :  { %12251 = vmatprep.subr.mxu1 %v17327_v15  ;;  %12235 = vmatpush3.msra.mxu0 %v14706_v44 }
  0x6f   :  { %12252 = vmatpush3.msra.mxu1 %v14654_v31  ;;  %12236 = vmatprep.subr.mxu0 %v17327_v15 }
  0x70   :  { %12253 = vmatprep.subr.mxu1 %v17327_v15  ;;  %12237 = vmatpush3.msra.mxu0 %v14717_v47 }
  0x71   :  { %12238 = vmatprep.mubr.msk.f32.mxu0 %vm14377_vm1, %v17327_v15  ;;  %12254 = vmatpush3.msra.mxu1 %v14680_v38 }
  0x72   :  { %12239 = vmatmul.mubr.f32.vlgmr.msra.gmra.mxu0 %v17327_v15  ;;  %12255 = vmatprep.subr.mxu1 %v17327_v15 }
  0x73   :  { %12260 = vmatprep.subr.mxu0 %v17327_v15  ;;  %12256 = vmatpush3.msra.mxu1 %v14694_v42 }
  0x74   :  { %12257 = vmatprep.mubr.msk.f32.mxu1 %vm14377_vm1, %v17327_v15  ;;  %12261 = vmatpush3.msra.mxu0 %v14619_v17 }
  0x75   :  { %12258 = vmatmul.mubr.f32.vlgmr.msra.gmra.mxu1 %v17327_v15  ;;  %12262 = vmatprep.subr.mxu0 %v17327_v15 }
  0x76   :  { %12279 = vmatprep.subr.mxu1 %v17327_v15  ;;  %12263 = vmatpush3.msra.mxu0 %v14630_v22 }
  0x77   :  { %12280 = vmatpush3.msra.mxu1 %v14581_v8  ;;  %12264 = vmatprep.subr.mxu0 %v17327_v15 }
  0x78   :  { %12281 = vmatprep.subr.mxu1 %v17327_v15  ;;  %12265 = vmatpush3.msra.mxu0 %v14652_v28 }
  0x79   :  { %12282 = vmatpush3.msra.mxu1 %v14586_v10  ;;  %12266 = vmatprep.subr.mxu0 %v17327_v15 }
  0x7a   :  { %12283 = vmatprep.subr.mxu1 %v17327_v15  ;;  %12267 = vmatpush3.msra.mxu0 %v14665_v34 }
  0x7b   :  { %12284 = vmatpush3.msra.mxu1 %v14607_v14  ;;  %12268 = vmatprep.subr.mxu0 %v17327_v15 }
  0x7c   :  { %12285 = vmatprep.subr.mxu1 %v17327_v15  ;;  %12269 = vmatpush3.msra.mxu0 %v14692_v41 }
  0x7d   :  { %12286 = vmatpush3.msra.mxu1 %v14621_v19  ;;  %12270 = vmatprep.subr.mxu0 %v17327_v15 }
  0x7e   :  { %12287 = vmatprep.subr.mxu1 %v17327_v15  ;;  %12271 = vmatpush3.msra.mxu0 %v14703_v43 }
  0x7f   :  { %12288 = vmatpush3.msra.mxu1 %v14642_v25  ;;  %12272 = vmatprep.subr.mxu0 %v17327_v15 }
  0x80   :  { %12289 = vmatprep.subr.mxu1 %v17327_v15  ;;  %12273 = vmatpush3.msra.mxu0 %v14726_v48 }
  0x81   :  { %12290 = vmatpush3.msra.mxu1 %v14654_v31  ;;  %12274 = vmatprep.subr.mxu0 %v17327_v15 }
  0x82   :  { %12291 = vmatprep.subr.mxu1 %v17327_v15  ;;  %12275 = vmatpush3.msra.mxu0 %v14735_v49 }
  0x83   :  { %12276 = vmatprep.mubr.msk.f32.mxu0 %vm14377_vm1, %v17327_v15  ;;  %12292 = vmatpush3.msra.mxu1 %v14680_v38 }
  0x84   :  { %12277 = vmatmul.mubr.f32.vlgmr.msra.gmra.mxu0 %v17327_v15  ;;  %12293 = vmatprep.subr.mxu1 %v17327_v15 }
  0x85   :  { %12294 = vmatpush3.msra.mxu1 %v14694_v42  ;;  %12295 = vmatprep.mubr.msk.f32.mxu1 %vm14377_vm1, %v17327_v15 }
  0x86   :  { %12296 = vmatmul.mubr.f32.vlgmr.msra.gmra.mxu1 %v17327_v15  ;;  %12317 = vmatprep.subr.mxu1 %v17327_v15 }
  0x87   :  { %12318 = vmatpush3.msra.mxu1 %v14662_v33  ;;  %12298 = vmatprep.subr.mxu0 %v17327_v15 }
  0x88   :  { %12319 = vmatprep.subr.mxu1 %v17327_v15  ;;  %12299 = vmatpush3.msra.mxu0 %v14581_v8 }
  0x89   :  { %12320 = vmatpush3.msra.mxu1 %v14676_v37  ;;  %12300 = vmatprep.subr.mxu0 %v17327_v15 }
  0x8a   :  { %12321 = vmatprep.subr.mxu1 %v17327_v15  ;;  %12301 = vmatpush3.msra.mxu0 %v14586_v10 }
  0x8b   :  { %12322 = vmatpush3.msra.mxu1 %v14700_v16  ;;  %12302 = vmatprep.subr.mxu0 %v17327_v15 }
  0x8c   :  { %12323 = vmatprep.subr.mxu1 %v17327_v15  ;;  %12303 = vmatpush3.msra.mxu0 %v14607_v14 }
  0x8d   :  { %12324 = vmatpush3.msra.mxu1 %v14712_v45  ;;  %12304 = vmatprep.subr.mxu0 %v17327_v15 }
  0x8e   :  { %12325 = vmatprep.subr.mxu1 %v17327_v15  ;;  %12305 = vmatpush3.msra.mxu0 %v14621_v19 }
  0x8f   :  { %12326 = vmatpush3.msra.mxu1 %v14732_v20  ;;  %12306 = vmatprep.subr.mxu0 %v17327_v15 }
  0x90   :  { %12327 = vmatprep.subr.mxu1 %v17327_v15  ;;  %12333 = vmatprep.mubr.msk.f32.mxu1 %vm14377_vm1, %v17327_v15 }
  0x91   :  { %12328 = vmatpush3.msra.mxu1 %v14741_v50  ;;  %12307 = vmatpush3.msra.mxu0 %v14642_v25 }
  0x92   :  { %12329 = vmatprep.subr.mxu1 %v17327_v15  ;;  %12308 = vmatprep.subr.mxu0 %v17327_v15 }
  0x93   :  { %12330 = vmatpush3.msra.mxu1 %v14755_v52  ;;  %12309 = vmatpush3.msra.mxu0 %v14654_v31 }
  0x94   :  { %12331 = vmatprep.subr.mxu1 %v17327_v15  ;;  %12310 = vmatprep.subr.mxu0 %v17327_v15 }
  0x95   :  { %12332 = vmatpush3.msra.mxu1 %v14761_v30  ;;  %12311 = vmatpush3.msra.mxu0 %v14680_v38 }
  0x96   :  { %12355 = vmatprep.subr.mxu1 %v17327_v15  ;;  %12312 = vmatprep.subr.mxu0 %v17327_v15 }
  0x97   :  { %12313 = vmatpush3.msra.mxu0 %v14694_v42  ;;  %12314 = vmatprep.mubr.msk.f32.mxu0 %vm14377_vm1, %v17327_v15 }
  0x98   :  { %12336 = vmatprep.subr.mxu0 %v17327_v15 }
  0xea   :  { %v12094_v54 = vpop.f32.mrf.mxu0 }
  0xeb   :  { %v192_v55 = vadd.f32 %v12094_v54, %v11011_v53  ;;  %v12110_v57 = vpop.f32.mrf.mxu1 }
  0xec   :  { %v181_v56 = vpop.f32.mrf.mxu0 }
  0xed   :  { %v339_v58 = vadd.f32 %v12110_v57, %v192_v55  ;;  %v332_v60 = vpop.f32.mrf.mxu1 }
  0xee   :  { %v12097_v59 = vpop.f32.mrf.mxu0 }
  0xef   :  { %v212_v61 = vadd.f32 %v12097_v59, %v11011_v53  ;;  %v12113_v63 = vpop.f32.mrf.mxu1 }
  0xf0   :  { %v201_v62 = vpop.f32.mrf.mxu0 }
  0xf1   :  { %v351_v0 = vadd.f32 %v12113_v63, %v212_v61  ;;  %v344_v2 = vpop.f32.mrf.mxu1 }
  0xf2   :  { %v12100_v1 = vpop.f32.mrf.mxu0 }
  0xf3   :  { %v232_v5 = vadd.f32 %v12100_v1, %v11011_v53  ;;  %v12116_v7 = vpop.f32.mrf.mxu1 }
  0xf4   :  { %v221_v6 = vpop.f32.mrf.mxu0 }
  0xf5   :  { %v363_v11 = vadd.f32 %v12116_v7, %v232_v5  ;;  %v356_v21 = vpop.f32.mrf.mxu1 }
  0xf6   :  { %v12103_v13 = vpop.f32.mrf.mxu0 }
  0xf7   :  { %v12119_v24 = vpop.f32.mrf.mxu1 }
  0xf8   :  { %v241_v23 = vpop.f32.mrf.mxu0 }
  0xf9   :  { %v368_v27 = vpop.f32.mrf.mxu1  ;;  %v242_v48 = vadd.f32 %v11011_v53, %v241_v23 }
  0xfa   :  { %v12126_v32 = vpop.f32.mrf.mxu0 }
  0xfb   :  { %v458_v36 = vadd.f32 %v12126_v32, %v339_v58  ;;  %v202_v58 = vadd.f32 %v11011_v53, %v201_v62 }
  0xfc   :  { %v450_v9 = vpop.f32.mrf.mxu0  ;;  %v12142_v40 = vpop.f32.mrf.mxu1 }
  0xfd   :  { %v583_v46 = vadd.f32 %v12142_v40, %v458_v36  ;;  %v222_v40 = vadd.f32 %v11011_v53, %v221_v6 }
  0xfe   :  { %v12129_v18 = vpop.f32.mrf.mxu0  ;;  %v574_v51 = vpop.f32.mrf.mxu1 }
  0xff   :  { %v472_v29 = vadd.f32 %v12129_v18, %v351_v0  ;;  %v345_v18 = vadd.f32 %v344_v2, %v202_v58  ;;  %v357_v37 = vadd.f32 %v356_v21, %v222_v40  ;;  %v369_v58 = vadd.f32 %v368_v27, %v242_v48 }
 0x100   :  { %v464_v54 = vpop.f32.mrf.mxu0  ;;  %v12145_v55 = vpop.f32.mrf.mxu1 }
 0x101   :  { %v599_v57 = vadd.f32 %v12145_v55, %v472_v29  ;;  %v182_v55 = vadd.f32 %v11011_v53, %v181_v56  ;;  %v465_v49 = vadd.f32 %v464_v54, %v345_v18 }
 0x102   :  { %v12132_v59 = vpop.f32.mrf.mxu0  ;;  %v590_v61 = vpop.f32.mrf.mxu1 }
 0x103   :  { %v486_v63 = vadd.f32 %v12132_v59, %v363_v11  ;;  %v252_v59 = vadd.f32 %v12103_v13, %v11011_v53  ;;  %v333_v62 = vadd.f32 %v332_v60, %v182_v55  ;;  %v591_v41 = vadd.f32 %v590_v61, %v465_v49 }
 0x104   :  { %v478_v1 = vpop.f32.mrf.mxu0  ;;  %v12148_v5 = vpop.f32.mrf.mxu1 }
 0x105   :  { %v615_v7 = vadd.f32 %v12148_v5, %v486_v63  ;;  %v479_v33 = vadd.f32 %v478_v1, %v357_v37 }
 0x106   :  { %v12135_v15 = vpop.f32.mrf.mxu0  ;;  %v606_v30 = vpop.f32.mrf.mxu1 }
 0x107   :  { %v607_v56 = vadd.f32 %v606_v30, %v479_v33 }
 0x108   :  { %v492_v52 = vpop.f32.mrf.mxu0  ;;  %v12151_v50 = vpop.f32.mrf.mxu1 }
 0x109   :  { %v493_v13 = vadd.f32 %v492_v52, %v369_v58 }
 0x10a   :  { %v622_v32 = vpop.f32.mrf.mxu1  ;;  %v12158_v20 = vpop.f32.mrf.mxu0 }
 0x10b   :  { %v714_v36 = vadd.f32 %v12158_v20, %v583_v46  ;;  %v375_v20 = vadd.f32 %v12119_v24, %v252_v59  ;;  %v451_v46 = vadd.f32 %v450_v9, %v333_v62  ;;  %v623_v48 = vadd.f32 %v622_v32, %v493_v13 }
 0x10c   :  { %v707_v45 = vpop.f32.mrf.mxu0  ;;  %v12174_v0 = vpop.f32.mrf.mxu1 }
 0x10d   :  { %v829_v16 = vadd.f32 %v12174_v0, %v714_v36  ;;  %v500_v36 = vadd.f32 %v12135_v15, %v375_v20  ;;  %v575_v53 = vadd.f32 %v574_v51, %v451_v46 }
 0x10e   :  { %v822_v29 = vpop.f32.mrf.mxu1 }
 0x10f   :  { %v12161_v11 = vpop.f32.mrf.mxu0  ;;  %v631_v60 = vadd.f32 %v12151_v50, %v500_v36 }
 0x110   :  { %v726_v63 = vadd.f32 %v12161_v11, %v599_v57 }
 0x111   :  { %v719_v5 = vpop.f32.mrf.mxu0 }
 0x112   :  { %v12177_v43 = vpop.f32.mrf.mxu1  ;;  %v720_v28 = vadd.f32 %v719_v5, %v591_v41 }
 0x113   :  { %v841_v34 = vadd.f32 %v12177_v43, %v726_v63  ;;  %v708_v43 = vadd.f32 %v707_v45, %v575_v53 }
 0x114   :  { %v834_v6 = vpop.f32.mrf.mxu1 }
 0x115   :  { %v12164_v2 = vpop.f32.mrf.mxu0  ;;  %v835_v37 = vadd.f32 %v834_v6, %v720_v28  ;;  %v823_v45 = vadd.f32 %v822_v29, %v708_v43  ;;  %v17388_v43 = vld [vmem:[#allocation8_spill] sm:$0xff] }
 0x116   :  { %v738_v54 = vadd.f32 %v12164_v2, %v615_v7 }
 0x117   :  { %v731_v0 = vpop.f32.mrf.mxu0 }
 0x118   :  { %v732_v21 = vadd.f32 %v731_v0, %v607_v56  ;;  %v12180_v57 = vpop.f32.mrf.mxu1 }
 0x119   :  { %v853_v23 = vadd.f32 %v12180_v57, %v738_v54 }
 0x11a   :  { %v846_v49 = vpop.f32.mrf.mxu1 }
 0x11b   :  { %v14892_v24 = vsel %vm868_vm2, %v835_v37, %v853_v23  ;;  %v14895_v41 = vsel %vm868_vm2, %v853_v23, %v835_v37  ;;  %v12167_v15 = vpop.f32.mrf.mxu0  ;;  %v847_v33 = vadd.f32 %v846_v49, %v732_v21  ;;  %v17387_v37 = vmov 0.0  }
 0x11c   :  { %v750_v30 = vadd.f32 %v12167_v15, %v631_v60  ;;  %v17389_v15 = vld [vmem:[#allocation10_spill] sm:$0xff] }
 0x11d   :  { %v743_v52 = vpop.f32.mrf.mxu0  ;;  %v14898_v27 = vsel %vm868_vm2, %v841_v34, %v847_v33  ;;  %v14901_v28 = vsel %vm868_vm2, %v847_v33, %v841_v34  ;;  %v17390_v33 = vld [vmem:[#allocation12_spill] sm:$0xff] }
 0x11e   :  { %v744_v50 = vadd.f32 %v743_v52, %v623_v48  ;;  %v12183_v9 = vpop.f32.mrf.mxu1  ;;  %v17391_v48 = vld [vmem:[#allocation14_spill] sm:$0xff]  ;;  %v17393_v52 = vld [vmem:[#allocation16_spill] sm:$0xff] }
 0x11f   :  { %v865_v51 = vadd.f32 %v12183_v9, %v750_v30  ;;  %v17392_v30 = vld [vmem:[#allocation9_spill] sm:$0xff]  ;;  %v17395_v9 = vld [vmem:[#allocation18_spill] sm:$0xff] }
 0x120   :  { %v858_v61 = vpop.f32.mrf.mxu1 }
 0x121   :  { %v14904_v1 = vsel %vm868_vm2, %v865_v51, %v823_v45  ;;  %v859_v7 = vadd.f32 %v858_v61, %v744_v50  ;;  %v960_v40 = vpop.f32.mrf.mxu0  ;;  %v869_v54 = vsel %vm868_vm2, %v823_v45, %v865_v51  ;;  %v17394_v50 = vld [vmem:[#allocation11_spill] sm:$0xff]  ;;  %v17396_v45 = vld [vmem:[#allocation13_spill] sm:$0xff] }
 0x122   :  { %v17397_v51 = vld [vmem:[#allocation15_spill] sm:$0xff]  ;;  %v17398_v61 = vld [vmem:[#allocation17_spill] sm:$0xff] }
 0x123   :  { %v12202_v18 = vpop.f32.mrf.mxu0  ;;  %v14907_v32 = vsel %vm868_vm2, %v829_v16, %v859_v7  ;;  %v14910_v55 = vsel %vm868_vm2, %v859_v7, %v829_v16  ;;  %v17399_v7 = vld [vmem:[#allocation19_spill] sm:$0xff] }
 0x124   :  { %v1071_v11 = vpop.f32.mrf.mxu1  ;;  %v17401_v18 = vld [vmem:[#allocation21_spill] sm:$0xff] }
 0x125   :  { %v1072_v62 = vadd.f32 %v1071_v11, %v960_v40  ;;  %v17400_v40 = vld [vmem:[#allocation20_spill] sm:$0xff] }
 0x126   :  { %v12221_v34 = vpop.f32.mrf.mxu1 }
 0x132   :  { %v1159_v59 = vpop.f32.mrf.mxu0 }
 0x133   :  { %v1160_v20 = vadd.f32 %v1159_v59, %v1072_v62 }
 0x134   :  { %v12240_v63 = vpop.f32.mrf.mxu0 }
 0x135   :  { %v1240_v5 = vpop.f32.mrf.mxu1 }
 0x136   :  { %v1241_v6 = vadd.f32 %v1240_v5, %v1160_v20 }
 0x137   :  { %v12259_v29 = vpop.f32.mrf.mxu1 }
 0x144   :  { %v1335_v46 = vpop.f32.mrf.mxu0 }
 0x145   :  { %v1336_v2 = vadd.f32 %v1335_v46, %v1241_v6 }
 0x146   :  { %v12278_v58 = vpop.f32.mrf.mxu0  ;;  %v1414_v36 = vpop.f32.mrf.mxu1 }
 0x147   :  { %v1415_v56 = vadd.f32 %v1414_v36, %v1336_v2 }
 0x148   :  { %v12297_v0 = vpop.f32.mrf.mxu1 }
 0x149   :  { %v1418_v13 = vadd.f32 %v1415_v56, %v869_v54 }
 0x14b   :  { %14296 = vtanh.f32 %v1418_v13 }
 0x158   :  { %v14913_v16 = vpop.eup %14296 }
 0x159   :  { %v1421_v21 = vsel %vm877_vm3, %v14913_v16, 0 }
 0x15a   :  { %v14917_v57 = vand.u32 4294901760, %v1421_v21 }
 0x15c   :  { %v1497_v53 = vsub.f32 %v1421_v21, %v14917_v57  ;;  %12334 = vmatmul.mubr.f32.vlgmr.msra.gmra.mxu1 %v14917_v57 }
 0x15d   :  { %12356 = vmatpush3.msra.mxu1 %v14581_v8  ;;  %12371 = vmatprep.mubr.msk.f32.mxu1 %vm14377_vm1, %v17387_v37 }
 0x15e   :  { %12357 = vmatprep.subr.mxu1 %v17387_v37  ;;  %v1498_v23 = vand.u32 4294901760, %v1497_v53 }
 0x15f   :  { %12358 = vmatpush3.msra.mxu1 %v14586_v10 }
 0x160   :  { %12359 = vmatprep.subr.mxu1 %v17387_v37  ;;  %v1499_v60 = vsub.f32 %v1497_v53, %v1498_v23 }
 0x161   :  { %12360 = vmatpush3.msra.mxu1 %v14607_v14 }
 0x162   :  { %12361 = vmatprep.subr.mxu1 %v17387_v37  ;;  %v1500_v49 = vand.u32 4294901760, %v1499_v60 }
 0x163   :  { %12362 = vmatpush3.msra.mxu1 %v14621_v19 }
 0x164   :  { %12363 = vmatprep.subr.mxu1 %v17387_v37  ;;  %12315 = vmatmul.mubr.f32.vlgmr.msra.gmra.mxu0 %v1500_v49 }
 0x165   :  { %12337 = vmatpush3.msra.mxu0 %v14598_v12  ;;  %12364 = vmatpush3.msra.mxu1 %v14642_v25 }
 0x166   :  { %12338 = vmatprep.subr.mxu0 %v17387_v37  ;;  %12365 = vmatprep.subr.mxu1 %v17387_v37 }
 0x167   :  { %12339 = vmatpush3.msra.mxu0 %v14610_v3  ;;  %12366 = vmatpush3.msra.mxu1 %v14654_v31 }
 0x168   :  { %12340 = vmatprep.subr.mxu0 %v17387_v37  ;;  %12367 = vmatprep.subr.mxu1 %v17387_v37 }
 0x169   :  { %12341 = vmatpush3.msra.mxu0 %v14633_v4  ;;  %12368 = vmatpush3.msra.mxu1 %v14680_v38 }
 0x16a   :  { %12342 = vmatprep.subr.mxu0 %v17387_v37  ;;  %12369 = vmatprep.subr.mxu1 %v17387_v37 }
 0x16b   :  { %12343 = vmatpush3.msra.mxu0 %v14645_v26  ;;  %12370 = vmatpush3.msra.mxu1 %v14694_v42 }
 0x16c   :  { %12344 = vmatprep.subr.mxu0 %v17387_v37  ;;  %12372 = vmatmul.mubr.f32.vlgmr.msra.gmra.mxu1 %v1498_v23 }
 0x16d   :  { %12393 = vmatprep.subr.mxu1 %v17387_v37  ;;  %12345 = vmatpush3.msra.mxu0 %v14668_v35 }
 0x16e   :  { %12394 = vmatpush3.msra.mxu1 %v14581_v8  ;;  %12346 = vmatprep.subr.mxu0 %v17387_v37 }
 0x16f   :  { %12395 = vmatprep.subr.mxu1 %v17387_v37  ;;  %12347 = vmatpush3.msra.mxu0 %v14683_v39 }
 0x170   :  { %12396 = vmatpush3.msra.mxu1 %v14586_v10  ;;  %12348 = vmatprep.subr.mxu0 %v17387_v37 }
 0x171   :  { %12397 = vmatprep.subr.mxu1 %v17387_v37  ;;  %12349 = vmatpush3.msra.mxu0 %v14706_v44 }
 0x172   :  { %12398 = vmatpush3.msra.mxu1 %v14607_v14  ;;  %12350 = vmatprep.subr.mxu0 %v17387_v37 }
 0x173   :  { %12399 = vmatprep.subr.mxu1 %v17387_v37  ;;  %12351 = vmatpush3.msra.mxu0 %v14717_v47 }
 0x174   :  { %12352 = vmatprep.mubr.msk.f32.mxu0 %vm14377_vm1, %v17387_v37  ;;  %12400 = vmatpush3.msra.mxu1 %v14621_v19 }
 0x175   :  { %12353 = vmatmul.mubr.f32.vlgmr.msra.gmra.mxu0 %v1497_v53  ;;  %12374 = vmatprep.subr.mxu0 %v17387_v37 }
 0x176   :  { %12401 = vmatprep.subr.mxu1 %v17387_v37  ;;  %12375 = vmatpush3.msra.mxu0 %v14619_v17 }
 0x177   :  { %12402 = vmatpush3.msra.mxu1 %v14642_v25  ;;  %12376 = vmatprep.subr.mxu0 %v17387_v37 }
 0x178   :  { %12403 = vmatprep.subr.mxu1 %v17387_v37  ;;  %12377 = vmatpush3.msra.mxu0 %v14630_v22 }
 0x179   :  { %12404 = vmatpush3.msra.mxu1 %v14654_v31  ;;  %12378 = vmatprep.subr.mxu0 %v17387_v37 }
 0x17a   :  { %12405 = vmatprep.subr.mxu1 %v17387_v37  ;;  %12379 = vmatpush3.msra.mxu0 %v17388_v43 }
 0x17b   :  { %12406 = vmatpush3.msra.mxu1 %v14680_v38  ;;  %12380 = vmatprep.subr.mxu0 %v17387_v37 }
 0x17c   :  { %12407 = vmatprep.subr.mxu1 %v17387_v37  ;;  %12381 = vmatpush3.msra.mxu0 %v17389_v15 }
 0x17d   :  { %12408 = vmatpush3.msra.mxu1 %v14694_v42  ;;  %12409 = vmatprep.mubr.msk.f32.mxu1 %vm14377_vm1, %v17387_v37 }
 0x17e   :  { %12382 = vmatprep.subr.mxu0 %v17387_v37  ;;  %12410 = vmatmul.mubr.f32.vlgmr.msra.gmra.mxu1 %v14917_v57 }
 0x17f   :  { %12383 = vmatpush3.msra.mxu0 %v17390_v33  ;;  %12390 = vmatprep.mubr.msk.f32.mxu0 %vm14377_vm1, %v17387_v37 }
 0x180   :  { %12384 = vmatprep.subr.mxu0 %v17387_v37  ;;  %12431 = vmatprep.subr.mxu1 %v17387_v37 }
 0x181   :  { %12385 = vmatpush3.msra.mxu0 %v17391_v48  ;;  %12432 = vmatpush3.msra.mxu1 %v17392_v30 }
 0x182   :  { %12386 = vmatprep.subr.mxu0 %v17387_v37  ;;  %12433 = vmatprep.subr.mxu1 %v17387_v37 }
 0x183   :  { %12387 = vmatpush3.msra.mxu0 %v17393_v52  ;;  %12434 = vmatpush3.msra.mxu1 %v17394_v50 }
 0x184   :  { %12388 = vmatprep.subr.mxu0 %v17387_v37  ;;  %12435 = vmatprep.subr.mxu1 %v17387_v37 }
 0x185   :  { %12389 = vmatpush3.msra.mxu0 %v17395_v9  ;;  %12436 = vmatpush3.msra.mxu1 %v17396_v45 }
 0x186   :  { %12391 = vmatmul.mubr.f32.vlgmr.msra.gmra.mxu0 %v14917_v57  ;;  %12437 = vmatprep.subr.mxu1 %v17387_v37 }
 0x187   :  { %12438 = vmatpush3.msra.mxu1 %v17397_v51  ;;  %12412 = vmatprep.subr.mxu0 %v17387_v37 }
 0x188   :  { %12439 = vmatprep.subr.mxu1 %v17387_v37  ;;  %12413 = vmatpush3.msra.mxu0 %v14581_v8 }
 0x189   :  { %12440 = vmatpush3.msra.mxu1 %v17398_v61  ;;  %12414 = vmatprep.subr.mxu0 %v17387_v37 }
 0x18a   :  { %12441 = vmatprep.subr.mxu1 %v17387_v37  ;;  %12415 = vmatpush3.msra.mxu0 %v14586_v10 }
 0x18b   :  { %12442 = vmatpush3.msra.mxu1 %v17399_v7  ;;  %12416 = vmatprep.subr.mxu0 %v17387_v37 }
 0x18c   :  { %12443 = vmatprep.subr.mxu1 %v17387_v37  ;;  %12417 = vmatpush3.msra.mxu0 %v14607_v14 }
 0x18d   :  { %12444 = vmatpush3.msra.mxu1 %v17400_v40  ;;  %12418 = vmatprep.subr.mxu0 %v17387_v37 }
 0x18e   :  { %12445 = vmatprep.subr.mxu1 %v17387_v37  ;;  %12419 = vmatpush3.msra.mxu0 %v14621_v19 }
 0x18f   :  { %12446 = vmatpush3.msra.mxu1 %v17401_v18  ;;  %12420 = vmatprep.subr.mxu0 %v17387_v37 }
 0x190   :  { %12447 = vmatprep.mubr.msk.f32.mxu1 %vm14377_vm1, %v17387_v37  ;;  %12469 = vmatprep.subr.mxu1 %v17387_v37 }
 0x191   :  { %12421 = vmatpush3.msra.mxu0 %v14642_v25  ;;  %12428 = vmatprep.mubr.msk.f32.mxu0 %vm14377_vm1, %v17387_v37 }
 0x192   :  { %12422 = vmatprep.subr.mxu0 %v17387_v37 }
 0x193   :  { %12423 = vmatpush3.msra.mxu0 %v14654_v31 }
 0x194   :  { %12424 = vmatprep.subr.mxu0 %v17387_v37 }
 0x195   :  { %12425 = vmatpush3.msra.mxu0 %v14680_v38 }
 0x196   :  { %12426 = vmatprep.subr.mxu0 %v17387_v37 }
 0x197   :  { %12427 = vmatpush3.msra.mxu0 %v14694_v42 }
 0x198   :  { %12450 = vmatprep.subr.mxu0 %v17387_v37 }
 0x21c   :  { %v1613_v11 = vpop.f32.mrf.mxu1 }
 0x21e   :  { %v12335_v34 = vpop.f32.mrf.mxu1 }
 0x224   :  { %v1502_v59 = vpop.f32.mrf.mxu0 }
 0x225   :  { %v1614_v46 = vadd.f32 %v1613_v11, %v1502_v59 }
 0x226   :  { %v12316_v63 = vpop.f32.mrf.mxu0 }
 0x22c   :  { %v1782_v5 = vpop.f32.mrf.mxu1 }
 0x22e   :  { %v12373_v29 = vpop.f32.mrf.mxu1 }
 0x235   :  { %v1701_v62 = vpop.f32.mrf.mxu0 }
 0x236   :  { %v1702_v58 = vadd.f32 %v1701_v62, %v1614_v46 }
 0x237   :  { %v12354_v20 = vpop.f32.mrf.mxu0 }
 0x238   :  { %v1783_v36 = vadd.f32 %v1782_v5, %v1702_v58 }
 0x23e   :  { %v1956_v6 = vpop.f32.mrf.mxu1 }
 0x240   :  { %v12411_v2 = vpop.f32.mrf.mxu1 }
 0x246   :  { %v1877_v56 = vpop.f32.mrf.mxu0 }
 0x247   :  { %v1878_v54 = vadd.f32 %v1877_v56, %v1783_v36 }
 0x248   :  { %v12392_v0 = vpop.f32.mrf.mxu0 }
 0x249   :  { %v1957_v13 = vadd.f32 %v1956_v6, %v1878_v54 }
 0x24b   :  { %v1960_v21 = vadd.f32 %v1957_v13, %v14907_v32 }
 0x24d   :  { %14298 = vtanh.f32 %v1960_v21 }
 0x25a   :  { %v15032_v57 = vpop.eup %14298 }
 0x25b   :  { %v1963_v53 = vsel %vm877_vm3, %v15032_v57, 0 }
 0x25c   :  { %v15036_v23 = vand.u32 4294901760, %v1963_v53 }
 0x25e   :  { %v2039_v60 = vsub.f32 %v1963_v53, %v15036_v23  ;;  %12448 = vmatmul.mubr.f32.vlgmr.msra.gmra.mxu1 %v15036_v23 }
 0x25f   :  { %12470 = vmatpush3.msra.mxu1 %v14581_v8  ;;  %12485 = vmatprep.mubr.msk.f32.mxu1 %vm14377_vm1, %v17387_v37 }
 0x260   :  { %12471 = vmatprep.subr.mxu1 %v17387_v37  ;;  %v2040_v32 = vand.u32 4294901760, %v2039_v60 }
 0x261   :  { %12472 = vmatpush3.msra.mxu1 %v14586_v10 }
 0x262   :  { %12473 = vmatprep.subr.mxu1 %v17387_v37  ;;  %v2041_v49 = vsub.f32 %v2039_v60, %v2040_v32 }
 0x263   :  { %12474 = vmatpush3.msra.mxu1 %v14607_v14 }
 0x264   :  { %12475 = vmatprep.subr.mxu1 %v17387_v37  ;;  %v2042_v11 = vand.u32 4294901760, %v2041_v49 }
 0x265   :  { %12476 = vmatpush3.msra.mxu1 %v14621_v19 }
 0x266   :  { %12477 = vmatprep.subr.mxu1 %v17387_v37  ;;  %12429 = vmatmul.mubr.f32.vlgmr.msra.gmra.mxu0 %v2042_v11 }
 0x267   :  { %12451 = vmatpush3.msra.mxu0 %v14598_v12  ;;  %12478 = vmatpush3.msra.mxu1 %v14642_v25 }
 0x268   :  { %12452 = vmatprep.subr.mxu0 %v17387_v37  ;;  %12479 = vmatprep.subr.mxu1 %v17387_v37 }
 0x269   :  { %12453 = vmatpush3.msra.mxu0 %v14610_v3  ;;  %12480 = vmatpush3.msra.mxu1 %v14654_v31 }
 0x26a   :  { %12454 = vmatprep.subr.mxu0 %v17387_v37  ;;  %12481 = vmatprep.subr.mxu1 %v17387_v37 }
 0x26b   :  { %12455 = vmatpush3.msra.mxu0 %v14633_v4  ;;  %12482 = vmatpush3.msra.mxu1 %v14680_v38 }
 0x26c   :  { %12456 = vmatprep.subr.mxu0 %v17387_v37  ;;  %12483 = vmatprep.subr.mxu1 %v17387_v37 }
 0x26d   :  { %12457 = vmatpush3.msra.mxu0 %v14645_v26  ;;  %12484 = vmatpush3.msra.mxu1 %v14694_v42 }
 0x26e   :  { %12458 = vmatprep.subr.mxu0 %v17387_v37  ;;  %12486 = vmatmul.mubr.f32.vlgmr.msra.gmra.mxu1 %v2040_v32 }
 0x26f   :  { %12507 = vmatprep.subr.mxu1 %v17387_v37  ;;  %12459 = vmatpush3.msra.mxu0 %v14668_v35 }
 0x270   :  { %12508 = vmatpush3.msra.mxu1 %v14581_v8  ;;  %12460 = vmatprep.subr.mxu0 %v17387_v37 }
 0x271   :  { %12509 = vmatprep.subr.mxu1 %v17387_v37  ;;  %12461 = vmatpush3.msra.mxu0 %v14683_v39 }
 0x272   :  { %12510 = vmatpush3.msra.mxu1 %v14586_v10  ;;  %12462 = vmatprep.subr.mxu0 %v17387_v37 }
 0x273   :  { %12511 = vmatprep.subr.mxu1 %v17387_v37  ;;  %12463 = vmatpush3.msra.mxu0 %v14706_v44 }
 0x274   :  { %12512 = vmatpush3.msra.mxu1 %v14607_v14  ;;  %12464 = vmatprep.subr.mxu0 %v17387_v37 }
 0x275   :  { %12513 = vmatprep.subr.mxu1 %v17387_v37  ;;  %12465 = vmatpush3.msra.mxu0 %v14717_v47 }
 0x276   :  { %12466 = vmatprep.mubr.msk.f32.mxu0 %vm14377_vm1, %v17387_v37  ;;  %12514 = vmatpush3.msra.mxu1 %v14621_v19 }
 0x277   :  { %12467 = vmatmul.mubr.f32.vlgmr.msra.gmra.mxu0 %v2039_v60  ;;  %12488 = vmatprep.subr.mxu0 %v17387_v37 }
 0x278   :  { %12515 = vmatprep.subr.mxu1 %v17387_v37  ;;  %12489 = vmatpush3.msra.mxu0 %v14619_v17 }
 0x279   :  { %12516 = vmatpush3.msra.mxu1 %v14642_v25  ;;  %12490 = vmatprep.subr.mxu0 %v17387_v37 }
 0x27a   :  { %12517 = vmatprep.subr.mxu1 %v17387_v37  ;;  %12491 = vmatpush3.msra.mxu0 %v14630_v22 }
 0x27b   :  { %12518 = vmatpush3.msra.mxu1 %v14654_v31  ;;  %12492 = vmatprep.subr.mxu0 %v17387_v37 }
 0x27c   :  { %12519 = vmatprep.subr.mxu1 %v17387_v37  ;;  %12493 = vmatpush3.msra.mxu0 %v17388_v43 }
 0x27d   :  { %12520 = vmatpush3.msra.mxu1 %v14680_v38  ;;  %12494 = vmatprep.subr.mxu0 %v17387_v37 }
 0x27e   :  { %12521 = vmatprep.subr.mxu1 %v17387_v37  ;;  %12495 = vmatpush3.msra.mxu0 %v17389_v15 }
 0x27f   :  { %12522 = vmatpush3.msra.mxu1 %v14694_v42  ;;  %12523 = vmatprep.mubr.msk.f32.mxu1 %vm14377_vm1, %v17387_v37 }
 0x280   :  { %12496 = vmatprep.subr.mxu0 %v17387_v37  ;;  %12524 = vmatmul.mubr.f32.vlgmr.msra.gmra.mxu1 %v15036_v23 }
 0x281   :  { %12497 = vmatpush3.msra.mxu0 %v17390_v33  ;;  %12504 = vmatprep.mubr.msk.f32.mxu0 %vm14377_vm1, %v17387_v37 }
 0x282   :  { %12498 = vmatprep.subr.mxu0 %v17387_v37  ;;  %12545 = vmatprep.subr.mxu1 %v17387_v37 }
 0x283   :  { %12499 = vmatpush3.msra.mxu0 %v17391_v48  ;;  %12546 = vmatpush3.msra.mxu1 %v17392_v30 }
 0x284   :  { %12500 = vmatprep.subr.mxu0 %v17387_v37  ;;  %12547 = vmatprep.subr.mxu1 %v17387_v37 }
 0x285   :  { %12501 = vmatpush3.msra.mxu0 %v17393_v52  ;;  %12548 = vmatpush3.msra.mxu1 %v17394_v50 }
 0x286   :  { %12502 = vmatprep.subr.mxu0 %v17387_v37  ;;  %12549 = vmatprep.subr.mxu1 %v17387_v37 }
 0x287   :  { %12503 = vmatpush3.msra.mxu0 %v17395_v9  ;;  %12550 = vmatpush3.msra.mxu1 %v17396_v45 }
 0x288   :  { %12505 = vmatmul.mubr.f32.vlgmr.msra.gmra.mxu0 %v15036_v23  ;;  %12551 = vmatprep.subr.mxu1 %v17387_v37 }
 0x289   :  { %12552 = vmatpush3.msra.mxu1 %v17397_v51  ;;  %12526 = vmatprep.subr.mxu0 %v17387_v37 }
 0x28a   :  { %12553 = vmatprep.subr.mxu1 %v17387_v37  ;;  %12527 = vmatpush3.msra.mxu0 %v14581_v8 }
 0x28b   :  { %12554 = vmatpush3.msra.mxu1 %v17398_v61  ;;  %12528 = vmatprep.subr.mxu0 %v17387_v37 }
 0x28c   :  { %12555 = vmatprep.subr.mxu1 %v17387_v37  ;;  %12529 = vmatpush3.msra.mxu0 %v14586_v10 }
 0x28d   :  { %12556 = vmatpush3.msra.mxu1 %v17399_v7  ;;  %12530 = vmatprep.subr.mxu0 %v17387_v37 }
 0x28e   :  { %12557 = vmatprep.subr.mxu1 %v17387_v37  ;;  %12531 = vmatpush3.msra.mxu0 %v14607_v14 }
 0x28f   :  { %12558 = vmatpush3.msra.mxu1 %v17400_v40  ;;  %12532 = vmatprep.subr.mxu0 %v17387_v37 }
 0x290   :  { %12559 = vmatprep.subr.mxu1 %v17387_v37  ;;  %12533 = vmatpush3.msra.mxu0 %v14621_v19 }
 0x291   :  { %12560 = vmatpush3.msra.mxu1 %v17401_v18  ;;  %12534 = vmatprep.subr.mxu0 %v17387_v37 }
 0x292   :  { %12561 = vmatprep.mubr.msk.f32.mxu1 %vm14377_vm1, %v17387_v37  ;;  %12583 = vmatprep.subr.mxu1 %v17387_v37 }
 0x293   :  { %12535 = vmatpush3.msra.mxu0 %v14642_v25  ;;  %12542 = vmatprep.mubr.msk.f32.mxu0 %vm14377_vm1, %v17387_v37 }
 0x294   :  { %12536 = vmatprep.subr.mxu0 %v17387_v37 }
 0x295   :  { %12537 = vmatpush3.msra.mxu0 %v14654_v31 }
 0x296   :  { %12538 = vmatprep.subr.mxu0 %v17387_v37 }
 0x297   :  { %12539 = vmatpush3.msra.mxu0 %v14680_v38 }
 0x298   :  { %12540 = vmatprep.subr.mxu0 %v17387_v37 }
 0x299   :  { %12541 = vmatpush3.msra.mxu0 %v14694_v42 }
 0x29a   :  { %12564 = vmatprep.subr.mxu0 %v17387_v37 }
 0x31e   :  { %v2155_v34 = vpop.f32.mrf.mxu1 }
 0x320   :  { %v12449_v59 = vpop.f32.mrf.mxu1 }
 0x326   :  { %v2044_v63 = vpop.f32.mrf.mxu0 }
 0x327   :  { %v2156_v2 = vadd.f32 %v2155_v34, %v2044_v63 }
 0x328   :  { %v12430_v5 = vpop.f32.mrf.mxu0 }
 0x32e   :  { %v2324_v29 = vpop.f32.mrf.mxu1 }
 0x330   :  { %v12487_v62 = vpop.f32.mrf.mxu1 }
 0x337   :  { %v2243_v20 = vpop.f32.mrf.mxu0 }
 0x338   :  { %v2244_v36 = vadd.f32 %v2243_v20, %v2156_v2 }
 0x339   :  { %v12468_v6 = vpop.f32.mrf.mxu0 }
 0x33a   :  { %v2325_v56 = vadd.f32 %v2324_v29, %v2244_v36 }
 0x340   :  { %v2498_v46 = vpop.f32.mrf.mxu1 }
 0x342   :  { %v12525_v58 = vpop.f32.mrf.mxu1 }
 0x348   :  { %v2419_v54 = vpop.f32.mrf.mxu0 }
 0x349   :  { %v2420_v0 = vadd.f32 %v2419_v54, %v2325_v56 }
 0x34a   :  { %v12506_v13 = vpop.f32.mrf.mxu0 }
 0x34b   :  { %v2499_v21 = vadd.f32 %v2498_v46, %v2420_v0 }
 0x34d   :  { %v2502_v53 = vadd.f32 %v2499_v21, %v14892_v24 }
 0x34f   :  { %14300 = vtanh.f32 %v2502_v53 }
 0x35c   :  { %v15151_v23 = vpop.eup %14300 }
 0x35d   :  { %v2505_v60 = vsel %vm877_vm3, %v15151_v23, 0 }
 0x35e   :  { %v15155_v32 = vand.u32 4294901760, %v2505_v60 }
 0x360   :  { %v2581_v49 = vsub.f32 %v2505_v60, %v15155_v32  ;;  %12562 = vmatmul.mubr.f32.vlgmr.msra.gmra.mxu1 %v15155_v32 }
 0x361   :  { %12584 = vmatpush3.msra.mxu1 %v14581_v8  ;;  %12599 = vmatprep.mubr.msk.f32.mxu1 %vm14377_vm1, %v17387_v37 }
 0x362   :  { %12585 = vmatprep.subr.mxu1 %v17387_v37  ;;  %v2582_v24 = vand.u32 4294901760, %v2581_v49 }
 0x363   :  { %12586 = vmatpush3.msra.mxu1 %v14586_v10 }
 0x364   :  { %12587 = vmatprep.subr.mxu1 %v17387_v37  ;;  %v2583_v11 = vsub.f32 %v2581_v49, %v2582_v24 }
 0x365   :  { %12588 = vmatpush3.msra.mxu1 %v14607_v14 }
 0x366   :  { %12589 = vmatprep.subr.mxu1 %v17387_v37  ;;  %v2584_v34 = vand.u32 4294901760, %v2583_v11 }
 0x367   :  { %12590 = vmatpush3.msra.mxu1 %v14621_v19 }
 0x368   :  { %12591 = vmatprep.subr.mxu1 %v17387_v37  ;;  %12543 = vmatmul.mubr.f32.vlgmr.msra.gmra.mxu0 %v2584_v34 }
 0x369   :  { %12565 = vmatpush3.msra.mxu0 %v14598_v12  ;;  %12592 = vmatpush3.msra.mxu1 %v14642_v25 }
 0x36a   :  { %12566 = vmatprep.subr.mxu0 %v17387_v37  ;;  %12593 = vmatprep.subr.mxu1 %v17387_v37 }
 0x36b   :  { %12567 = vmatpush3.msra.mxu0 %v14610_v3  ;;  %12594 = vmatpush3.msra.mxu1 %v14654_v31 }
 0x36c   :  { %12568 = vmatprep.subr.mxu0 %v17387_v37  ;;  %12595 = vmatprep.subr.mxu1 %v17387_v37 }
 0x36d   :  { %12569 = vmatpush3.msra.mxu0 %v14633_v4  ;;  %12596 = vmatpush3.msra.mxu1 %v14680_v38 }
 0x36e   :  { %12570 = vmatprep.subr.mxu0 %v17387_v37  ;;  %12597 = vmatprep.subr.mxu1 %v17387_v37 }
 0x36f   :  { %12571 = vmatpush3.msra.mxu0 %v14645_v26  ;;  %12598 = vmatpush3.msra.mxu1 %v14694_v42 }
 0x370   :  { %12572 = vmatprep.subr.mxu0 %v17387_v37  ;;  %12600 = vmatmul.mubr.f32.vlgmr.msra.gmra.mxu1 %v2582_v24 }
 0x371   :  { %12621 = vmatprep.subr.mxu1 %v17387_v37  ;;  %12573 = vmatpush3.msra.mxu0 %v14668_v35 }
 0x372   :  { %12622 = vmatpush3.msra.mxu1 %v14581_v8  ;;  %12574 = vmatprep.subr.mxu0 %v17387_v37 }
 0x373   :  { %12623 = vmatprep.subr.mxu1 %v17387_v37  ;;  %12575 = vmatpush3.msra.mxu0 %v14683_v39 }
 0x374   :  { %12624 = vmatpush3.msra.mxu1 %v14586_v10  ;;  %12576 = vmatprep.subr.mxu0 %v17387_v37 }
 0x375   :  { %12625 = vmatprep.subr.mxu1 %v17387_v37  ;;  %12577 = vmatpush3.msra.mxu0 %v14706_v44 }
 0x376   :  { %12626 = vmatpush3.msra.mxu1 %v14607_v14  ;;  %12578 = vmatprep.subr.mxu0 %v17387_v37 }
 0x377   :  { %12627 = vmatprep.subr.mxu1 %v17387_v37  ;;  %12579 = vmatpush3.msra.mxu0 %v14717_v47 }
 0x378   :  { %12580 = vmatprep.mubr.msk.f32.mxu0 %vm14377_vm1, %v17387_v37  ;;  %12628 = vmatpush3.msra.mxu1 %v14621_v19 }
 0x379   :  { %12581 = vmatmul.mubr.f32.vlgmr.msra.gmra.mxu0 %v2581_v49  ;;  %12602 = vmatprep.subr.mxu0 %v17387_v37 }
 0x37a   :  { %12629 = vmatprep.subr.mxu1 %v17387_v37  ;;  %12603 = vmatpush3.msra.mxu0 %v14619_v17 }
 0x37b   :  { %12630 = vmatpush3.msra.mxu1 %v14642_v25  ;;  %12604 = vmatprep.subr.mxu0 %v17387_v37 }
 0x37c   :  { %12631 = vmatprep.subr.mxu1 %v17387_v37  ;;  %12605 = vmatpush3.msra.mxu0 %v14630_v22 }
 0x37d   :  { %12632 = vmatpush3.msra.mxu1 %v14654_v31  ;;  %12606 = vmatprep.subr.mxu0 %v17387_v37 }
 0x37e   :  { %12633 = vmatprep.subr.mxu1 %v17387_v37  ;;  %12607 = vmatpush3.msra.mxu0 %v17388_v43 }
 0x37f   :  { %12634 = vmatpush3.msra.mxu1 %v14680_v38  ;;  %12608 = vmatprep.subr.mxu0 %v17387_v37 }
 0x380   :  { %12635 = vmatprep.subr.mxu1 %v17387_v37  ;;  %12609 = vmatpush3.msra.mxu0 %v17389_v15 }
 0x381   :  { %12636 = vmatpush3.msra.mxu1 %v14694_v42  ;;  %12637 = vmatprep.mubr.msk.f32.mxu1 %vm14377_vm1, %v17387_v37 }
 0x382   :  { %12610 = vmatprep.subr.mxu0 %v17387_v37  ;;  %12638 = vmatmul.mubr.f32.vlgmr.msra.gmra.mxu1 %v15155_v32 }
 0x383   :  { %12611 = vmatpush3.msra.mxu0 %v17390_v33  ;;  %12618 = vmatprep.mubr.msk.f32.mxu0 %vm14377_vm1, %v17387_v37 }
 0x384   :  { %12612 = vmatprep.subr.mxu0 %v17387_v37  ;;  %12659 = vmatprep.subr.mxu1 %v17387_v37 }
 0x385   :  { %12613 = vmatpush3.msra.mxu0 %v17391_v48  ;;  %12660 = vmatpush3.msra.mxu1 %v17392_v30 }
 0x386   :  { %12614 = vmatprep.subr.mxu0 %v17387_v37  ;;  %12661 = vmatprep.subr.mxu1 %v17387_v37 }
 0x387   :  { %12615 = vmatpush3.msra.mxu0 %v17393_v52  ;;  %12662 = vmatpush3.msra.mxu1 %v17394_v50 }
 0x388   :  { %12616 = vmatprep.subr.mxu0 %v17387_v37  ;;  %12663 = vmatprep.subr.mxu1 %v17387_v37 }
 0x389   :  { %12617 = vmatpush3.msra.mxu0 %v17395_v9  ;;  %12664 = vmatpush3.msra.mxu1 %v17396_v45 }
 0x38a   :  { %12619 = vmatmul.mubr.f32.vlgmr.msra.gmra.mxu0 %v15155_v32  ;;  %12665 = vmatprep.subr.mxu1 %v17387_v37 }
 0x38b   :  { %12666 = vmatpush3.msra.mxu1 %v17397_v51  ;;  %12640 = vmatprep.subr.mxu0 %v17387_v37 }
 0x38c   :  { %12667 = vmatprep.subr.mxu1 %v17387_v37  ;;  %12641 = vmatpush3.msra.mxu0 %v14581_v8 }
 0x38d   :  { %12668 = vmatpush3.msra.mxu1 %v17398_v61  ;;  %12642 = vmatprep.subr.mxu0 %v17387_v37 }
 0x38e   :  { %12669 = vmatprep.subr.mxu1 %v17387_v37  ;;  %12643 = vmatpush3.msra.mxu0 %v14586_v10 }
 0x38f   :  { %12670 = vmatpush3.msra.mxu1 %v17399_v7  ;;  %12644 = vmatprep.subr.mxu0 %v17387_v37 }
 0x390   :  { %12671 = vmatprep.subr.mxu1 %v17387_v37  ;;  %12645 = vmatpush3.msra.mxu0 %v14607_v14 }
 0x391   :  { %12672 = vmatpush3.msra.mxu1 %v17400_v40  ;;  %12646 = vmatprep.subr.mxu0 %v17387_v37 }
 0x392   :  { %12673 = vmatprep.subr.mxu1 %v17387_v37  ;;  %12647 = vmatpush3.msra.mxu0 %v14621_v19 }
 0x393   :  { %12674 = vmatpush3.msra.mxu1 %v17401_v18  ;;  %12648 = vmatprep.subr.mxu0 %v17387_v37 }
 0x394   :  { %12675 = vmatprep.mubr.msk.f32.mxu1 %vm14377_vm1, %v17387_v37  ;;  %12697 = vmatprep.subr.mxu1 %v17387_v37 }
 0x395   :  { %12649 = vmatpush3.msra.mxu0 %v14642_v25  ;;  %12656 = vmatprep.mubr.msk.f32.mxu0 %vm14377_vm1, %v17387_v37 }
 0x396   :  { %12650 = vmatprep.subr.mxu0 %v17387_v37 }
 0x397   :  { %12651 = vmatpush3.msra.mxu0 %v14654_v31 }
 0x398   :  { %12652 = vmatprep.subr.mxu0 %v17387_v37 }
 0x399   :  { %12653 = vmatpush3.msra.mxu0 %v14680_v38 }
 0x39a   :  { %12654 = vmatprep.subr.mxu0 %v17387_v37 }
 0x39b   :  { %12655 = vmatpush3.msra.mxu0 %v14694_v42 }
 0x39c   :  { %12678 = vmatprep.subr.mxu0 %v17387_v37 }
 0x420   :  { %v2697_v59 = vpop.f32.mrf.mxu1 }
 0x422   :  { %v12563_v63 = vpop.f32.mrf.mxu1 }
 0x428   :  { %v2586_v5 = vpop.f32.mrf.mxu0 }
 0x429   :  { %v2698_v58 = vadd.f32 %v2697_v59, %v2586_v5 }
 0x42a   :  { %v12544_v29 = vpop.f32.mrf.mxu0 }
 0x430   :  { %v2866_v62 = vpop.f32.mrf.mxu1 }
 0x432   :  { %v12601_v20 = vpop.f32.mrf.mxu1 }
 0x439   :  { %v2785_v6 = vpop.f32.mrf.mxu0 }
 0x43a   :  { %v2786_v56 = vadd.f32 %v2785_v6, %v2698_v58 }
 0x43b   :  { %v12582_v46 = vpop.f32.mrf.mxu0 }
 0x43c   :  { %v2867_v54 = vadd.f32 %v2866_v62, %v2786_v56 }
 0x442   :  { %v3040_v2 = vpop.f32.mrf.mxu1 }
 0x444   :  { %v12639_v36 = vpop.f32.mrf.mxu1 }
 0x44a   :  { %v2961_v0 = vpop.f32.mrf.mxu0 }
 0x44b   :  { %v2962_v13 = vadd.f32 %v2961_v0, %v2867_v54 }
 0x44c   :  { %v12620_v21 = vpop.f32.mrf.mxu0 }
 0x44d   :  { %v3041_v53 = vadd.f32 %v3040_v2, %v2962_v13 }
 0x44f   :  { %v3044_v60 = vadd.f32 %v3041_v53, %v14898_v27 }
 0x451   :  { %14302 = vtanh.f32 %v3044_v60 }
 0x45e   :  { %v15270_v32 = vpop.eup %14302 }
 0x45f   :  { %v3047_v49 = vsel %vm877_vm3, %v15270_v32, 0 }
 0x460   :  { %v15274_v24 = vand.u32 4294901760, %v3047_v49 }
 0x462   :  { %v3123_v11 = vsub.f32 %v3047_v49, %v15274_v24  ;;  %12676 = vmatmul.mubr.f32.vlgmr.msra.gmra.mxu1 %v15274_v24 }
 0x463   :  { %12698 = vmatpush3.msra.mxu1 %v14581_v8  ;;  %12713 = vmatprep.mubr.msk.f32.mxu1 %vm14377_vm1, %v17387_v37 }
 0x464   :  { %12699 = vmatprep.subr.mxu1 %v17387_v37  ;;  %v3124_v27 = vand.u32 4294901760, %v3123_v11 }
 0x465   :  { %12700 = vmatpush3.msra.mxu1 %v14586_v10 }
 0x466   :  { %12701 = vmatprep.subr.mxu1 %v17387_v37  ;;  %v3125_v34 = vsub.f32 %v3123_v11, %v3124_v27 }
 0x467   :  { %12702 = vmatpush3.msra.mxu1 %v14607_v14 }
 0x468   :  { %12703 = vmatprep.subr.mxu1 %v17387_v37  ;;  %v3126_v59 = vand.u32 4294901760, %v3125_v34 }
 0x469   :  { %12704 = vmatpush3.msra.mxu1 %v14621_v19 }
 0x46a   :  { %12705 = vmatprep.subr.mxu1 %v17387_v37  ;;  %12657 = vmatmul.mubr.f32.vlgmr.msra.gmra.mxu0 %v3126_v59 }
 0x46b   :  { %12679 = vmatpush3.msra.mxu0 %v14598_v12  ;;  %12706 = vmatpush3.msra.mxu1 %v14642_v25 }
 0x46c   :  { %12680 = vmatprep.subr.mxu0 %v17387_v37  ;;  %12707 = vmatprep.subr.mxu1 %v17387_v37 }
 0x46d   :  { %12681 = vmatpush3.msra.mxu0 %v14610_v3  ;;  %12708 = vmatpush3.msra.mxu1 %v14654_v31 }
 0x46e   :  { %12682 = vmatprep.subr.mxu0 %v17387_v37  ;;  %12709 = vmatprep.subr.mxu1 %v17387_v37 }
 0x46f   :  { %12683 = vmatpush3.msra.mxu0 %v14633_v4  ;;  %12710 = vmatpush3.msra.mxu1 %v14680_v38 }
 0x470   :  { %12684 = vmatprep.subr.mxu0 %v17387_v37  ;;  %12711 = vmatprep.subr.mxu1 %v17387_v37 }
 0x471   :  { %12685 = vmatpush3.msra.mxu0 %v14645_v26  ;;  %12712 = vmatpush3.msra.mxu1 %v14694_v42 }
 0x472   :  { %12686 = vmatprep.subr.mxu0 %v17387_v37  ;;  %12714 = vmatmul.mubr.f32.vlgmr.msra.gmra.mxu1 %v3124_v27 }
 0x473   :  { %12735 = vmatprep.subr.mxu1 %v17387_v37  ;;  %12687 = vmatpush3.msra.mxu0 %v14668_v35 }
 0x474   :  { %12736 = vmatpush3.msra.mxu1 %v14581_v8  ;;  %12688 = vmatprep.subr.mxu0 %v17387_v37 }
 0x475   :  { %12737 = vmatprep.subr.mxu1 %v17387_v37  ;;  %12689 = vmatpush3.msra.mxu0 %v14683_v39 }
 0x476   :  { %12738 = vmatpush3.msra.mxu1 %v14586_v10  ;;  %12690 = vmatprep.subr.mxu0 %v17387_v37 }
 0x477   :  { %12739 = vmatprep.subr.mxu1 %v17387_v37  ;;  %12691 = vmatpush3.msra.mxu0 %v14706_v44 }
 0x478   :  { %12740 = vmatpush3.msra.mxu1 %v14607_v14  ;;  %12692 = vmatprep.subr.mxu0 %v17387_v37 }
 0x479   :  { %12741 = vmatprep.subr.mxu1 %v17387_v37  ;;  %12693 = vmatpush3.msra.mxu0 %v14717_v47 }
 0x47a   :  { %12694 = vmatprep.mubr.msk.f32.mxu0 %vm14377_vm1, %v17387_v37  ;;  %12742 = vmatpush3.msra.mxu1 %v14621_v19 }
 0x47b   :  { %12695 = vmatmul.mubr.f32.vlgmr.msra.gmra.mxu0 %v3123_v11  ;;  %12716 = vmatprep.subr.mxu0 %v17387_v37 }
 0x47c   :  { %12743 = vmatprep.subr.mxu1 %v17387_v37  ;;  %12717 = vmatpush3.msra.mxu0 %v14619_v17 }
 0x47d   :  { %12744 = vmatpush3.msra.mxu1 %v14642_v25  ;;  %12718 = vmatprep.subr.mxu0 %v17387_v37 }
 0x47e   :  { %12745 = vmatprep.subr.mxu1 %v17387_v37  ;;  %12719 = vmatpush3.msra.mxu0 %v14630_v22 }
 0x47f   :  { %12746 = vmatpush3.msra.mxu1 %v14654_v31  ;;  %12720 = vmatprep.subr.mxu0 %v17387_v37 }
 0x480   :  { %12747 = vmatprep.subr.mxu1 %v17387_v37  ;;  %12721 = vmatpush3.msra.mxu0 %v17388_v43 }
 0x481   :  { %12748 = vmatpush3.msra.mxu1 %v14680_v38  ;;  %12722 = vmatprep.subr.mxu0 %v17387_v37 }
 0x482   :  { %12749 = vmatprep.subr.mxu1 %v17387_v37  ;;  %12723 = vmatpush3.msra.mxu0 %v17389_v15 }
 0x483   :  { %12750 = vmatpush3.msra.mxu1 %v14694_v42  ;;  %12751 = vmatprep.mubr.msk.f32.mxu1 %vm14377_vm1, %v17387_v37 }
 0x484   :  { %12724 = vmatprep.subr.mxu0 %v17387_v37  ;;  %12752 = vmatmul.mubr.f32.vlgmr.msra.gmra.mxu1 %v15274_v24 }
 0x485   :  { %12725 = vmatpush3.msra.mxu0 %v17390_v33  ;;  %12732 = vmatprep.mubr.msk.f32.mxu0 %vm14377_vm1, %v17387_v37 }
 0x486   :  { %12726 = vmatprep.subr.mxu0 %v17387_v37  ;;  %12773 = vmatprep.subr.mxu1 %v17387_v37 }
 0x487   :  { %12727 = vmatpush3.msra.mxu0 %v17391_v48  ;;  %12774 = vmatpush3.msra.mxu1 %v17392_v30 }
 0x488   :  { %12728 = vmatprep.subr.mxu0 %v17387_v37  ;;  %12775 = vmatprep.subr.mxu1 %v17387_v37 }
 0x489   :  { %12729 = vmatpush3.msra.mxu0 %v17393_v52  ;;  %12776 = vmatpush3.msra.mxu1 %v17394_v50 }
 0x48a   :  { %12730 = vmatprep.subr.mxu0 %v17387_v37  ;;  %12777 = vmatprep.subr.mxu1 %v17387_v37 }
 0x48b   :  { %12731 = vmatpush3.msra.mxu0 %v17395_v9  ;;  %12778 = vmatpush3.msra.mxu1 %v17396_v45 }
 0x48c   :  { %12733 = vmatmul.mubr.f32.vlgmr.msra.gmra.mxu0 %v15274_v24  ;;  %12779 = vmatprep.subr.mxu1 %v17387_v37 }
 0x48d   :  { %12780 = vmatpush3.msra.mxu1 %v17397_v51  ;;  %12754 = vmatprep.subr.mxu0 %v17387_v37 }
 0x48e   :  { %12781 = vmatprep.subr.mxu1 %v17387_v37  ;;  %12755 = vmatpush3.msra.mxu0 %v14581_v8 }
 0x48f   :  { %12782 = vmatpush3.msra.mxu1 %v17398_v61  ;;  %12756 = vmatprep.subr.mxu0 %v17387_v37 }
 0x490   :  { %12783 = vmatprep.subr.mxu1 %v17387_v37  ;;  %12757 = vmatpush3.msra.mxu0 %v14586_v10 }
 0x491   :  { %12784 = vmatpush3.msra.mxu1 %v17399_v7  ;;  %12758 = vmatprep.subr.mxu0 %v17387_v37 }
 0x492   :  { %12785 = vmatprep.subr.mxu1 %v17387_v37  ;;  %12759 = vmatpush3.msra.mxu0 %v14607_v14 }
 0x493   :  { %12786 = vmatpush3.msra.mxu1 %v17400_v40  ;;  %12760 = vmatprep.subr.mxu0 %v17387_v37 }
 0x494   :  { %12787 = vmatprep.subr.mxu1 %v17387_v37  ;;  %12761 = vmatpush3.msra.mxu0 %v14621_v19 }
 0x495   :  { %12788 = vmatpush3.msra.mxu1 %v17401_v18  ;;  %12762 = vmatprep.subr.mxu0 %v17387_v37 }
 0x496   :  { %12789 = vmatprep.mubr.msk.f32.mxu1 %vm14377_vm1, %v17387_v37  ;;  %12811 = vmatprep.subr.mxu1 %v17387_v37 }
 0x497   :  { %12763 = vmatpush3.msra.mxu0 %v14642_v25  ;;  %12770 = vmatprep.mubr.msk.f32.mxu0 %vm14377_vm1, %v17387_v37 }
 0x498   :  { %12764 = vmatprep.subr.mxu0 %v17387_v37 }
 0x499   :  { %12765 = vmatpush3.msra.mxu0 %v14654_v31 }
 0x49a   :  { %12766 = vmatprep.subr.mxu0 %v17387_v37 }
 0x49b   :  { %12767 = vmatpush3.msra.mxu0 %v14680_v38 }
 0x49c   :  { %12768 = vmatprep.subr.mxu0 %v17387_v37 }
 0x49d   :  { %12769 = vmatpush3.msra.mxu0 %v14694_v42 }
 0x49e   :  { %12792 = vmatprep.subr.mxu0 %v17387_v37 }
 0x522   :  { %v3239_v63 = vpop.f32.mrf.mxu1 }
 0x524   :  { %v12677_v5 = vpop.f32.mrf.mxu1 }
 0x52a   :  { %v3128_v29 = vpop.f32.mrf.mxu0 }
 0x52b   :  { %v3240_v36 = vadd.f32 %v3239_v63, %v3128_v29 }
 0x52c   :  { %v12658_v62 = vpop.f32.mrf.mxu0 }
 0x532   :  { %v3408_v20 = vpop.f32.mrf.mxu1 }
 0x534   :  { %v12715_v6 = vpop.f32.mrf.mxu1 }
 0x53b   :  { %v3327_v46 = vpop.f32.mrf.mxu0 }
 0x53c   :  { %v3328_v54 = vadd.f32 %v3327_v46, %v3240_v36 }
 0x53d   :  { %v12696_v2 = vpop.f32.mrf.mxu0 }
 0x53e   :  { %v3409_v0 = vadd.f32 %v3408_v20, %v3328_v54 }
 0x544   :  { %v3582_v58 = vpop.f32.mrf.mxu1 }
 0x546   :  { %v12753_v56 = vpop.f32.mrf.mxu1 }
 0x54c   :  { %v3503_v13 = vpop.f32.mrf.mxu0 }
 0x54d   :  { %v3504_v21 = vadd.f32 %v3503_v13, %v3409_v0 }
 0x54e   :  { %v12734_v53 = vpop.f32.mrf.mxu0 }
 0x54f   :  { %v3583_v60 = vadd.f32 %v3582_v58, %v3504_v21 }
 0x551   :  { %v3586_v49 = vadd.f32 %v3583_v60, %v14901_v28 }
 0x553   :  { %14304 = vtanh.f32 %v3586_v49 }
 0x560   :  { %v15389_v24 = vpop.eup %14304 }
 0x561   :  { %v3589_v11 = vsel %vm877_vm3, %v15389_v24, 0 }
 0x562   :  { %v15393_v27 = vand.u32 4294901760, %v3589_v11 }
 0x564   :  { %v3665_v34 = vsub.f32 %v3589_v11, %v15393_v27  ;;  %12790 = vmatmul.mubr.f32.vlgmr.msra.gmra.mxu1 %v15393_v27 }
 0x565   :  { %12812 = vmatpush3.msra.mxu1 %v14581_v8  ;;  %12827 = vmatprep.mubr.msk.f32.mxu1 %vm14377_vm1, %v17387_v37 }
 0x566   :  { %12813 = vmatprep.subr.mxu1 %v17387_v37  ;;  %v3666_v28 = vand.u32 4294901760, %v3665_v34 }
 0x567   :  { %12814 = vmatpush3.msra.mxu1 %v14586_v10 }
 0x568   :  { %12815 = vmatprep.subr.mxu1 %v17387_v37  ;;  %v3667_v59 = vsub.f32 %v3665_v34, %v3666_v28 }
 0x569   :  { %12816 = vmatpush3.msra.mxu1 %v14607_v14 }
 0x56a   :  { %12817 = vmatprep.subr.mxu1 %v17387_v37  ;;  %v3668_v63 = vand.u32 4294901760, %v3667_v59 }
 0x56b   :  { %12818 = vmatpush3.msra.mxu1 %v14621_v19 }
 0x56c   :  { %12819 = vmatprep.subr.mxu1 %v17387_v37  ;;  %12771 = vmatmul.mubr.f32.vlgmr.msra.gmra.mxu0 %v3668_v63 }
 0x56d   :  { %12793 = vmatpush3.msra.mxu0 %v14598_v12  ;;  %12820 = vmatpush3.msra.mxu1 %v14642_v25 }
 0x56e   :  { %12794 = vmatprep.subr.mxu0 %v17387_v37  ;;  %12821 = vmatprep.subr.mxu1 %v17387_v37 }
 0x56f   :  { %12795 = vmatpush3.msra.mxu0 %v14610_v3  ;;  %12822 = vmatpush3.msra.mxu1 %v14654_v31 }
 0x570   :  { %12796 = vmatprep.subr.mxu0 %v17387_v37  ;;  %12823 = vmatprep.subr.mxu1 %v17387_v37 }
 0x571   :  { %12797 = vmatpush3.msra.mxu0 %v14633_v4  ;;  %12824 = vmatpush3.msra.mxu1 %v14680_v38 }
 0x572   :  { %12798 = vmatprep.subr.mxu0 %v17387_v37  ;;  %12825 = vmatprep.subr.mxu1 %v17387_v37 }
 0x573   :  { %12799 = vmatpush3.msra.mxu0 %v14645_v26  ;;  %12826 = vmatpush3.msra.mxu1 %v14694_v42 }
 0x574   :  { %12800 = vmatprep.subr.mxu0 %v17387_v37  ;;  %12828 = vmatmul.mubr.f32.vlgmr.msra.gmra.mxu1 %v3666_v28 }
 0x575   :  { %12849 = vmatprep.subr.mxu1 %v17387_v37  ;;  %12801 = vmatpush3.msra.mxu0 %v14668_v35 }
 0x576   :  { %12850 = vmatpush3.msra.mxu1 %v14581_v8  ;;  %12802 = vmatprep.subr.mxu0 %v17387_v37 }
 0x577   :  { %12851 = vmatprep.subr.mxu1 %v17387_v37  ;;  %12803 = vmatpush3.msra.mxu0 %v14683_v39 }
 0x578   :  { %12852 = vmatpush3.msra.mxu1 %v14586_v10  ;;  %12804 = vmatprep.subr.mxu0 %v17387_v37 }
 0x579   :  { %12853 = vmatprep.subr.mxu1 %v17387_v37  ;;  %12805 = vmatpush3.msra.mxu0 %v14706_v44 }
 0x57a   :  { %12854 = vmatpush3.msra.mxu1 %v14607_v14  ;;  %12806 = vmatprep.subr.mxu0 %v17387_v37 }
 0x57b   :  { %12855 = vmatprep.subr.mxu1 %v17387_v37  ;;  %12807 = vmatpush3.msra.mxu0 %v14717_v47 }
 0x57c   :  { %12808 = vmatprep.mubr.msk.f32.mxu0 %vm14377_vm1, %v17387_v37  ;;  %12856 = vmatpush3.msra.mxu1 %v14621_v19 }
 0x57d   :  { %12809 = vmatmul.mubr.f32.vlgmr.msra.gmra.mxu0 %v3665_v34  ;;  %12830 = vmatprep.subr.mxu0 %v17387_v37 }
 0x57e   :  { %12857 = vmatprep.subr.mxu1 %v17387_v37  ;;  %12831 = vmatpush3.msra.mxu0 %v14619_v17 }
 0x57f   :  { %12858 = vmatpush3.msra.mxu1 %v14642_v25  ;;  %12832 = vmatprep.subr.mxu0 %v17387_v37 }
 0x580   :  { %12859 = vmatprep.subr.mxu1 %v17387_v37  ;;  %12833 = vmatpush3.msra.mxu0 %v14630_v22 }
 0x581   :  { %12860 = vmatpush3.msra.mxu1 %v14654_v31  ;;  %12834 = vmatprep.subr.mxu0 %v17387_v37 }
 0x582   :  { %12861 = vmatprep.subr.mxu1 %v17387_v37  ;;  %12835 = vmatpush3.msra.mxu0 %v17388_v43 }
 0x583   :  { %12862 = vmatpush3.msra.mxu1 %v14680_v38  ;;  %12836 = vmatprep.subr.mxu0 %v17387_v37 }
 0x584   :  { %12863 = vmatprep.subr.mxu1 %v17387_v37  ;;  %12837 = vmatpush3.msra.mxu0 %v17389_v15 }
 0x585   :  { %12864 = vmatpush3.msra.mxu1 %v14694_v42  ;;  %12865 = vmatprep.mubr.msk.f32.mxu1 %vm14377_vm1, %v17387_v37 }
 0x586   :  { %12838 = vmatprep.subr.mxu0 %v17387_v37  ;;  %12866 = vmatmul.mubr.f32.vlgmr.msra.gmra.mxu1 %v15393_v27 }
 0x587   :  { %12839 = vmatpush3.msra.mxu0 %v17390_v33  ;;  %12846 = vmatprep.mubr.msk.f32.mxu0 %vm14377_vm1, %v17387_v37 }
 0x588   :  { %12840 = vmatprep.subr.mxu0 %v17387_v37  ;;  %12887 = vmatprep.subr.mxu1 %v17387_v37 }
 0x589   :  { %12841 = vmatpush3.msra.mxu0 %v17391_v48  ;;  %12888 = vmatpush3.msra.mxu1 %v17392_v30 }
 0x58a   :  { %12842 = vmatprep.subr.mxu0 %v17387_v37  ;;  %12889 = vmatprep.subr.mxu1 %v17387_v37 }
 0x58b   :  { %12843 = vmatpush3.msra.mxu0 %v17393_v52  ;;  %12890 = vmatpush3.msra.mxu1 %v17394_v50 }
 0x58c   :  { %12844 = vmatprep.subr.mxu0 %v17387_v37  ;;  %12891 = vmatprep.subr.mxu1 %v17387_v37 }
 0x58d   :  { %12845 = vmatpush3.msra.mxu0 %v17395_v9  ;;  %12892 = vmatpush3.msra.mxu1 %v17396_v45 }
 0x58e   :  { %12847 = vmatmul.mubr.f32.vlgmr.msra.gmra.mxu0 %v15393_v27  ;;  %12893 = vmatprep.subr.mxu1 %v17387_v37 }
 0x58f   :  { %12894 = vmatpush3.msra.mxu1 %v17397_v51  ;;  %12868 = vmatprep.subr.mxu0 %v17387_v37 }
 0x590   :  { %12895 = vmatprep.subr.mxu1 %v17387_v37  ;;  %12869 = vmatpush3.msra.mxu0 %v14581_v8 }
 0x591   :  { %12896 = vmatpush3.msra.mxu1 %v17398_v61  ;;  %12870 = vmatprep.subr.mxu0 %v17387_v37 }
 0x592   :  { %12897 = vmatprep.subr.mxu1 %v17387_v37  ;;  %12871 = vmatpush3.msra.mxu0 %v14586_v10 }
 0x593   :  { %12898 = vmatpush3.msra.mxu1 %v17399_v7  ;;  %12872 = vmatprep.subr.mxu0 %v17387_v37 }
 0x594   :  { %12899 = vmatprep.subr.mxu1 %v17387_v37  ;;  %12873 = vmatpush3.msra.mxu0 %v14607_v14 }
 0x595   :  { %12900 = vmatpush3.msra.mxu1 %v17400_v40  ;;  %12874 = vmatprep.subr.mxu0 %v17387_v37 }
 0x596   :  { %12901 = vmatprep.subr.mxu1 %v17387_v37  ;;  %12875 = vmatpush3.msra.mxu0 %v14621_v19 }
 0x597   :  { %12902 = vmatpush3.msra.mxu1 %v17401_v18  ;;  %12876 = vmatprep.subr.mxu0 %v17387_v37 }
 0x598   :  { %12903 = vmatprep.mubr.msk.f32.mxu1 %vm14377_vm1, %v17387_v37  ;;  %12925 = vmatprep.subr.mxu1 %v17387_v37 }
 0x599   :  { %12877 = vmatpush3.msra.mxu0 %v14642_v25  ;;  %12884 = vmatprep.mubr.msk.f32.mxu0 %vm14377_vm1, %v17387_v37 }
 0x59a   :  { %12878 = vmatprep.subr.mxu0 %v17387_v37 }
 0x59b   :  { %12879 = vmatpush3.msra.mxu0 %v14654_v31 }
 0x59c   :  { %12880 = vmatprep.subr.mxu0 %v17387_v37 }
 0x59d   :  { %12881 = vmatpush3.msra.mxu0 %v14680_v38 }
 0x59e   :  { %12882 = vmatprep.subr.mxu0 %v17387_v37 }
 0x59f   :  { %12883 = vmatpush3.msra.mxu0 %v14694_v42 }
 0x5a0   :  { %12906 = vmatprep.subr.mxu0 %v17387_v37 }
 0x624   :  { %v3781_v5 = vpop.f32.mrf.mxu1 }
 0x626   :  { %v12791_v29 = vpop.f32.mrf.mxu1 }
 0x62c   :  { %v3670_v62 = vpop.f32.mrf.mxu0 }
 0x62d   :  { %v3782_v56 = vadd.f32 %v3781_v5, %v3670_v62 }
 0x62e   :  { %v12772_v20 = vpop.f32.mrf.mxu0 }
 0x634   :  { %v3950_v6 = vpop.f32.mrf.mxu1 }
 0x636   :  { %v12829_v46 = vpop.f32.mrf.mxu1 }
 0x63d   :  { %v3869_v2 = vpop.f32.mrf.mxu0 }
 0x63e   :  { %v3870_v0 = vadd.f32 %v3869_v2, %v3782_v56 }
 0x63f   :  { %v12810_v58 = vpop.f32.mrf.mxu0 }
 0x640   :  { %v3951_v13 = vadd.f32 %v3950_v6, %v3870_v0 }
 0x646   :  { %v4124_v36 = vpop.f32.mrf.mxu1 }
 0x648   :  { %v12867_v54 = vpop.f32.mrf.mxu1 }
 0x64e   :  { %v4045_v21 = vpop.f32.mrf.mxu0 }
 0x64f   :  { %v4046_v53 = vadd.f32 %v4045_v21, %v3951_v13 }
 0x650   :  { %v12848_v60 = vpop.f32.mrf.mxu0 }
 0x651   :  { %v4125_v49 = vadd.f32 %v4124_v36, %v4046_v53 }
 0x653   :  { %v4128_v11 = vadd.f32 %v4125_v49, %v14895_v41 }
 0x655   :  { %14306 = vtanh.f32 %v4128_v11 }
 0x662   :  { %v15508_v27 = vpop.eup %14306 }
 0x663   :  { %v4131_v34 = vsel %vm877_vm3, %v15508_v27, 0 }
 0x664   :  { %v15512_v28 = vand.u32 4294901760, %v4131_v34 }
 0x666   :  { %v4207_v59 = vsub.f32 %v4131_v34, %v15512_v28  ;;  %12904 = vmatmul.mubr.f32.vlgmr.msra.gmra.mxu1 %v15512_v28 }
 0x667   :  { %12926 = vmatpush3.msra.mxu1 %v14581_v8  ;;  %12941 = vmatprep.mubr.msk.f32.mxu1 %vm14377_vm1, %v17387_v37 }
 0x668   :  { %12927 = vmatprep.subr.mxu1 %v17387_v37  ;;  %v4208_v41 = vand.u32 4294901760, %v4207_v59 }
 0x669   :  { %12928 = vmatpush3.msra.mxu1 %v14586_v10 }
 0x66a   :  { %12929 = vmatprep.subr.mxu1 %v17387_v37  ;;  %v4209_v63 = vsub.f32 %v4207_v59, %v4208_v41 }
 0x66b   :  { %12930 = vmatpush3.msra.mxu1 %v14607_v14 }
 0x66c   :  { %12931 = vmatprep.subr.mxu1 %v17387_v37  ;;  %v4210_v5 = vand.u32 4294901760, %v4209_v63 }
 0x66d   :  { %12932 = vmatpush3.msra.mxu1 %v14621_v19 }
 0x66e   :  { %12933 = vmatprep.subr.mxu1 %v17387_v37  ;;  %12885 = vmatmul.mubr.f32.vlgmr.msra.gmra.mxu0 %v4210_v5 }
 0x66f   :  { %12907 = vmatpush3.msra.mxu0 %v14598_v12  ;;  %12934 = vmatpush3.msra.mxu1 %v14642_v25 }
 0x670   :  { %12908 = vmatprep.subr.mxu0 %v17387_v37  ;;  %12935 = vmatprep.subr.mxu1 %v17387_v37 }
 0x671   :  { %12909 = vmatpush3.msra.mxu0 %v14610_v3  ;;  %12936 = vmatpush3.msra.mxu1 %v14654_v31 }
 0x672   :  { %12910 = vmatprep.subr.mxu0 %v17387_v37  ;;  %12937 = vmatprep.subr.mxu1 %v17387_v37 }
 0x673   :  { %12911 = vmatpush3.msra.mxu0 %v14633_v4  ;;  %12938 = vmatpush3.msra.mxu1 %v14680_v38 }
 0x674   :  { %12912 = vmatprep.subr.mxu0 %v17387_v37  ;;  %12939 = vmatprep.subr.mxu1 %v17387_v37 }
 0x675   :  { %12913 = vmatpush3.msra.mxu0 %v14645_v26  ;;  %12940 = vmatpush3.msra.mxu1 %v14694_v42 }
 0x676   :  { %12914 = vmatprep.subr.mxu0 %v17387_v37  ;;  %12942 = vmatmul.mubr.f32.vlgmr.msra.gmra.mxu1 %v4208_v41 }
 0x677   :  { %12963 = vmatprep.subr.mxu1 %v17387_v37  ;;  %12915 = vmatpush3.msra.mxu0 %v14668_v35 }
 0x678   :  { %12964 = vmatpush3.msra.mxu1 %v14581_v8  ;;  %12916 = vmatprep.subr.mxu0 %v17387_v37 }
 0x679   :  { %12965 = vmatprep.subr.mxu1 %v17387_v37  ;;  %12917 = vmatpush3.msra.mxu0 %v14683_v39 }
 0x67a   :  { %12966 = vmatpush3.msra.mxu1 %v14586_v10  ;;  %12918 = vmatprep.subr.mxu0 %v17387_v37 }
 0x67b   :  { %12967 = vmatprep.subr.mxu1 %v17387_v37  ;;  %12919 = vmatpush3.msra.mxu0 %v14706_v44 }
 0x67c   :  { %12968 = vmatpush3.msra.mxu1 %v14607_v14  ;;  %12920 = vmatprep.subr.mxu0 %v17387_v37 }
 0x67d   :  { %12969 = vmatprep.subr.mxu1 %v17387_v37  ;;  %12921 = vmatpush3.msra.mxu0 %v14717_v47 }
 0x67e   :  { %12922 = vmatprep.mubr.msk.f32.mxu0 %vm14377_vm1, %v17387_v37  ;;  %12970 = vmatpush3.msra.mxu1 %v14621_v19 }
 0x67f   :  { %12923 = vmatmul.mubr.f32.vlgmr.msra.gmra.mxu0 %v4207_v59  ;;  %12944 = vmatprep.subr.mxu0 %v17387_v37 }
 0x680   :  { %12971 = vmatprep.subr.mxu1 %v17387_v37  ;;  %12945 = vmatpush3.msra.mxu0 %v14619_v17 }
 0x681   :  { %12972 = vmatpush3.msra.mxu1 %v14642_v25  ;;  %12946 = vmatprep.subr.mxu0 %v17387_v37 }
 0x682   :  { %12973 = vmatprep.subr.mxu1 %v17387_v37  ;;  %12947 = vmatpush3.msra.mxu0 %v14630_v22 }
 0x683   :  { %12974 = vmatpush3.msra.mxu1 %v14654_v31  ;;  %12948 = vmatprep.subr.mxu0 %v17387_v37 }
 0x684   :  { %12975 = vmatprep.subr.mxu1 %v17387_v37  ;;  %12949 = vmatpush3.msra.mxu0 %v17388_v43 }
 0x685   :  { %12976 = vmatpush3.msra.mxu1 %v14680_v38  ;;  %12950 = vmatprep.subr.mxu0 %v17387_v37 }
 0x686   :  { %12977 = vmatprep.subr.mxu1 %v17387_v37  ;;  %12951 = vmatpush3.msra.mxu0 %v17389_v15 }
 0x687   :  { %12978 = vmatpush3.msra.mxu1 %v14694_v42  ;;  %12979 = vmatprep.mubr.msk.f32.mxu1 %vm14377_vm1, %v17387_v37 }
 0x688   :  { %12952 = vmatprep.subr.mxu0 %v17387_v37  ;;  %12980 = vmatmul.mubr.f32.vlgmr.msra.gmra.mxu1 %v15512_v28 }
 0x689   :  { %12953 = vmatpush3.msra.mxu0 %v17390_v33  ;;  %12960 = vmatprep.mubr.msk.f32.mxu0 %vm14377_vm1, %v17387_v37 }
 0x68a   :  { %12954 = vmatprep.subr.mxu0 %v17387_v37  ;;  %13001 = vmatprep.subr.mxu1 %v17387_v37 }
 0x68b   :  { %12955 = vmatpush3.msra.mxu0 %v17391_v48  ;;  %13002 = vmatpush3.msra.mxu1 %v17392_v30 }
 0x68c   :  { %12956 = vmatprep.subr.mxu0 %v17387_v37  ;;  %13003 = vmatprep.subr.mxu1 %v17387_v37 }
 0x68d   :  { %12957 = vmatpush3.msra.mxu0 %v17393_v52  ;;  %13004 = vmatpush3.msra.mxu1 %v17394_v50 }
 0x68e   :  { %12958 = vmatprep.subr.mxu0 %v17387_v37  ;;  %13005 = vmatprep.subr.mxu1 %v17387_v37 }
 0x68f   :  { %12959 = vmatpush3.msra.mxu0 %v17395_v9  ;;  %13006 = vmatpush3.msra.mxu1 %v17396_v45 }
 0x690   :  { %12961 = vmatmul.mubr.f32.vlgmr.msra.gmra.mxu0 %v15512_v28  ;;  %13007 = vmatprep.subr.mxu1 %v17387_v37 }
 0x691   :  { %13008 = vmatpush3.msra.mxu1 %v17397_v51  ;;  %12982 = vmatprep.subr.mxu0 %v17387_v37 }
 0x692   :  { %13009 = vmatprep.subr.mxu1 %v17387_v37  ;;  %12983 = vmatpush3.msra.mxu0 %v14581_v8 }
 0x693   :  { %13010 = vmatpush3.msra.mxu1 %v17398_v61  ;;  %12984 = vmatprep.subr.mxu0 %v17387_v37 }
 0x694   :  { %13011 = vmatprep.subr.mxu1 %v17387_v37  ;;  %12985 = vmatpush3.msra.mxu0 %v14586_v10 }
 0x695   :  { %13012 = vmatpush3.msra.mxu1 %v17399_v7  ;;  %12986 = vmatprep.subr.mxu0 %v17387_v37 }
 0x696   :  { %13013 = vmatprep.subr.mxu1 %v17387_v37  ;;  %12987 = vmatpush3.msra.mxu0 %v14607_v14 }
 0x697   :  { %13014 = vmatpush3.msra.mxu1 %v17400_v40  ;;  %12988 = vmatprep.subr.mxu0 %v17387_v37 }
 0x698   :  { %13015 = vmatprep.subr.mxu1 %v17387_v37  ;;  %12989 = vmatpush3.msra.mxu0 %v14621_v19 }
 0x699   :  { %13016 = vmatpush3.msra.mxu1 %v17401_v18  ;;  %12990 = vmatprep.subr.mxu0 %v17387_v37 }
 0x69a   :  { %13017 = vmatprep.mubr.msk.f32.mxu1 %vm14377_vm1, %v17387_v37  ;;  %13039 = vmatprep.subr.mxu1 %v17387_v37 }
 0x69b   :  { %12991 = vmatpush3.msra.mxu0 %v14642_v25  ;;  %12998 = vmatprep.mubr.msk.f32.mxu0 %vm14377_vm1, %v17387_v37 }
 0x69c   :  { %12992 = vmatprep.subr.mxu0 %v17387_v37 }
 0x69d   :  { %12993 = vmatpush3.msra.mxu0 %v14654_v31 }
 0x69e   :  { %12994 = vmatprep.subr.mxu0 %v17387_v37 }
 0x69f   :  { %12995 = vmatpush3.msra.mxu0 %v14680_v38 }
 0x6a0   :  { %12996 = vmatprep.subr.mxu0 %v17387_v37 }
 0x6a1   :  { %12997 = vmatpush3.msra.mxu0 %v14694_v42 }
 0x6a2   :  { %13020 = vmatprep.subr.mxu0 %v17387_v37 }
 0x726   :  { %v4323_v30 = vpop.f32.mrf.mxu1 }
 0x728   :  { %v12905_v50 = vpop.f32.mrf.mxu1 }
 0x72e   :  { %v4212_v45 = vpop.f32.mrf.mxu0 }
 0x72f   :  { %v4324_v62 = vadd.f32 %v4323_v30, %v4212_v45 }
 0x730   :  { %v12886_v51 = vpop.f32.mrf.mxu0 }
 0x736   :  { %v4492_v61 = vpop.f32.mrf.mxu1 }
 0x738   :  { %v12943_v7 = vpop.f32.mrf.mxu1 }
 0x73f   :  { %v4411_v40 = vpop.f32.mrf.mxu0 }
 0x740   :  { %v4412_v6 = vadd.f32 %v4411_v40, %v4324_v62 }
 0x741   :  { %v12924_v18 = vpop.f32.mrf.mxu0 }
 0x742   :  { %v4493_v46 = vadd.f32 %v4492_v61, %v4412_v6 }
 0x748   :  { %v4666_v29 = vpop.f32.mrf.mxu1 }
 0x74a   :  { %v12981_v20 = vpop.f32.mrf.mxu1 }
 0x750   :  { %v4587_v2 = vpop.f32.mrf.mxu0 }
 0x751   :  { %v4588_v58 = vadd.f32 %v4587_v2, %v4493_v46 }
 0x752   :  { %v12962_v36 = vpop.f32.mrf.mxu0 }
 0x753   :  { %v4667_v56 = vadd.f32 %v4666_v29, %v4588_v58 }
 0x755   :  { %v4670_v54 = vadd.f32 %v4667_v56, %v14910_v55 }
 0x757   :  { %14308 = vtanh.f32 %v4670_v54 }
 0x764   :  { %v15627_v0 = vpop.eup %14308 }
 0x765   :  { %v4673_v13 = vsel %vm877_vm3, %v15627_v0, 0 }
 0x766   :  { %v15631_v21 = vand.u32 4294901760, %v4673_v13 }
 0x768   :  { %v4749_v53 = vsub.f32 %v4673_v13, %v15631_v21  ;;  %13018 = vmatmul.mubr.f32.vlgmr.msra.gmra.mxu1 %v15631_v21 }
 0x769   :  { %13040 = vmatpush3.msra.mxu1 %v14581_v8  ;;  %13055 = vmatprep.mubr.msk.f32.mxu1 %vm14377_vm1, %v17387_v37 }
 0x76a   :  { %13041 = vmatprep.subr.mxu1 %v17387_v37  ;;  %v4750_v55 = vand.u32 4294901760, %v4749_v53 }
 0x76b   :  { %13042 = vmatpush3.msra.mxu1 %v14586_v10 }
 0x76c   :  { %13043 = vmatprep.subr.mxu1 %v17387_v37  ;;  %v4751_v60 = vsub.f32 %v4749_v53, %v4750_v55 }
 0x76d   :  { %13044 = vmatpush3.msra.mxu1 %v14607_v14 }
 0x76e   :  { %13045 = vmatprep.subr.mxu1 %v17387_v37  ;;  %v4752_v49 = vand.u32 4294901760, %v4751_v60 }
 0x76f   :  { %13046 = vmatpush3.msra.mxu1 %v14621_v19 }
 0x770   :  { %13047 = vmatprep.subr.mxu1 %v17387_v37  ;;  %12999 = vmatmul.mubr.f32.vlgmr.msra.gmra.mxu0 %v4752_v49 }
 0x771   :  { %13021 = vmatpush3.msra.mxu0 %v14598_v12  ;;  %13048 = vmatpush3.msra.mxu1 %v14642_v25  ;;  %v5228_v12 = vld [vmem:[%s17321_s4 + $0x30] sm:$0xff] }
 0x772   :  { %13022 = vmatprep.subr.mxu0 %v17387_v37  ;;  %13049 = vmatprep.subr.mxu1 %v17387_v37 }
 0x773   :  { %13023 = vmatpush3.msra.mxu0 %v14610_v3  ;;  %13050 = vmatpush3.msra.mxu1 %v14654_v31  ;;  %v15718_v3 = vand.u32 4294901760, %v5228_v12 }
 0x774   :  { %13024 = vmatprep.subr.mxu0 %v17387_v37  ;;  %13051 = vmatprep.subr.mxu1 %v17387_v37 }
 0x775   :  { %13025 = vmatpush3.msra.mxu0 %v14633_v4  ;;  %13052 = vmatpush3.msra.mxu1 %v14680_v38 }
 0x776   :  { %13026 = vmatprep.subr.mxu0 %v17387_v37  ;;  %13053 = vmatprep.subr.mxu1 %v17387_v37 }
 0x777   :  { %13027 = vmatpush3.msra.mxu0 %v14645_v26  ;;  %13054 = vmatpush3.msra.mxu1 %v14694_v42 }
 0x778   :  { %13028 = vmatprep.subr.mxu0 %v17387_v37  ;;  %13056 = vmatmul.mubr.f32.vlgmr.msra.gmra.mxu1 %v4750_v55 }
 0x779   :  { %13077 = vmatprep.subr.mxu1 %v17387_v37  ;;  %13029 = vmatpush3.msra.mxu0 %v14668_v35 }
 0x77a   :  { %13078 = vmatpush3.msra.mxu1 %v14581_v8  ;;  %13030 = vmatprep.subr.mxu0 %v17387_v37  ;;  %v5229_v8 = vld [vmem:[%s17321_s4 + $0x38] sm:$0xff] }
 0x77b   :  { %13079 = vmatprep.subr.mxu1 %v17387_v37  ;;  %13031 = vmatpush3.msra.mxu0 %v14683_v39  ;;  %v5225_v39 = vld [vmem:[%s17321_s4 + $0x18] sm:$0xff] }
 0x77c   :  { %13080 = vmatpush3.msra.mxu1 %v14586_v10  ;;  %13032 = vmatprep.subr.mxu0 %v17387_v37  ;;  %v15710_v10 = vand.u32 4294901760, %v5229_v8 }
 0x77d   :  { %13081 = vmatprep.subr.mxu1 %v17387_v37  ;;  %13033 = vmatpush3.msra.mxu0 %v14706_v44  ;;  %v5223_v44 = vld [vmem:[%s17321_s4 + $0x8] sm:$0xff] }
 0x77e   :  { %13082 = vmatpush3.msra.mxu1 %v14607_v14  ;;  %13034 = vmatprep.subr.mxu0 %v17387_v37  ;;  %v15716_v14 = vsub.f32 %v5229_v8, %v15710_v10  ;;  %v15775_v11 = vand.u32 4294901760, %v5223_v44 }
 0x77f   :  { %13083 = vmatprep.subr.mxu1 %v17387_v37  ;;  %13035 = vmatpush3.msra.mxu0 %v14717_v47 }
 0x780   :  { %13036 = vmatprep.mubr.msk.f32.mxu0 %vm14377_vm1, %v17387_v37  ;;  %13084 = vmatpush3.msra.mxu1 %v14621_v19  ;;  %v15726_v19 = vand.u32 4294901760, %v15716_v14  ;;  %v15792_v30 = vsub.f32 %v5223_v44, %v15775_v11 }
 0x781   :  { %13037 = vmatmul.mubr.f32.vlgmr.msra.gmra.mxu0 %v4749_v53  ;;  %13058 = vmatprep.subr.mxu0 %v17387_v37 }
 0x782   :  { %13085 = vmatprep.subr.mxu1 %v17387_v37  ;;  %13059 = vmatpush3.msra.mxu0 %v14619_v17  ;;  %v5227_v17 = vld [vmem:[%s17321_s4 + $0x28] sm:$0xff]  ;;  %v5442_v26 = vsub.f32 %v15716_v14, %v15726_v19  ;;  %v15807_v40 = vand.u32 4294901760, %v15792_v30 }
 0x783   :  { %13086 = vmatpush3.msra.mxu1 %v14642_v25  ;;  %13060 = vmatprep.subr.mxu0 %v17387_v37  ;;  %v15731_v4 = vand.u32 4294901760, %v5227_v17  ;;  %v5226_v25 = vld [vmem:[%s17321_s4 + $0x20] sm:$0xff] }
 0x784   :  { %13087 = vmatprep.subr.mxu1 %v17387_v37  ;;  %13061 = vmatpush3.msra.mxu0 %v14630_v22  ;;  %v15729_v22 = vsub.f32 %v5228_v12, %v15718_v3  ;;  %v5443_v47 = vand.u32 4294901760, %v5442_v26  ;;  %v5484_v6 = vsub.f32 %v15792_v30, %v15807_v40 }
 0x785   :  { %13088 = vmatpush3.msra.mxu1 %v14654_v31  ;;  %13062 = vmatprep.subr.mxu0 %v17387_v37  ;;  %v15744_v35 = vsub.f32 %v5227_v17, %v15731_v4 }
 0x786   :  { %13089 = vmatprep.subr.mxu1 %v17387_v37  ;;  %13063 = vmatpush3.msra.mxu0 %v17388_v43  ;;  %v15741_v31 = vand.u32 4294901760, %v15729_v22  ;;  %v5485_v36 = vand.u32 4294901760, %v5484_v6 }
 0x787   :  { %13090 = vmatpush3.msra.mxu1 %v14680_v38  ;;  %13064 = vmatprep.subr.mxu0 %v17387_v37  ;;  %v15746_v38 = vand.u32 4294901760, %v5226_v25 }
 0x788   :  { %13091 = vmatprep.subr.mxu1 %v17387_v37  ;;  %13065 = vmatpush3.msra.mxu0 %v17389_v15  ;;  %v5449_v43 = vsub.f32 %v15729_v22, %v15741_v31  ;;  %v15762_v15 = vand.u32 4294901760, %v15744_v35 }
 0x789   :  { %13092 = vmatpush3.msra.mxu1 %v14694_v42  ;;  %13093 = vmatprep.mubr.msk.f32.mxu1 %vm14377_vm1, %v17387_v37  ;;  %v5224_v42 = vld [vmem:[%s17321_s4 + $0x10] sm:$0xff] }
 0x78a   :  { %13066 = vmatprep.subr.mxu0 %v17387_v37  ;;  %13094 = vmatmul.mubr.f32.vlgmr.msra.gmra.mxu1 %v15631_v21  ;;  %v5450_v28 = vand.u32 4294901760, %v5449_v43  ;;  %v5456_v59 = vsub.f32 %v15744_v35, %v15762_v15 }
 0x78b   :  { %13067 = vmatpush3.msra.mxu0 %v17390_v33  ;;  %13074 = vmatprep.mubr.msk.f32.mxu0 %vm14377_vm1, %v17387_v37  ;;  %v15765_v33 = vsub.f32 %v5226_v25, %v15746_v38 }
 0x78c   :  { %13068 = vmatprep.subr.mxu0 %v17387_v37  ;;  %13124 = vmatprep.subr.mxu1 %v5443_v47  ;;  %v5457_v45 = vand.u32 4294901760, %v5456_v59  ;;  %v5216_v59 = vsel %vm868_vm2, %v15151_v23, %v15508_v27 }
 0x78d   :  { %13069 = vmatpush3.msra.mxu0 %v17391_v48  ;;  %v5222_v48 = vld [vmem:[%s17321_s4] sm:$0xff]  ;;  %v15783_v41 = vand.u32 4294901760, %v15765_v33  ;;  %13125 = vmatpush3.msra.mxu1 %v5443_v47 }
 0x78e   :  { %13070 = vmatprep.subr.mxu0 %v17387_v37  ;;  %v15778_v34 = vand.u32 4294901760, %v5222_v48  ;;  %13126 = vmatprep.subr.mxu1 %v5450_v28 }
 0x78f   :  { %13071 = vmatpush3.msra.mxu0 %v17393_v52  ;;  %v15771_v52 = vand.u32 4294901760, %v5225_v39  ;;  %v5463_v51 = vsub.f32 %v15765_v33, %v15783_v41  ;;  %13127 = vmatpush3.msra.mxu1 %v5450_v28  ;;  %v5215_v28 = vsel %vm868_vm2, %v15032_v57, %v15627_v0 }
 0x790   :  { %13072 = vmatprep.subr.mxu0 %v17387_v37  ;;  %v15795_v50 = vsub.f32 %v5222_v48, %v15778_v34  ;;  %13128 = vmatprep.subr.mxu1 %v5457_v45 }
 0x791   :  { %13073 = vmatpush3.msra.mxu0 %v17395_v9  ;;  %v15773_v9 = vand.u32 4294901760, %v5224_v42  ;;  %v15786_v63 = vsub.f32 %v5225_v39, %v15771_v52  ;;  %v5464_v29 = vand.u32 4294901760, %v5463_v51  ;;  %13129 = vmatpush3.msra.mxu1 %v5457_v45  ;;  %v5249_v45 = vsel %vm877_vm3, %v5215_v28, 0 }
 0x792   :  { %13075 = vmatmul.mubr.f32.vlgmr.msra.gmra.mxu0 %v15631_v21  ;;  %13096 = vmatprep.subr.mxu0 %v15710_v10  ;;  %v15810_v18 = vand.u32 4294901760, %v15795_v50  ;;  %v5252_v51 = vsel %vm877_vm3, %v5216_v59, 0 }
 0x793   :  { %13097 = vmatpush3.msra.mxu0 %v15710_v10  ;;  %v15789_v5 = vsub.f32 %v5224_v42, %v15773_v9  ;;  %v15801_v61 = vand.u32 4294901760, %v15786_v63  ;;  %13130 = vmatprep.subr.mxu1 %v5464_v29 }
 0x794   :  { %13098 = vmatprep.subr.mxu0 %v15718_v3  ;;  %13131 = vmatpush3.msra.mxu1 %v5464_v29  ;;  %v5491_v58 = vsub.f32 %v15795_v50, %v15810_v18  ;;  %v15838_v29 = vand.u32 4294901760, %v5249_v45 }
 0x795   :  { %13099 = vmatpush3.msra.mxu0 %v15718_v3  ;;  %v15804_v7 = vand.u32 4294901760, %v15789_v5  ;;  %v5470_v62 = vsub.f32 %v15786_v63, %v15801_v61 }
 0x796   :  { %13100 = vmatprep.subr.mxu0 %v15731_v4  ;;  %v5492_v56 = vand.u32 4294901760, %v5491_v58 }
 0x797   :  { %13101 = vmatpush3.msra.mxu0 %v15731_v4  ;;  %v5477_v20 = vsub.f32 %v15789_v5, %v15804_v7  ;;  %v5471_v46 = vand.u32 4294901760, %v5470_v62  ;;  %v5217_v62 = vsel %vm868_vm2, %v15270_v32, %v15389_v24 }
 0x798   :  { %13102 = vmatprep.subr.mxu0 %v15746_v38  ;;  %v5255_v6 = vsel %vm877_vm3, %v5217_v62, 0 }
 0x799   :  { %13103 = vmatpush3.msra.mxu0 %v15746_v38  ;;  %v5478_v2 = vand.u32 4294901760, %v5477_v20  ;;  %13132 = vmatprep.subr.mxu1 %v5471_v46  ;;  %v5218_v20 = vsel %vm868_vm2, %v15389_v24, %v15270_v32 }
 0x79a   :  { %13104 = vmatprep.subr.mxu0 %v15771_v52  ;;  %13133 = vmatpush3.msra.mxu1 %v5471_v46 }
 0x79b   :  { %13105 = vmatpush3.msra.mxu0 %v15771_v52  ;;  %13134 = vmatprep.subr.mxu1 %v5478_v2 }
 0x79c   :  { %13106 = vmatprep.subr.mxu0 %v15773_v9  ;;  %13135 = vmatpush3.msra.mxu1 %v5478_v2  ;;  %v15850_v2 = vsub.f32 %v5249_v45, %v15838_v29 }
 0x79d   :  { %13107 = vmatpush3.msra.mxu0 %v15773_v9  ;;  %13136 = vmatprep.subr.mxu1 %v5485_v36 }
 0x79e   :  { %13108 = vmatprep.subr.mxu0 %v15775_v11  ;;  %13137 = vmatpush3.msra.mxu1 %v5485_v36  ;;  %v5258_v36 = vsel %vm877_vm3, %v5218_v20, 0 }
 0x79f   :  { %13109 = vmatpush3.msra.mxu0 %v15775_v11  ;;  %13138 = vmatprep.subr.mxu1 %v5492_v56 }
 0x7a0   :  { %13110 = vmatprep.subr.mxu0 %v15778_v34  ;;  %13139 = vmatpush3.msra.mxu1 %v5492_v56 }
 0x7a1   :  { %13111 = vmatpush3.msra.mxu0 %v15778_v34  ;;  %13180 = vmatprep.subr.mxu1 %v15710_v10 }
 0x7a2   :  { %13152 = vmatprep.subr.mxu0 %v15716_v14 }
 0x828   :  { %v4865_v54 = vpop.f32.mrf.mxu1 }
 0x82a   :  { %v13019_v13 = vpop.f32.mrf.mxu1 }
 0x82b   :  { %v5219_v13 = vsel %vm868_vm2, %v15508_v27, %v15151_v23 }
 0x82c   :  { %v5261_v23 = vsel %vm877_vm3, %v5219_v13, 0 }
 0x830   :  { %v4754_v21 = vpop.f32.mrf.mxu0 }
 0x831   :  { %v4866_v17 = vadd.f32 %v4865_v54, %v4754_v21  ;;  %v15856_v54 = vand.u32 4294901760, %v5255_v6  ;;  %v15866_v21 = vand.u32 4294901760, %v5258_v36 }
 0x832   :  { %v13000_v53 = vpop.f32.mrf.mxu0 }
 0x833   :  { %v5354_v53 = vand.u32 4294901760, %v15850_v2 }
 0x838   :  { %v5034_v55 = vpop.f32.mrf.mxu1 }
 0x83a   :  { %v13057_v60 = vpop.f32.mrf.mxu1 }
 0x841   :  { %v4953_v49 = vpop.f32.mrf.mxu0 }
 0x842   :  { %v4954_v26 = vadd.f32 %v4953_v49, %v4866_v17  ;;  %v15880_v49 = vsub.f32 %v5255_v6, %v15856_v54 }
 0x843   :  { %v13038_v8 = vpop.f32.mrf.mxu0 }
 0x844   :  { %v5035_v39 = vadd.f32 %v5034_v55, %v4954_v26  ;;  %v5220_v55 = vsel %vm868_vm2, %v15627_v0, %v15032_v57  ;;  %v5355_v8 = vsub.f32 %v15850_v2, %v5354_v53 }
 0x845   :  { %v5264_v0 = vsel %vm877_vm3, %v5220_v55, 0 }
 0x84a   :  { %v5208_v12 = vpop.f32.mrf.mxu1 }
 0x84c   :  { %v13095_v25 = vpop.f32.mrf.mxu1 }
 0x84d   :  { %v15895_v25 = vsub.f32 %v5258_v36, %v15866_v21 }
 0x852   :  { %v5129_v42 = vpop.f32.mrf.mxu0 }
 0x853   :  { %v5130_v44 = vadd.f32 %v5129_v42, %v5035_v39  ;;  %v15904_v42 = vand.u32 4294901760, %v5264_v0 }
 0x854   :  { %v13076_v47 = vpop.f32.mrf.mxu0 }
 0x855   :  { %v5209_v43 = vadd.f32 %v5208_v12, %v5130_v44  ;;  %v15890_v12 = vand.u32 4294901760, %v5261_v23  ;;  %v5374_v44 = vand.u32 4294901760, %v15880_v49  ;;  %v15923_v62 = vsub.f32 %v5264_v0, %v15904_v42 }
 0x857   :  { %v5212_v48 = vadd.f32 %v5209_v43, %v14904_v1  ;;  %v15843_v1 = vand.u32 4294901760, %v5252_v51  ;;  %v5356_v43 = vand.u32 4294901760, %v5355_v8  ;;  %v15913_v28 = vsub.f32 %v5261_v23, %v15890_v12 }
 0x858   :  { %v5375_v45 = vsub.f32 %v15880_v49, %v5374_v44 }
 0x859   :  { %14310 = vtanh.f32 %v5212_v48  ;;  %v15862_v32 = vsub.f32 %v5252_v51, %v15843_v1  ;;  %v5384_v48 = vand.u32 4294901760, %v15895_v25  ;;  %v5394_v6 = vand.u32 4294901760, %v15913_v28 }
 0x85b   :  { %v5364_v27 = vand.u32 4294901760, %v15862_v32  ;;  %v5385_v20 = vsub.f32 %v15895_v25, %v5384_v48 }
 0x85d   :  { %v5365_v39 = vsub.f32 %v15862_v32, %v5364_v27  ;;  %v5386_v36 = vand.u32 4294901760, %v5385_v20 }
 0x85f   :  { %v5366_v59 = vand.u32 4294901760, %v5365_v39 }
 0x866   :  { %v14311_v46 = vpop.eup %14310 }
 0x867   :  { %v5214_v58 = vsel %vm868_vm2, %v14913_v16, %v14311_v46  ;;  %v5221_v17 = vsel %vm868_vm2, %v14311_v46, %v14913_v16  ;;  %v5376_v46 = vand.u32 4294901760, %v5375_v45 }
 0x868   :  { %v5246_v56 = vsel %vm877_vm3, %v5214_v58, 0  ;;  %v5267_v47 = vsel %vm877_vm3, %v5221_v17, 0 }
 0x869   :  { %v15864_v24 = vand.u32 4294901760, %v5246_v56  ;;  %v15920_v51 = vand.u32 4294901760, %v5267_v47 }
 0x86b   :  { %13140 = vmatprep.mubr.f32.mxu1 %v15864_v24  ;;  %v15874_v60 = vsub.f32 %v5246_v56, %v15864_v24  ;;  %v15936_v58 = vsub.f32 %v5267_v47, %v15920_v51  ;;  %v5395_v56 = vsub.f32 %v15913_v28, %v5394_v6 }
 0x86c   :  { %13141 = vmatmul.mubr.f32.vlgmr.msra.gmra.mxu1 %v15838_v29 }
 0x86d   :  { %13143 = vmatprep.mubr.f32.mxu1 %v15843_v1  ;;  %13181 = vmatpush3.msra.mxu1 %v15710_v10  ;;  %v5344_v57 = vand.u32 4294901760, %v15874_v60  ;;  %v5414_v13 = vand.u32 4294901760, %v15936_v58  ;;  %v5396_v55 = vand.u32 4294901760, %v5395_v56 }
 0x86e   :  { %13182 = vmatprep.subr.mxu1 %v15718_v3 }
 0x86f   :  { %13183 = vmatpush3.msra.mxu1 %v15718_v3  ;;  %v5345_v26 = vsub.f32 %v15874_v60, %v5344_v57  ;;  %v5415_v23 = vsub.f32 %v15936_v58, %v5414_v13 }
 0x870   :  { %13144 = vmatmul.mubr.f32.gmra.mxu1 %v15856_v54  ;;  %13184 = vmatprep.subr.mxu1 %v15731_v4 }
 0x871   :  { %13146 = vmatprep.mubr.f32.mxu1 %v15866_v21  ;;  %13185 = vmatpush3.msra.mxu1 %v15731_v4  ;;  %v5346_v16 = vand.u32 4294901760, %v5345_v26 }
 0x872   :  { %13186 = vmatprep.subr.mxu1 %v15746_v38 }
 0x873   :  { %13112 = vmatprep.mubr.f32.mxu0 %v5346_v16  ;;  %13187 = vmatpush3.msra.mxu1 %v15746_v38 }
 0x874   :  { %13113 = vmatmul.mubr.f32.vlgmr.msra.gmra.mxu0 %v5356_v43  ;;  %13147 = vmatmul.mubr.f32.gmra.mxu1 %v15890_v12 }
 0x875   :  { %13153 = vmatpush3.msra.mxu0 %v15716_v14  ;;  %13188 = vmatprep.subr.mxu1 %v15771_v52  ;;  %v5404_v14 = vand.u32 4294901760, %v15923_v62 }
 0x876   :  { %13115 = vmatprep.mubr.f32.mxu0 %v5366_v59  ;;  %13149 = vmatprep.mubr.f32.mxu1 %v15904_v42 }
 0x877   :  { %13154 = vmatprep.subr.mxu0 %v15729_v22  ;;  %13189 = vmatpush3.msra.mxu1 %v15771_v52 }
 0x878   :  { %13155 = vmatpush3.msra.mxu0 %v15729_v22  ;;  %13190 = vmatprep.subr.mxu1 %v15773_v9  ;;  %v5405_v22 = vsub.f32 %v15923_v62, %v5404_v14 }
 0x879   :  { %13156 = vmatprep.subr.mxu0 %v15744_v35  ;;  %13191 = vmatpush3.msra.mxu1 %v15773_v9 }
 0x87a   :  { %13116 = vmatmul.mubr.f32.gmra.mxu0 %v5376_v46  ;;  %13150 = vmatmul.mubr.f32.gmra.mxu1 %v15920_v51  ;;  %v16297_v46 = vld [vmem:[%s17323_s6] ss:$0 sm:$0xff] }
 0x87b   :  { %13157 = vmatpush3.msra.mxu0 %v15744_v35  ;;  %13192 = vmatprep.subr.mxu1 %v15775_v11  ;;  %v5406_v35 = vand.u32 4294901760, %v5405_v22 }
 0x87c   :  { %13118 = vmatprep.mubr.f32.mxu0 %v5386_v36  ;;  %13158 = vmatprep.subr.mxu0 %v15765_v33 }
 0x87d   :  { %13193 = vmatpush3.msra.mxu1 %v15775_v11  ;;  %13196 = vmatprep.mubr.f32.mxu1 %v5344_v57 }
 0x87e   :  { %13159 = vmatpush3.msra.mxu0 %v15765_v33  ;;  %13194 = vmatprep.subr.mxu1 %v15778_v34  ;;  %v5416_v33 = vand.u32 4294901760, %v5415_v23 }
 0x87f   :  { %13160 = vmatprep.subr.mxu0 %v15786_v63  ;;  %13195 = vmatpush3.msra.mxu1 %v15778_v34 }
 0x880   :  { %13119 = vmatmul.mubr.f32.gmra.mxu0 %v5396_v55  ;;  %13197 = vmatmul.mubr.f32.vlgmr.msra.gmra.mxu1 %v5354_v53 }
 0x881   :  { %13161 = vmatpush3.msra.mxu0 %v15786_v63  ;;  %13236 = vmatprep.subr.mxu1 %v15710_v10 }
 0x882   :  { %13121 = vmatprep.mubr.f32.mxu0 %v5406_v35  ;;  %13162 = vmatprep.subr.mxu0 %v15789_v5 }
 0x883   :  { %13199 = vmatprep.mubr.f32.mxu1 %v5364_v27  ;;  %13237 = vmatpush3.msra.mxu1 %v15710_v10  ;;  %v5237_v10 = vld [vmem:[%s17322_s5 + $0x38] sm:$0xff]  ;;  %v5230_v27 = vld [vmem:[%s17322_s5] sm:$0xff] }
 0x884   :  { %13163 = vmatpush3.msra.mxu0 %v15789_v5  ;;  %13238 = vmatprep.subr.mxu1 %v15718_v3  ;;  %v16089_v8 = vand.u32 4294901760, %v5230_v27 }
 0x885   :  { %13164 = vmatprep.subr.mxu0 %v15792_v30  ;;  %13239 = vmatpush3.msra.mxu1 %v15718_v3  ;;  %v5236_v3 = vld [vmem:[%s17322_s5 + $0x30] sm:$0xff] }
 0x886   :  { %13122 = vmatmul.mubr.f32.gmra.mxu0 %v5416_v33  ;;  %13200 = vmatmul.mubr.f32.gmra.mxu1 %v5374_v44  ;;  %v16115_v39 = vsub.f32 %v5230_v27, %v16089_v8 }
 0x887   :  { %13165 = vmatpush3.msra.mxu0 %v15792_v30  ;;  %13240 = vmatprep.subr.mxu1 %v15731_v4  ;;  %v5232_v30 = vld [vmem:[%s17322_s5 + $0x10] sm:$0xff] }
 0x888   :  { %13166 = vmatprep.subr.mxu0 %v15795_v50  ;;  %13168 = vmatprep.mubr.f32.mxu0 %v15874_v60  ;;  %v16058_v53 = vand.u32 4294901760, %v5232_v30 }
 0x889   :  { %13202 = vmatprep.mubr.f32.mxu1 %v5384_v48  ;;  %13241 = vmatpush3.msra.mxu1 %v15731_v4  ;;  %v15988_v4 = vand.u32 4294901760, %v5237_v10  ;;  %v16137_v48 = vand.u32 4294901760, %v16115_v39 }
 0x88a   :  { %13167 = vmatpush3.msra.mxu0 %v15795_v50  ;;  %13242 = vmatprep.subr.mxu1 %v15746_v38 }
 0x88b   :  { %13208 = vmatprep.subr.mxu0 %v15726_v19  ;;  %13243 = vmatpush3.msra.mxu1 %v15746_v38  ;;  %v5235_v38 = vld [vmem:[%s17322_s5 + $0x28] sm:$0xff]  ;;  %17405 = vst [vmem:[#allocation14_spill] sm:$0xff] %v16137_v48  ;;  %v6267_v45 = vsub.f32 %v16115_v39, %v16137_v48 }
 0x88c   :  { %13169 = vmatmul.mubr.f32.vlgmr.msra.gmra.mxu0 %v15850_v2  ;;  %13203 = vmatmul.mubr.f32.gmra.mxu1 %v5394_v6 }
 0x88d   :  { %13209 = vmatpush3.msra.mxu0 %v15726_v19  ;;  %13244 = vmatprep.subr.mxu1 %v15771_v52  ;;  %v15994_v19 = vand.u32 4294901760, %v5236_v3 }
 0x88e   :  { %13171 = vmatprep.mubr.f32.mxu0 %v15862_v32  ;;  %13205 = vmatprep.mubr.f32.mxu1 %v5404_v14  ;;  %v5231_v32 = vld [vmem:[%s17322_s5 + $0x8] sm:$0xff] }
 0x88f   :  { %13210 = vmatprep.subr.mxu0 %v15741_v31  ;;  %13245 = vmatpush3.msra.mxu1 %v15771_v52  ;;  %v5234_v52 = vld [vmem:[%s17322_s5 + $0x20] sm:$0xff] }
 0x890   :  { %13211 = vmatpush3.msra.mxu0 %v15741_v31  ;;  %13246 = vmatprep.subr.mxu1 %v15773_v9  ;;  %v16003_v31 = vsub.f32 %v5237_v10, %v15988_v4  ;;  %v16024_v5 = vand.u32 4294901760, %v5234_v52 }
 0x891   :  { %13212 = vmatprep.subr.mxu0 %v15762_v15  ;;  %13247 = vmatpush3.msra.mxu1 %v15773_v9  ;;  %v16013_v9 = vsub.f32 %v5236_v3, %v15994_v19 }
 0x892   :  { %13172 = vmatmul.mubr.f32.gmra.mxu0 %v15880_v49  ;;  %13206 = vmatmul.mubr.f32.gmra.mxu1 %v5414_v13  ;;  %v16022_v63 = vand.u32 4294901760, %v16003_v31  ;;  %v16051_v2 = vsub.f32 %v5234_v52, %v16024_v5 }
 0x893   :  { %13213 = vmatpush3.msra.mxu0 %v15762_v15  ;;  %13248 = vmatprep.subr.mxu1 %v15775_v11  ;;  %v16015_v15 = vand.u32 4294901760, %v5235_v38 }
 0x894   :  { %13174 = vmatprep.mubr.f32.mxu0 %v15895_v25  ;;  %13214 = vmatprep.subr.mxu0 %v15783_v41  ;;  %v16082_v0 = vand.u32 4294901760, %v16051_v2 }
 0x895   :  { %13249 = vmatpush3.msra.mxu1 %v15775_v11  ;;  %13252 = vmatprep.mubr.f32.mxu1 %v15864_v24  ;;  %v5233_v11 = vld [vmem:[%s17322_s5 + $0x18] sm:$0xff] }
 0x896   :  { %13215 = vmatpush3.msra.mxu0 %v15783_v41  ;;  %13250 = vmatprep.subr.mxu1 %v15778_v34  ;;  %v16034_v41 = vand.u32 4294901760, %v16013_v9  ;;  %v16044_v50 = vand.u32 4294901760, %v5233_v11  ;;  %v6239_v26 = vsub.f32 %v16051_v2, %v16082_v0 }
 0x897   :  { %13216 = vmatprep.subr.mxu0 %v15801_v61  ;;  %13251 = vmatpush3.msra.mxu1 %v15778_v34  ;;  %v16037_v34 = vsub.f32 %v5235_v38, %v16015_v15 }
 0x898   :  { %13175 = vmatmul.mubr.f32.gmra.mxu0 %v15913_v28  ;;  %13253 = vmatmul.mubr.f32.vlgmr.msra.gmra.mxu1 %v15838_v29  ;;  %v16073_v49 = vsub.f32 %v5233_v11, %v16044_v50  ;;  %v16130_v43 = vand.u32 4294901760, %v6239_v26 }
 0x899   :  { %13217 = vmatpush3.msra.mxu0 %v15801_v61  ;;  %13177 = vmatprep.mubr.f32.mxu0 %v15923_v62  ;;  %v6218_v61 = vsub.f32 %v16003_v31, %v16022_v63  ;;  %v16065_v60 = vand.u32 4294901760, %v16037_v34 }
 0x89a   :  { %13218 = vmatprep.subr.mxu0 %v15804_v7  ;;  %13255 = vmatprep.mubr.f32.mxu1 %v15843_v1  ;;  %17404 = vst [vmem:[#allocation12_spill] sm:$0xff] %v16130_v43 }
 0x89b   :  { %13219 = vmatpush3.msra.mxu0 %v15804_v7  ;;  %13283 = vmatprep.subr.mxu1 %v17387_v37  ;;  %v6225_v7 = vsub.f32 %v16013_v9, %v16034_v41  ;;  %v16079_v57 = vand.u32 4294901760, %v6218_v61 }
 0x89c   :  { %13220 = vmatprep.subr.mxu0 %v15807_v40  ;;  %13178 = vmatmul.mubr.f32.gmra.mxu0 %v15936_v58 }
 0x89d   :  { %13221 = vmatpush3.msra.mxu0 %v15807_v40  ;;  %13256 = vmatmul.mubr.f32.gmra.mxu1 %v15856_v54  ;;  %v16075_v40 = vand.u32 4294901760, %v5231_v32  ;;  %v16093_v17 = vand.u32 4294901760, %v6225_v7 }
 0x89e   :  { %13222 = vmatprep.subr.mxu0 %v15810_v18  ;;  %13224 = vmatprep.mubr.f32.mxu0 %v15864_v24  ;;  %v16087_v24 = vsub.f32 %v5232_v30, %v16058_v53 }
 0x89f   :  { %13258 = vmatprep.mubr.f32.mxu1 %v15866_v21  ;;  %13223 = vmatpush3.msra.mxu0 %v15810_v18  ;;  %17402 = vst [vmem:[#allocation8_spill] sm:$0xff] %v16093_v17  ;;  %v6232_v18 = vsub.f32 %v16037_v34, %v16065_v60  ;;  %v16103_v25 = vsub.f32 %v5231_v32, %v16075_v40 }
 0x8a0   :  { %13264 = vmatprep.subr.mxu0 %v17387_v37  ;;  %13225 = vmatmul.mubr.f32.vlgmr.msra.gmra.mxu0 %v15838_v29  ;;  %v16100_v29 = vand.u32 4294901760, %v16073_v49 }
 0x8a1   :  { %13259 = vmatmul.mubr.f32.gmra.mxu1 %v15890_v12  ;;  %13265 = vmatpush3.msra.mxu0 %v15988_v4  ;;  %v16119_v44 = vand.u32 4294901760, %v6232_v18  ;;  %v16126_v47 = vand.u32 4294901760, %v16103_v25 }
 0x8a2   :  { %13227 = vmatprep.mubr.f32.mxu0 %v15843_v1  ;;  %13261 = vmatprep.mubr.f32.mxu1 %v15904_v42  ;;  %v16112_v1 = vand.u32 4294901760, %v16087_v24  ;;  %v6246_v16 = vsub.f32 %v16073_v49, %v16100_v29 }
 0x8a3   :  { %13266 = vmatprep.subr.mxu0 %v17387_v37  ;;  %13284 = vmatpush3.msra.mxu1 %v16079_v57  ;;  %17403 = vst [vmem:[#allocation10_spill] sm:$0xff] %v16119_v44 }
 0x8a4   :  { %13267 = vmatpush3.msra.mxu0 %v15994_v19  ;;  %13285 = vmatprep.subr.mxu1 %v17387_v37  ;;  %v16143_v28 = vand.u32 4294901760, %v6246_v16 }
 0x8a5   :  { %13268 = vmatprep.subr.mxu0 %v17387_v37  ;;  %13286 = vmatpush3.msra.mxu1 %v16093_v17 }
 0x8a6   :  { %13228 = vmatmul.mubr.f32.gmra.mxu0 %v15856_v54  ;;  %13262 = vmatmul.mubr.f32.gmra.mxu1 %v15920_v51  ;;  %v6253_v54 = vsub.f32 %v16087_v24, %v16112_v1  ;;  %17406 = vst [vmem:[#allocation9_spill] sm:$0xff] %v16143_v28 }
 0x8a7   :  { %13269 = vmatpush3.msra.mxu0 %v16015_v15  ;;  %13287 = vmatprep.subr.mxu1 %v17387_v37 }
 0x8a8   :  { %13230 = vmatprep.mubr.f32.mxu0 %v15866_v21  ;;  %13270 = vmatprep.subr.mxu0 %v17387_v37  ;;  %v6260_v21 = vsub.f32 %v16103_v25, %v16126_v47  ;;  %v16151_v59 = vand.u32 4294901760, %v6253_v54 }
 0x8a9   :  { %13288 = vmatpush3.msra.mxu1 %v16119_v44  ;;  %13271 = vmatpush3.msra.mxu0 %v16024_v5 }
 0x8aa   :  { %13289 = vmatprep.subr.mxu1 %v17387_v37  ;;  %13272 = vmatprep.subr.mxu0 %v17387_v37  ;;  %17407 = vst [vmem:[#allocation16_spill] sm:$0xff] %v16151_v59  ;;  %v16159_v62 = vand.u32 4294901760, %v6260_v21 }
 0x8ab   :  { %13290 = vmatpush3.msra.mxu1 %v16130_v43  ;;  %13231 = vmatmul.mubr.f32.gmra.mxu0 %v15890_v12  ;;  %v16165_v12 = vand.u32 4294901760, %v6267_v45 }
 0x8ac   :  { %13273 = vmatpush3.msra.mxu0 %v16044_v50  ;;  %13291 = vmatprep.subr.mxu1 %v17387_v37  ;;  %17408 = vst [vmem:[#allocation11_spill] sm:$0xff] %v16159_v62 }
 0x8ad   :  { %13233 = vmatprep.mubr.f32.mxu0 %v15904_v42  ;;  %13274 = vmatprep.subr.mxu0 %v17387_v37  ;;  %17409 = vst [vmem:[#allocation18_spill] sm:$0xff] %v16165_v12 }
 0x8ae   :  { %13292 = vmatpush3.msra.mxu1 %v16143_v28  ;;  %13275 = vmatpush3.msra.mxu0 %v16058_v53 }
 0x8af   :  { %13293 = vmatprep.subr.mxu1 %v17387_v37  ;;  %13276 = vmatprep.subr.mxu0 %v17387_v37 }
 0x8b0   :  { %13294 = vmatpush3.msra.mxu1 %v16151_v59  ;;  %13234 = vmatmul.mubr.f32.gmra.mxu0 %v15920_v51 }
 0x8b1   :  { %13277 = vmatpush3.msra.mxu0 %v16075_v40  ;;  %13295 = vmatprep.subr.mxu1 %v17387_v37 }
 0x8b2   :  { %13278 = vmatprep.subr.mxu0 %v17387_v37  ;;  %13296 = vmatpush3.msra.mxu1 %v16159_v62 }
 0x8b3   :  { %13279 = vmatpush3.msra.mxu0 %v16089_v8  ;;  %13297 = vmatprep.subr.mxu1 %v17387_v37 }
 0x8b4   :  { %13280 = vmatprep.mubr.msk.f32.mxu0 %vm14377_vm1, %v17387_v37  ;;  %13298 = vmatpush3.msra.mxu1 %v16165_v12 }
 0x8b5   :  { %13302 = vmatprep.subr.mxu0 %v17387_v37  ;;  %13281 = vmatmul.mubr.f32.vlgmr.msra.gmra.mxu0 %v17387_v37 }
 0x8b6   :  { %13299 = vmatprep.mubr.msk.f32.mxu1 %vm14377_vm1, %v17387_v37  ;;  %13303 = vmatpush3.msra.mxu0 %v16003_v31 }
 0x8b7   :  { %13321 = vmatprep.subr.mxu1 %v17387_v37  ;;  %13300 = vmatmul.mubr.f32.vlgmr.msra.gmra.mxu1 %v17387_v37 }
 0x8b8   :  { %13304 = vmatprep.subr.mxu0 %v17387_v37  ;;  %13322 = vmatpush3.msra.mxu1 %v15988_v4 }
 0x8b9   :  { %13305 = vmatpush3.msra.mxu0 %v16013_v9  ;;  %13323 = vmatprep.subr.mxu1 %v17387_v37 }
 0x8ba   :  { %13306 = vmatprep.subr.mxu0 %v17387_v37  ;;  %13324 = vmatpush3.msra.mxu1 %v15994_v19 }
 0x8bb   :  { %13307 = vmatpush3.msra.mxu0 %v16037_v34  ;;  %13325 = vmatprep.subr.mxu1 %v17387_v37 }
 0x8bc   :  { %13308 = vmatprep.subr.mxu0 %v17387_v37  ;;  %13326 = vmatpush3.msra.mxu1 %v16015_v15 }
 0x8bd   :  { %13309 = vmatpush3.msra.mxu0 %v16051_v2  ;;  %13327 = vmatprep.subr.mxu1 %v17387_v37 }
 0x8be   :  { %13310 = vmatprep.subr.mxu0 %v17387_v37  ;;  %13328 = vmatpush3.msra.mxu1 %v16024_v5 }
 0x8bf   :  { %13311 = vmatpush3.msra.mxu0 %v16073_v49  ;;  %13329 = vmatprep.subr.mxu1 %v17387_v37 }
 0x8c0   :  { %13312 = vmatprep.subr.mxu0 %v17387_v37  ;;  %13330 = vmatpush3.msra.mxu1 %v16044_v50 }
 0x8c1   :  { %13313 = vmatpush3.msra.mxu0 %v16087_v24  ;;  %13331 = vmatprep.subr.mxu1 %v17387_v37 }
 0x8c2   :  { %13314 = vmatprep.subr.mxu0 %v17387_v37  ;;  %13332 = vmatpush3.msra.mxu1 %v16058_v53 }
 0x8c3   :  { %13315 = vmatpush3.msra.mxu0 %v16103_v25  ;;  %13333 = vmatprep.subr.mxu1 %v17387_v37 }
 0x8c4   :  { %13316 = vmatprep.subr.mxu0 %v17387_v37  ;;  %13334 = vmatpush3.msra.mxu1 %v16075_v40 }
 0x8c5   :  { %13317 = vmatpush3.msra.mxu0 %v16115_v39  ;;  %13318 = vmatprep.mubr.msk.f32.mxu0 %vm14377_vm1, %v17387_v37 }
 0x8c6   :  { %13335 = vmatprep.subr.mxu1 %v17387_v37  ;;  %13319 = vmatmul.mubr.f32.vlgmr.msra.gmra.mxu0 %v17387_v37 }
 0x8c7   :  { %13336 = vmatpush3.msra.mxu1 %v16089_v8  ;;  %13340 = vmatprep.subr.mxu0 %v17387_v37 }
 0x8c8   :  { %13337 = vmatprep.mubr.msk.f32.mxu1 %vm14377_vm1, %v17387_v37  ;;  %13341 = vmatpush3.msra.mxu0 %v16022_v63 }
 0x8c9   :  { %13359 = vmatprep.subr.mxu1 %v17387_v37  ;;  %13338 = vmatmul.mubr.f32.vlgmr.msra.gmra.mxu1 %v17387_v37 }
 0x8ca   :  { %13342 = vmatprep.subr.mxu0 %v17387_v37  ;;  %13360 = vmatpush3.msra.mxu1 %v15988_v4 }
 0x8cb   :  { %13343 = vmatpush3.msra.mxu0 %v16034_v41  ;;  %13361 = vmatprep.subr.mxu1 %v17387_v37 }
 0x8cc   :  { %13344 = vmatprep.subr.mxu0 %v17387_v37  ;;  %13362 = vmatpush3.msra.mxu1 %v15994_v19 }
 0x8cd   :  { %13345 = vmatpush3.msra.mxu0 %v16065_v60  ;;  %13363 = vmatprep.subr.mxu1 %v17387_v37 }
 0x8ce   :  { %13346 = vmatprep.subr.mxu0 %v17387_v37  ;;  %13364 = vmatpush3.msra.mxu1 %v16015_v15 }
 0x8cf   :  { %13347 = vmatpush3.msra.mxu0 %v16082_v0  ;;  %13365 = vmatprep.subr.mxu1 %v17387_v37 }
 0x8d0   :  { %13348 = vmatprep.subr.mxu0 %v17387_v37  ;;  %13366 = vmatpush3.msra.mxu1 %v16024_v5 }
 0x8d1   :  { %13349 = vmatpush3.msra.mxu0 %v16100_v29  ;;  %13367 = vmatprep.subr.mxu1 %v17387_v37 }
 0x8d2   :  { %13350 = vmatprep.subr.mxu0 %v17387_v37  ;;  %13368 = vmatpush3.msra.mxu1 %v16044_v50 }
 0x8d3   :  { %13351 = vmatpush3.msra.mxu0 %v16112_v1  ;;  %13369 = vmatprep.subr.mxu1 %v17387_v37 }
 0x8d4   :  { %13352 = vmatprep.subr.mxu0 %v17387_v37  ;;  %13370 = vmatpush3.msra.mxu1 %v16058_v53 }
 0x8d5   :  { %13353 = vmatpush3.msra.mxu0 %v16126_v47  ;;  %13371 = vmatprep.subr.mxu1 %v17387_v37 }
 0x8d6   :  { %13354 = vmatprep.subr.mxu0 %v17387_v37  ;;  %13372 = vmatpush3.msra.mxu1 %v16075_v40 }
 0x8d7   :  { %13355 = vmatpush3.msra.mxu0 %v16137_v48  ;;  %13356 = vmatprep.mubr.msk.f32.mxu0 %vm14377_vm1, %v17387_v37 }
 0x8d8   :  { %13373 = vmatprep.subr.mxu1 %v17387_v37  ;;  %13357 = vmatmul.mubr.f32.vlgmr.msra.gmra.mxu0 %v17387_v37 }
 0x8d9   :  { %13374 = vmatpush3.msra.mxu1 %v16089_v8  ;;  %13375 = vmatprep.mubr.msk.f32.mxu1 %vm14377_vm1, %v17387_v37 }
 0x8da   :  { %13376 = vmatmul.mubr.f32.vlgmr.msra.gmra.mxu1 %v17387_v37  ;;  %13397 = vmatprep.subr.mxu1 %v17387_v37 }
 0x8db   :  { %13398 = vmatpush3.msra.mxu1 %v16079_v57  ;;  %13378 = vmatprep.subr.mxu0 %v17387_v37 }
 0x8dc   :  { %13399 = vmatprep.subr.mxu1 %v17387_v37  ;;  %13379 = vmatpush3.msra.mxu0 %v15988_v4 }
 0x8dd   :  { %13400 = vmatpush3.msra.mxu1 %v16093_v17  ;;  %13380 = vmatprep.subr.mxu0 %v17387_v37 }
 0x8de   :  { %13401 = vmatprep.subr.mxu1 %v17387_v37  ;;  %13381 = vmatpush3.msra.mxu0 %v15994_v19 }
 0x8df   :  { %13402 = vmatpush3.msra.mxu1 %v16119_v44  ;;  %13382 = vmatprep.subr.mxu0 %v17387_v37 }
 0x8e0   :  { %13403 = vmatprep.subr.mxu1 %v17387_v37  ;;  %13383 = vmatpush3.msra.mxu0 %v16015_v15 }
 0x8e1   :  { %13404 = vmatpush3.msra.mxu1 %v16130_v43  ;;  %13384 = vmatprep.subr.mxu0 %v17387_v37 }
 0x8e2   :  { %13405 = vmatprep.subr.mxu1 %v17387_v37  ;;  %13385 = vmatpush3.msra.mxu0 %v16024_v5 }
 0x8e3   :  { %13406 = vmatpush3.msra.mxu1 %v16143_v28  ;;  %13386 = vmatprep.subr.mxu0 %v17387_v37 }
 0x8e4   :  { %13407 = vmatprep.subr.mxu1 %v17387_v37  ;;  %13413 = vmatprep.mubr.msk.f32.mxu1 %vm14377_vm1, %v17387_v37 }
 0x8e5   :  { %13408 = vmatpush3.msra.mxu1 %v16151_v59  ;;  %13387 = vmatpush3.msra.mxu0 %v16044_v50 }
 0x8e6   :  { %13409 = vmatprep.subr.mxu1 %v17387_v37  ;;  %13388 = vmatprep.subr.mxu0 %v17387_v37 }
 0x8e7   :  { %13410 = vmatpush3.msra.mxu1 %v16159_v62  ;;  %13389 = vmatpush3.msra.mxu0 %v16058_v53 }
 0x8e8   :  { %13411 = vmatprep.subr.mxu1 %v17387_v37  ;;  %13390 = vmatprep.subr.mxu0 %v17387_v37 }
 0x8e9   :  { %13412 = vmatpush3.msra.mxu1 %v16165_v12  ;;  %13391 = vmatpush3.msra.mxu0 %v16075_v40 }
 0x8ea   :  { %13435 = vmatprep.subr.mxu1 %v17387_v37  ;;  %13392 = vmatprep.subr.mxu0 %v17387_v37 }
 0x8eb   :  { %13393 = vmatpush3.msra.mxu0 %v16089_v8  ;;  %13394 = vmatprep.mubr.msk.f32.mxu0 %vm14377_vm1, %v17387_v37 }
 0x8ec   :  { %13416 = vmatprep.subr.mxu0 %v17387_v37 }
 0x92c   :  { %v13142_v42 = vpop.f32.mrf.mxu1 }
 0x92e   :  { %v5529_v51 = vpop.f32.mrf.mxu1 }
 0x930   :  { %v13145_v20 = vpop.f32.mrf.mxu1 }
 0x932   :  { %v5541_v6 = vpop.f32.mrf.mxu1 }
 0x934   :  { %v13114_v14 = vpop.f32.mrf.mxu0  ;;  %v13148_v58 = vpop.f32.mrf.mxu1 }
 0x935   :  { %v5359_v36 = vadd.f32 %v13114_v14, %v16297_v46 }
 0x936   :  { %v5348_v56 = vpop.f32.mrf.mxu0  ;;  %v5553_v22 = vpop.f32.mrf.mxu1 }
 0x937   :  { %v5349_v13 = vadd.f32 %v16297_v46, %v5348_v56  ;;  %v5536_v55 = vadd.f32 %v13142_v42, %v5359_v36 }
 0x939   :  { %v5530_v35 = vadd.f32 %v5529_v51, %v5349_v13 }
 0x93a   :  { %v13117_v23 = vpop.f32.mrf.mxu0  ;;  %v13151_v33 = vpop.f32.mrf.mxu1 }
 0x93b   :  { %v5379_v10 = vadd.f32 %v13117_v23, %v16297_v46 }
 0x93c   :  { %v5368_v3 = vpop.f32.mrf.mxu0  ;;  %v5565_v38 = vpop.f32.mrf.mxu1 }
 0x93d   :  { %v5369_v52 = vadd.f32 %v16297_v46, %v5368_v3  ;;  %v5548_v11 = vadd.f32 %v13145_v20, %v5379_v10 }
 0x93f   :  { %v5542_v30 = vadd.f32 %v5541_v6, %v5369_v52 }
 0x940   :  { %v13120_v61 = vpop.f32.mrf.mxu0  ;;  %v13198_v32 = vpop.f32.mrf.mxu1 }
 0x941   :  { %v5399_v7 = vadd.f32 %v13120_v61, %v16297_v46 }
 0x942   :  { %v5388_v27 = vpop.f32.mrf.mxu0  ;;  %v5789_v18 = vpop.f32.mrf.mxu1 }
 0x943   :  { %v5389_v26 = vadd.f32 %v16297_v46, %v5388_v27  ;;  %v5560_v16 = vadd.f32 %v13148_v58, %v5399_v7 }
 0x945   :  { %v5554_v54 = vadd.f32 %v5553_v22, %v5389_v26 }
 0x946   :  { %v13123_v21 = vpop.f32.mrf.mxu0  ;;  %v13201_v45 = vpop.f32.mrf.mxu1 }
 0x948   :  { %v5408_v42 = vpop.f32.mrf.mxu0  ;;  %v5805_v51 = vpop.f32.mrf.mxu1 }
 0x949   :  { %v5409_v14 = vadd.f32 %v16297_v46, %v5408_v42 }
 0x94b   :  { %v5566_v36 = vadd.f32 %v5565_v38, %v5409_v14 }
 0x94c   :  { %v13170_v56 = vpop.f32.mrf.mxu0  ;;  %v13204_v20 = vpop.f32.mrf.mxu1 }
 0x94d   :  { %v5667_v6 = vadd.f32 %v13170_v56, %v5536_v55 }
 0x94e   :  { %v5659_v13 = vpop.f32.mrf.mxu0  ;;  %v5821_v23 = vpop.f32.mrf.mxu1 }
 0x94f   :  { %v5798_v10 = vadd.f32 %v13198_v32, %v5667_v6 }
 0x952   :  { %v13173_v3 = vpop.f32.mrf.mxu0  ;;  %v13207_v52 = vpop.f32.mrf.mxu1 }
 0x953   :  { %v5681_v61 = vadd.f32 %v13173_v3, %v5548_v11 }
 0x954   :  { %v5673_v12 = vpop.f32.mrf.mxu0  ;;  %v5837_v27 = vpop.f32.mrf.mxu1 }
 0x955   :  { %v5674_v58 = vadd.f32 %v5673_v12, %v5542_v30  ;;  %v5814_v22 = vadd.f32 %v13201_v45, %v5681_v61  ;;  %v5419_v30 = vadd.f32 %v13123_v21, %v16297_v46 }
 0x957   :  { %v5806_v7 = vadd.f32 %v5805_v51, %v5674_v58 }
 0x958   :  { %v13176_v26 = vpop.f32.mrf.mxu0  ;;  %v13254_v62 = vpop.f32.mrf.mxu1 }
 0x959   :  { %v5695_v59 = vadd.f32 %v13176_v26, %v5560_v16 }
 0x95a   :  { %v5687_v28 = vpop.f32.mrf.mxu0  ;;  %v6061_v14 = vpop.f32.mrf.mxu1 }
 0x95b   :  { %v5688_v42 = vadd.f32 %v5687_v28, %v5554_v54  ;;  %v5830_v38 = vadd.f32 %v13204_v20, %v5695_v59  ;;  %v5660_v28 = vadd.f32 %v5659_v13, %v5530_v35  ;;  %v5572_v59 = vadd.f32 %v13151_v33, %v5419_v30 }
 0x95c   :  { %v13179_v43 = vpop.f32.mrf.mxu0 }
 0x95d   :  { %v5822_v55 = vadd.f32 %v5821_v23, %v5688_v42  ;;  %v13257_v32 = vpop.f32.mrf.mxu1  ;;  %v5709_v23 = vadd.f32 %v13179_v43, %v5572_v59 }
 0x95e   :  { %v5701_v56 = vpop.f32.mrf.mxu0 }
 0x95f   :  { %v5702_v44 = vadd.f32 %v5701_v56, %v5566_v36  ;;  %v6073_v12 = vpop.f32.mrf.mxu1  ;;  %v5846_v56 = vadd.f32 %v13207_v52, %v5709_v23 }
 0x960   :  { %v13226_v6 = vpop.f32.mrf.mxu0 }
 0x961   :  { %v5947_v48 = vadd.f32 %v13226_v6, %v5798_v10  ;;  %v5838_v11 = vadd.f32 %v5837_v27, %v5702_v44  ;;  %v13260_v16 = vpop.f32.mrf.mxu1  ;;  %v5790_v10 = vadd.f32 %v5789_v18, %v5660_v28 }
 0x962   :  { %v5940_v3 = vpop.f32.mrf.mxu0 }
 0x963   :  { %v6068_v17 = vadd.f32 %v13254_v62, %v5947_v48  ;;  %v6085_v26 = vpop.f32.mrf.mxu1  ;;  %v5941_v62 = vadd.f32 %v5940_v3, %v5790_v10 }
 0x966   :  { %v13229_v45 = vpop.f32.mrf.mxu0  ;;  %v13263_v46 = vpop.f32.mrf.mxu1 }
 0x967   :  { %v5959_v51 = vadd.f32 %v13229_v45, %v5814_v22 }
 0x968   :  { %v5952_v61 = vpop.f32.mrf.mxu0 }
 0x969   :  { %v6080_v54 = vadd.f32 %v13257_v32, %v5959_v51  ;;  %v5953_v20 = vadd.f32 %v5952_v61, %v5806_v7  ;;  %v6062_v7 = vadd.f32 %v6061_v14, %v5941_v62 }
 0x96b   :  { %v6074_v58 = vadd.f32 %v6073_v12, %v5953_v20  ;;  %v13232_v36 = vpop.f32.mrf.mxu0 }
 0x96c   :  { %v5971_v42 = vadd.f32 %v13232_v36, %v5830_v38 }
 0x96d   :  { %v5964_v44 = vpop.f32.mrf.mxu0 }
 0x96e   :  { %v6092_v27 = vadd.f32 %v13260_v16, %v5971_v42  ;;  %v5965_v48 = vadd.f32 %v5964_v44, %v5822_v55  ;;  %v6097_v55 = vpop.f32.mrf.mxu1 }
 0x970   :  { %v6086_v21 = vadd.f32 %v6085_v26, %v5965_v48  ;;  %v13235_v22 = vpop.f32.mrf.mxu0  ;;  %v16308_v6 = vsel %vm868_vm2, %v6074_v58, %v6092_v27  ;;  %v16311_v35 = vsel %vm868_vm2, %v6092_v27, %v6074_v58 }
 0x971   :  { %v5983_v43 = vadd.f32 %v13235_v22, %v5846_v56 }
 0x972   :  { %v5976_v33 = vpop.f32.mrf.mxu0  ;;  %v16314_v13 = vsel %vm868_vm2, %v6080_v54, %v6086_v21  ;;  %v16317_v18 = vsel %vm868_vm2, %v6086_v21, %v6080_v54 }
 0x973   :  { %v6104_v38 = vadd.f32 %v13263_v46, %v5983_v43  ;;  %v5977_v52 = vadd.f32 %v5976_v33, %v5838_v11  ;;  %v17410_v33 = vld [vmem:[#allocation8_spill] sm:$0xff] }
 0x975   :  { %v6098_v32 = vadd.f32 %v6097_v55, %v5977_v52  ;;  %v6194_v3 = vpop.f32.mrf.mxu0  ;;  %v16320_v12 = vsel %vm868_vm2, %v6104_v38, %v6062_v7  ;;  %v6107_v44 = vsel %vm868_vm2, %v6062_v7, %v6104_v38  ;;  %v17411_v7 = vld [vmem:[#allocation14_spill] sm:$0xff]  ;;  %v17413_v52 = vld [vmem:[#allocation12_spill] sm:$0xff]  ;;  %v17414_v55 = vld [vmem:[#allocation9_spill] sm:$0xff] }
 0x976   :  { %v17412_v38 = vld [vmem:[#allocation10_spill] sm:$0xff] }
 0x977   :  { %v6305_v30 = vpop.f32.mrf.mxu1  ;;  %v13282_v45 = vpop.f32.mrf.mxu0  ;;  %v16323_v51 = vsel %vm868_vm2, %v6068_v17, %v6098_v32  ;;  %v16326_v16 = vsel %vm868_vm2, %v6098_v32, %v6068_v17  ;;  %v17415_v32 = vld [vmem:[#allocation16_spill] sm:$0xff] }
 0x978   :  { %v6306_v11 = vadd.f32 %v6305_v30, %v6194_v3  ;;  %v17416_v3 = vld [vmem:[#allocation11_spill] sm:$0xff]  ;;  %v17417_v30 = vld [vmem:[#allocation18_spill] sm:$0xff] }
 0x979   :  { %v13301_v61 = vpop.f32.mrf.mxu1 }
 0x986   :  { %v6393_v28 = vpop.f32.mrf.mxu0 }
 0x987   :  { %v6394_v20 = vadd.f32 %v6393_v28, %v6306_v11 }
 0x988   :  { %v13320_v59 = vpop.f32.mrf.mxu0 }
 0x989   :  { %v6474_v14 = vpop.f32.mrf.mxu1 }
 0x98a   :  { %v6475_v23 = vadd.f32 %v6474_v14, %v6394_v20 }
 0x98b   :  { %v13339_v54 = vpop.f32.mrf.mxu1 }
 0x998   :  { %v6569_v58 = vpop.f32.mrf.mxu0 }
 0x999   :  { %v6570_v36 = vadd.f32 %v6569_v58, %v6475_v23 }
 0x99a   :  { %v6648_v26 = vpop.f32.mrf.mxu1  ;;  %v13358_v42 = vpop.f32.mrf.mxu0 }
 0x99b   :  { %v6649_v10 = vadd.f32 %v6648_v26, %v6570_v36 }
 0x99c   :  { %v13377_v27 = vpop.f32.mrf.mxu1 }
 0x99d   :  { %v6652_v48 = vadd.f32 %v6649_v10, %v6107_v44 }
 0x99f   :  { %14312 = vtanh.f32 %v6652_v48 }
 0x9ac   :  { %v14313_v17 = vpop.eup %14312 }
 0x9ad   :  { %v6655_v62 = vsel %vm877_vm3, %v14313_v17, 0 }
 0x9ae   :  { %v16330_v56 = vand.u32 4294901760, %v6655_v62 }
 0x9b0   :  { %v6731_v46 = vsub.f32 %v6655_v62, %v16330_v56  ;;  %13414 = vmatmul.mubr.f32.vlgmr.msra.gmra.mxu1 %v16330_v56 }
 0x9b1   :  { %13436 = vmatpush3.msra.mxu1 %v15988_v4  ;;  %13451 = vmatprep.mubr.msk.f32.mxu1 %vm14377_vm1, %v17387_v37 }
 0x9b2   :  { %13437 = vmatprep.subr.mxu1 %v17387_v37  ;;  %v6732_v21 = vand.u32 4294901760, %v6731_v46 }
 0x9b3   :  { %13438 = vmatpush3.msra.mxu1 %v15994_v19 }
 0x9b4   :  { %13439 = vmatprep.subr.mxu1 %v17387_v37  ;;  %v6733_v22 = vsub.f32 %v6731_v46, %v6732_v21 }
 0x9b5   :  { %13440 = vmatpush3.msra.mxu1 %v16015_v15 }
 0x9b6   :  { %13441 = vmatprep.subr.mxu1 %v17387_v37  ;;  %v6734_v43 = vand.u32 4294901760, %v6733_v22 }
 0x9b7   :  { %13442 = vmatpush3.msra.mxu1 %v16024_v5 }
 0x9b8   :  { %13443 = vmatprep.subr.mxu1 %v17387_v37  ;;  %13395 = vmatmul.mubr.f32.vlgmr.msra.gmra.mxu0 %v6734_v43 }
 0x9b9   :  { %13417 = vmatpush3.msra.mxu0 %v16003_v31  ;;  %13444 = vmatpush3.msra.mxu1 %v16044_v50 }
 0x9ba   :  { %13418 = vmatprep.subr.mxu0 %v17387_v37  ;;  %13445 = vmatprep.subr.mxu1 %v17387_v37 }
 0x9bb   :  { %13419 = vmatpush3.msra.mxu0 %v16013_v9  ;;  %13446 = vmatpush3.msra.mxu1 %v16058_v53 }
 0x9bc   :  { %13420 = vmatprep.subr.mxu0 %v17387_v37  ;;  %13447 = vmatprep.subr.mxu1 %v17387_v37 }
 0x9bd   :  { %13421 = vmatpush3.msra.mxu0 %v16037_v34  ;;  %13448 = vmatpush3.msra.mxu1 %v16075_v40 }
 0x9be   :  { %13422 = vmatprep.subr.mxu0 %v17387_v37  ;;  %13449 = vmatprep.subr.mxu1 %v17387_v37 }
 0x9bf   :  { %13423 = vmatpush3.msra.mxu0 %v16051_v2  ;;  %13450 = vmatpush3.msra.mxu1 %v16089_v8 }
 0x9c0   :  { %13424 = vmatprep.subr.mxu0 %v17387_v37  ;;  %13452 = vmatmul.mubr.f32.vlgmr.msra.gmra.mxu1 %v6732_v21 }
 0x9c1   :  { %13473 = vmatprep.subr.mxu1 %v17387_v37  ;;  %13425 = vmatpush3.msra.mxu0 %v16073_v49 }
 0x9c2   :  { %13474 = vmatpush3.msra.mxu1 %v15988_v4  ;;  %13426 = vmatprep.subr.mxu0 %v17387_v37 }
 0x9c3   :  { %13475 = vmatprep.subr.mxu1 %v17387_v37  ;;  %13427 = vmatpush3.msra.mxu0 %v16087_v24 }
 0x9c4   :  { %13476 = vmatpush3.msra.mxu1 %v15994_v19  ;;  %13428 = vmatprep.subr.mxu0 %v17387_v37 }
 0x9c5   :  { %13477 = vmatprep.subr.mxu1 %v17387_v37  ;;  %13429 = vmatpush3.msra.mxu0 %v16103_v25 }
 0x9c6   :  { %13478 = vmatpush3.msra.mxu1 %v16015_v15  ;;  %13430 = vmatprep.subr.mxu0 %v17387_v37 }
 0x9c7   :  { %13479 = vmatprep.subr.mxu1 %v17387_v37  ;;  %13431 = vmatpush3.msra.mxu0 %v16115_v39 }
 0x9c8   :  { %13432 = vmatprep.mubr.msk.f32.mxu0 %vm14377_vm1, %v17387_v37  ;;  %13480 = vmatpush3.msra.mxu1 %v16024_v5 }
 0x9c9   :  { %13433 = vmatmul.mubr.f32.vlgmr.msra.gmra.mxu0 %v6731_v46  ;;  %13454 = vmatprep.subr.mxu0 %v17387_v37 }
 0x9ca   :  { %13481 = vmatprep.subr.mxu1 %v17387_v37  ;;  %13455 = vmatpush3.msra.mxu0 %v16022_v63 }
 0x9cb   :  { %13482 = vmatpush3.msra.mxu1 %v16044_v50  ;;  %13456 = vmatprep.subr.mxu0 %v17387_v37 }
 0x9cc   :  { %13483 = vmatprep.subr.mxu1 %v17387_v37  ;;  %13457 = vmatpush3.msra.mxu0 %v16034_v41 }
 0x9cd   :  { %13484 = vmatpush3.msra.mxu1 %v16058_v53  ;;  %13458 = vmatprep.subr.mxu0 %v17387_v37 }
 0x9ce   :  { %13485 = vmatprep.subr.mxu1 %v17387_v37  ;;  %13459 = vmatpush3.msra.mxu0 %v16065_v60 }
 0x9cf   :  { %13486 = vmatpush3.msra.mxu1 %v16075_v40  ;;  %13460 = vmatprep.subr.mxu0 %v17387_v37 }
 0x9d0   :  { %13487 = vmatprep.subr.mxu1 %v17387_v37  ;;  %13461 = vmatpush3.msra.mxu0 %v16082_v0 }
 0x9d1   :  { %13488 = vmatpush3.msra.mxu1 %v16089_v8  ;;  %13489 = vmatprep.mubr.msk.f32.mxu1 %vm14377_vm1, %v17387_v37 }
 0x9d2   :  { %13462 = vmatprep.subr.mxu0 %v17387_v37  ;;  %13490 = vmatmul.mubr.f32.vlgmr.msra.gmra.mxu1 %v16330_v56 }
 0x9d3   :  { %13463 = vmatpush3.msra.mxu0 %v16100_v29  ;;  %13470 = vmatprep.mubr.msk.f32.mxu0 %vm14377_vm1, %v17387_v37 }
 0x9d4   :  { %13464 = vmatprep.subr.mxu0 %v17387_v37  ;;  %13511 = vmatprep.subr.mxu1 %v17387_v37 }
 0x9d5   :  { %13465 = vmatpush3.msra.mxu0 %v16112_v1  ;;  %13512 = vmatpush3.msra.mxu1 %v16079_v57 }
 0x9d6   :  { %13466 = vmatprep.subr.mxu0 %v17387_v37  ;;  %13513 = vmatprep.subr.mxu1 %v17387_v37 }
 0x9d7   :  { %13467 = vmatpush3.msra.mxu0 %v16126_v47  ;;  %13514 = vmatpush3.msra.mxu1 %v17410_v33 }
 0x9d8   :  { %13468 = vmatprep.subr.mxu0 %v17387_v37  ;;  %13515 = vmatprep.subr.mxu1 %v17387_v37 }
 0x9d9   :  { %13469 = vmatpush3.msra.mxu0 %v17411_v7  ;;  %13516 = vmatpush3.msra.mxu1 %v17412_v38 }
 0x9da   :  { %13471 = vmatmul.mubr.f32.vlgmr.msra.gmra.mxu0 %v16330_v56  ;;  %13517 = vmatprep.subr.mxu1 %v17387_v37 }
 0x9db   :  { %13518 = vmatpush3.msra.mxu1 %v17413_v52  ;;  %13492 = vmatprep.subr.mxu0 %v17387_v37 }
 0x9dc   :  { %13519 = vmatprep.subr.mxu1 %v17387_v37  ;;  %13493 = vmatpush3.msra.mxu0 %v15988_v4 }
 0x9dd   :  { %13520 = vmatpush3.msra.mxu1 %v17414_v55  ;;  %13494 = vmatprep.subr.mxu0 %v17387_v37 }
 0x9de   :  { %13521 = vmatprep.subr.mxu1 %v17387_v37  ;;  %13495 = vmatpush3.msra.mxu0 %v15994_v19 }
 0x9df   :  { %13522 = vmatpush3.msra.mxu1 %v17415_v32  ;;  %13496 = vmatprep.subr.mxu0 %v17387_v37 }
 0x9e0   :  { %13523 = vmatprep.subr.mxu1 %v17387_v37  ;;  %13497 = vmatpush3.msra.mxu0 %v16015_v15 }
 0x9e1   :  { %13524 = vmatpush3.msra.mxu1 %v17416_v3  ;;  %13498 = vmatprep.subr.mxu0 %v17387_v37 }
 0x9e2   :  { %13525 = vmatprep.subr.mxu1 %v17387_v37  ;;  %13499 = vmatpush3.msra.mxu0 %v16024_v5 }
 0x9e3   :  { %13526 = vmatpush3.msra.mxu1 %v17417_v30  ;;  %13500 = vmatprep.subr.mxu0 %v17387_v37 }
 0x9e4   :  { %13527 = vmatprep.mubr.msk.f32.mxu1 %vm14377_vm1, %v17387_v37  ;;  %13549 = vmatprep.subr.mxu1 %v17387_v37 }
 0x9e5   :  { %13501 = vmatpush3.msra.mxu0 %v16044_v50  ;;  %13508 = vmatprep.mubr.msk.f32.mxu0 %vm14377_vm1, %v17387_v37 }
 0x9e6   :  { %13502 = vmatprep.subr.mxu0 %v17387_v37 }
 0x9e7   :  { %13503 = vmatpush3.msra.mxu0 %v16058_v53 }
 0x9e8   :  { %13504 = vmatprep.subr.mxu0 %v17387_v37 }
 0x9e9   :  { %13505 = vmatpush3.msra.mxu0 %v16075_v40 }
 0x9ea   :  { %13506 = vmatprep.subr.mxu0 %v17387_v37 }
 0x9eb   :  { %13507 = vmatpush3.msra.mxu0 %v16089_v8 }
 0x9ec   :  { %13530 = vmatprep.subr.mxu0 %v17387_v37 }
 0xa70   :  { %v6847_v45 = vpop.f32.mrf.mxu1 }
 0xa72   :  { %v13415_v61 = vpop.f32.mrf.mxu1 }
 0xa78   :  { %v6736_v28 = vpop.f32.mrf.mxu0 }
 0xa79   :  { %v6848_v58 = vadd.f32 %v6847_v45, %v6736_v28 }
 0xa7a   :  { %v13396_v59 = vpop.f32.mrf.mxu0 }
 0xa80   :  { %v7016_v14 = vpop.f32.mrf.mxu1 }
 0xa82   :  { %v13453_v54 = vpop.f32.mrf.mxu1 }
 0xa89   :  { %v6935_v11 = vpop.f32.mrf.mxu0 }
 0xa8a   :  { %v6936_v26 = vadd.f32 %v6935_v11, %v6848_v58 }
 0xa8b   :  { %v13434_v20 = vpop.f32.mrf.mxu0 }
 0xa8c   :  { %v7017_v42 = vadd.f32 %v7016_v14, %v6936_v26 }
 0xa92   :  { %v7190_v23 = vpop.f32.mrf.mxu1 }
 0xa94   :  { %v13491_v36 = vpop.f32.mrf.mxu1 }
 0xa9a   :  { %v7111_v10 = vpop.f32.mrf.mxu0 }
 0xa9b   :  { %v7112_v44 = vadd.f32 %v7111_v10, %v7017_v42 }
 0xa9c   :  { %v13472_v27 = vpop.f32.mrf.mxu0 }
 0xa9d   :  { %v7191_v48 = vadd.f32 %v7190_v23, %v7112_v44 }
 0xa9f   :  { %v7194_v17 = vadd.f32 %v7191_v48, %v16323_v51 }
 0xaa1   :  { %14314 = vtanh.f32 %v7194_v17 }
 0xaae   :  { %v14315_v62 = vpop.eup %14314 }
 0xaaf   :  { %v7197_v56 = vsel %vm877_vm3, %v14315_v62, 0 }
 0xab0   :  { %v16446_v46 = vand.u32 4294901760, %v7197_v56 }
 0xab2   :  { %v7273_v21 = vsub.f32 %v7197_v56, %v16446_v46  ;;  %13528 = vmatmul.mubr.f32.vlgmr.msra.gmra.mxu1 %v16446_v46 }
 0xab3   :  { %13550 = vmatpush3.msra.mxu1 %v15988_v4  ;;  %13565 = vmatprep.mubr.msk.f32.mxu1 %vm14377_vm1, %v17387_v37 }
 0xab4   :  { %13551 = vmatprep.subr.mxu1 %v17387_v37  ;;  %v7274_v22 = vand.u32 4294901760, %v7273_v21 }
 0xab5   :  { %13552 = vmatpush3.msra.mxu1 %v15994_v19 }
 0xab6   :  { %13553 = vmatprep.subr.mxu1 %v17387_v37  ;;  %v7275_v51 = vsub.f32 %v7273_v21, %v7274_v22 }
 0xab7   :  { %13554 = vmatpush3.msra.mxu1 %v16015_v15 }
 0xab8   :  { %13555 = vmatprep.subr.mxu1 %v17387_v37  ;;  %v7276_v43 = vand.u32 4294901760, %v7275_v51 }
 0xab9   :  { %13556 = vmatpush3.msra.mxu1 %v16024_v5 }
 0xaba   :  { %13557 = vmatprep.subr.mxu1 %v17387_v37  ;;  %13509 = vmatmul.mubr.f32.vlgmr.msra.gmra.mxu0 %v7276_v43 }
 0xabb   :  { %13531 = vmatpush3.msra.mxu0 %v16003_v31  ;;  %13558 = vmatpush3.msra.mxu1 %v16044_v50 }
 0xabc   :  { %13532 = vmatprep.subr.mxu0 %v17387_v37  ;;  %13559 = vmatprep.subr.mxu1 %v17387_v37 }
 0xabd   :  { %13533 = vmatpush3.msra.mxu0 %v16013_v9  ;;  %13560 = vmatpush3.msra.mxu1 %v16058_v53 }
 0xabe   :  { %13534 = vmatprep.subr.mxu0 %v17387_v37  ;;  %13561 = vmatprep.subr.mxu1 %v17387_v37 }
 0xabf   :  { %13535 = vmatpush3.msra.mxu0 %v16037_v34  ;;  %13562 = vmatpush3.msra.mxu1 %v16075_v40 }
 0xac0   :  { %13536 = vmatprep.subr.mxu0 %v17387_v37  ;;  %13563 = vmatprep.subr.mxu1 %v17387_v37 }
 0xac1   :  { %13537 = vmatpush3.msra.mxu0 %v16051_v2  ;;  %13564 = vmatpush3.msra.mxu1 %v16089_v8 }
 0xac2   :  { %13538 = vmatprep.subr.mxu0 %v17387_v37  ;;  %13566 = vmatmul.mubr.f32.vlgmr.msra.gmra.mxu1 %v7274_v22 }
 0xac3   :  { %13587 = vmatprep.subr.mxu1 %v17387_v37  ;;  %13539 = vmatpush3.msra.mxu0 %v16073_v49 }
 0xac4   :  { %13588 = vmatpush3.msra.mxu1 %v15988_v4  ;;  %13540 = vmatprep.subr.mxu0 %v17387_v37 }
 0xac5   :  { %13589 = vmatprep.subr.mxu1 %v17387_v37  ;;  %13541 = vmatpush3.msra.mxu0 %v16087_v24 }
 0xac6   :  { %13590 = vmatpush3.msra.mxu1 %v15994_v19  ;;  %13542 = vmatprep.subr.mxu0 %v17387_v37 }
 0xac7   :  { %13591 = vmatprep.subr.mxu1 %v17387_v37  ;;  %13543 = vmatpush3.msra.mxu0 %v16103_v25 }
 0xac8   :  { %13592 = vmatpush3.msra.mxu1 %v16015_v15  ;;  %13544 = vmatprep.subr.mxu0 %v17387_v37 }
 0xac9   :  { %13593 = vmatprep.subr.mxu1 %v17387_v37  ;;  %13545 = vmatpush3.msra.mxu0 %v16115_v39 }
 0xaca   :  { %13546 = vmatprep.mubr.msk.f32.mxu0 %vm14377_vm1, %v17387_v37  ;;  %13594 = vmatpush3.msra.mxu1 %v16024_v5 }
 0xacb   :  { %13547 = vmatmul.mubr.f32.vlgmr.msra.gmra.mxu0 %v7273_v21  ;;  %13568 = vmatprep.subr.mxu0 %v17387_v37 }
 0xacc   :  { %13595 = vmatprep.subr.mxu1 %v17387_v37  ;;  %13569 = vmatpush3.msra.mxu0 %v16022_v63 }
 0xacd   :  { %13596 = vmatpush3.msra.mxu1 %v16044_v50  ;;  %13570 = vmatprep.subr.mxu0 %v17387_v37 }
 0xace   :  { %13597 = vmatprep.subr.mxu1 %v17387_v37  ;;  %13571 = vmatpush3.msra.mxu0 %v16034_v41 }
 0xacf   :  { %13598 = vmatpush3.msra.mxu1 %v16058_v53  ;;  %13572 = vmatprep.subr.mxu0 %v17387_v37 }
 0xad0   :  { %13599 = vmatprep.subr.mxu1 %v17387_v37  ;;  %13573 = vmatpush3.msra.mxu0 %v16065_v60 }
 0xad1   :  { %13600 = vmatpush3.msra.mxu1 %v16075_v40  ;;  %13574 = vmatprep.subr.mxu0 %v17387_v37 }
 0xad2   :  { %13601 = vmatprep.subr.mxu1 %v17387_v37  ;;  %13575 = vmatpush3.msra.mxu0 %v16082_v0 }
 0xad3   :  { %13602 = vmatpush3.msra.mxu1 %v16089_v8  ;;  %13603 = vmatprep.mubr.msk.f32.mxu1 %vm14377_vm1, %v17387_v37 }
 0xad4   :  { %13576 = vmatprep.subr.mxu0 %v17387_v37  ;;  %13604 = vmatmul.mubr.f32.vlgmr.msra.gmra.mxu1 %v16446_v46 }
 0xad5   :  { %13577 = vmatpush3.msra.mxu0 %v16100_v29  ;;  %13584 = vmatprep.mubr.msk.f32.mxu0 %vm14377_vm1, %v17387_v37 }
 0xad6   :  { %13578 = vmatprep.subr.mxu0 %v17387_v37  ;;  %13625 = vmatprep.subr.mxu1 %v17387_v37 }
 0xad7   :  { %13579 = vmatpush3.msra.mxu0 %v16112_v1  ;;  %13626 = vmatpush3.msra.mxu1 %v16079_v57 }
 0xad8   :  { %13580 = vmatprep.subr.mxu0 %v17387_v37  ;;  %13627 = vmatprep.subr.mxu1 %v17387_v37 }
 0xad9   :  { %13581 = vmatpush3.msra.mxu0 %v16126_v47  ;;  %13628 = vmatpush3.msra.mxu1 %v17410_v33 }
 0xada   :  { %13582 = vmatprep.subr.mxu0 %v17387_v37  ;;  %13629 = vmatprep.subr.mxu1 %v17387_v37 }
 0xadb   :  { %13583 = vmatpush3.msra.mxu0 %v17411_v7  ;;  %13630 = vmatpush3.msra.mxu1 %v17412_v38 }
 0xadc   :  { %13585 = vmatmul.mubr.f32.vlgmr.msra.gmra.mxu0 %v16446_v46  ;;  %13631 = vmatprep.subr.mxu1 %v17387_v37 }
 0xadd   :  { %13632 = vmatpush3.msra.mxu1 %v17413_v52  ;;  %13606 = vmatprep.subr.mxu0 %v17387_v37 }
 0xade   :  { %13633 = vmatprep.subr.mxu1 %v17387_v37  ;;  %13607 = vmatpush3.msra.mxu0 %v15988_v4 }
 0xadf   :  { %13634 = vmatpush3.msra.mxu1 %v17414_v55  ;;  %13608 = vmatprep.subr.mxu0 %v17387_v37 }
 0xae0   :  { %13635 = vmatprep.subr.mxu1 %v17387_v37  ;;  %13609 = vmatpush3.msra.mxu0 %v15994_v19 }
 0xae1   :  { %13636 = vmatpush3.msra.mxu1 %v17415_v32  ;;  %13610 = vmatprep.subr.mxu0 %v17387_v37 }
 0xae2   :  { %13637 = vmatprep.subr.mxu1 %v17387_v37  ;;  %13611 = vmatpush3.msra.mxu0 %v16015_v15 }
 0xae3   :  { %13638 = vmatpush3.msra.mxu1 %v17416_v3  ;;  %13612 = vmatprep.subr.mxu0 %v17387_v37 }
 0xae4   :  { %13639 = vmatprep.subr.mxu1 %v17387_v37  ;;  %13613 = vmatpush3.msra.mxu0 %v16024_v5 }
 0xae5   :  { %13640 = vmatpush3.msra.mxu1 %v17417_v30  ;;  %13614 = vmatprep.subr.mxu0 %v17387_v37 }
 0xae6   :  { %13641 = vmatprep.mubr.msk.f32.mxu1 %vm14377_vm1, %v17387_v37  ;;  %13663 = vmatprep.subr.mxu1 %v17387_v37 }
 0xae7   :  { %13615 = vmatpush3.msra.mxu0 %v16044_v50  ;;  %13622 = vmatprep.mubr.msk.f32.mxu0 %vm14377_vm1, %v17387_v37 }
 0xae8   :  { %13616 = vmatprep.subr.mxu0 %v17387_v37 }
 0xae9   :  { %13617 = vmatpush3.msra.mxu0 %v16058_v53 }
 0xaea   :  { %13618 = vmatprep.subr.mxu0 %v17387_v37 }
 0xaeb   :  { %13619 = vmatpush3.msra.mxu0 %v16075_v40 }
 0xaec   :  { %13620 = vmatprep.subr.mxu0 %v17387_v37 }
 0xaed   :  { %13621 = vmatpush3.msra.mxu0 %v16089_v8 }
 0xaee   :  { %13644 = vmatprep.subr.mxu0 %v17387_v37 }
 0xb72   :  { %v7389_v45 = vpop.f32.mrf.mxu1 }
 0xb74   :  { %v13529_v61 = vpop.f32.mrf.mxu1 }
 0xb7a   :  { %v7278_v28 = vpop.f32.mrf.mxu0 }
 0xb7b   :  { %v7390_v58 = vadd.f32 %v7389_v45, %v7278_v28 }
 0xb7c   :  { %v13510_v59 = vpop.f32.mrf.mxu0 }
 0xb82   :  { %v7558_v14 = vpop.f32.mrf.mxu1 }
 0xb84   :  { %v13567_v54 = vpop.f32.mrf.mxu1 }
 0xb8b   :  { %v7477_v11 = vpop.f32.mrf.mxu0 }
 0xb8c   :  { %v7478_v26 = vadd.f32 %v7477_v11, %v7390_v58 }
 0xb8d   :  { %v13548_v20 = vpop.f32.mrf.mxu0 }
 0xb8e   :  { %v7559_v42 = vadd.f32 %v7558_v14, %v7478_v26 }
 0xb94   :  { %v7732_v23 = vpop.f32.mrf.mxu1 }
 0xb96   :  { %v13605_v36 = vpop.f32.mrf.mxu1 }
 0xb9c   :  { %v7653_v10 = vpop.f32.mrf.mxu0 }
 0xb9d   :  { %v7654_v44 = vadd.f32 %v7653_v10, %v7559_v42 }
 0xb9e   :  { %v13586_v27 = vpop.f32.mrf.mxu0 }
 0xb9f   :  { %v7733_v48 = vadd.f32 %v7732_v23, %v7654_v44 }
 0xba1   :  { %v7736_v17 = vadd.f32 %v7733_v48, %v16308_v6 }
 0xba3   :  { %14316 = vtanh.f32 %v7736_v17 }
 0xbb0   :  { %v14317_v62 = vpop.eup %14316 }
 0xbb1   :  { %v7739_v56 = vsel %vm877_vm3, %v14317_v62, 0 }
 0xbb2   :  { %v16562_v46 = vand.u32 4294901760, %v7739_v56 }
 0xbb4   :  { %v7815_v21 = vsub.f32 %v7739_v56, %v16562_v46  ;;  %13642 = vmatmul.mubr.f32.vlgmr.msra.gmra.mxu1 %v16562_v46 }
 0xbb5   :  { %13664 = vmatpush3.msra.mxu1 %v15988_v4  ;;  %13679 = vmatprep.mubr.msk.f32.mxu1 %vm14377_vm1, %v17387_v37 }
 0xbb6   :  { %13665 = vmatprep.subr.mxu1 %v17387_v37  ;;  %v7816_v22 = vand.u32 4294901760, %v7815_v21 }
 0xbb7   :  { %13666 = vmatpush3.msra.mxu1 %v15994_v19 }
 0xbb8   :  { %13667 = vmatprep.subr.mxu1 %v17387_v37  ;;  %v7817_v6 = vsub.f32 %v7815_v21, %v7816_v22 }
 0xbb9   :  { %13668 = vmatpush3.msra.mxu1 %v16015_v15 }
 0xbba   :  { %13669 = vmatprep.subr.mxu1 %v17387_v37  ;;  %v7818_v51 = vand.u32 4294901760, %v7817_v6 }
 0xbbb   :  { %13670 = vmatpush3.msra.mxu1 %v16024_v5 }
 0xbbc   :  { %13671 = vmatprep.subr.mxu1 %v17387_v37  ;;  %13623 = vmatmul.mubr.f32.vlgmr.msra.gmra.mxu0 %v7818_v51 }
 0xbbd   :  { %13645 = vmatpush3.msra.mxu0 %v16003_v31  ;;  %13672 = vmatpush3.msra.mxu1 %v16044_v50 }
 0xbbe   :  { %13646 = vmatprep.subr.mxu0 %v17387_v37  ;;  %13673 = vmatprep.subr.mxu1 %v17387_v37 }
 0xbbf   :  { %13647 = vmatpush3.msra.mxu0 %v16013_v9  ;;  %13674 = vmatpush3.msra.mxu1 %v16058_v53 }
 0xbc0   :  { %13648 = vmatprep.subr.mxu0 %v17387_v37  ;;  %13675 = vmatprep.subr.mxu1 %v17387_v37 }
 0xbc1   :  { %13649 = vmatpush3.msra.mxu0 %v16037_v34  ;;  %13676 = vmatpush3.msra.mxu1 %v16075_v40 }
 0xbc2   :  { %13650 = vmatprep.subr.mxu0 %v17387_v37  ;;  %13677 = vmatprep.subr.mxu1 %v17387_v37 }
 0xbc3   :  { %13651 = vmatpush3.msra.mxu0 %v16051_v2  ;;  %13678 = vmatpush3.msra.mxu1 %v16089_v8 }
 0xbc4   :  { %13652 = vmatprep.subr.mxu0 %v17387_v37  ;;  %13680 = vmatmul.mubr.f32.vlgmr.msra.gmra.mxu1 %v7816_v22 }
 0xbc5   :  { %13701 = vmatprep.subr.mxu1 %v17387_v37  ;;  %13653 = vmatpush3.msra.mxu0 %v16073_v49 }
 0xbc6   :  { %13702 = vmatpush3.msra.mxu1 %v15988_v4  ;;  %13654 = vmatprep.subr.mxu0 %v17387_v37 }
 0xbc7   :  { %13703 = vmatprep.subr.mxu1 %v17387_v37  ;;  %13655 = vmatpush3.msra.mxu0 %v16087_v24 }
 0xbc8   :  { %13704 = vmatpush3.msra.mxu1 %v15994_v19  ;;  %13656 = vmatprep.subr.mxu0 %v17387_v37 }
 0xbc9   :  { %13705 = vmatprep.subr.mxu1 %v17387_v37  ;;  %13657 = vmatpush3.msra.mxu0 %v16103_v25 }
 0xbca   :  { %13706 = vmatpush3.msra.mxu1 %v16015_v15  ;;  %13658 = vmatprep.subr.mxu0 %v17387_v37 }
 0xbcb   :  { %13707 = vmatprep.subr.mxu1 %v17387_v37  ;;  %13659 = vmatpush3.msra.mxu0 %v16115_v39 }
 0xbcc   :  { %13660 = vmatprep.mubr.msk.f32.mxu0 %vm14377_vm1, %v17387_v37  ;;  %13708 = vmatpush3.msra.mxu1 %v16024_v5 }
 0xbcd   :  { %13661 = vmatmul.mubr.f32.vlgmr.msra.gmra.mxu0 %v7815_v21  ;;  %13682 = vmatprep.subr.mxu0 %v17387_v37 }
 0xbce   :  { %13709 = vmatprep.subr.mxu1 %v17387_v37  ;;  %13683 = vmatpush3.msra.mxu0 %v16022_v63 }
 0xbcf   :  { %13710 = vmatpush3.msra.mxu1 %v16044_v50  ;;  %13684 = vmatprep.subr.mxu0 %v17387_v37 }
 0xbd0   :  { %13711 = vmatprep.subr.mxu1 %v17387_v37  ;;  %13685 = vmatpush3.msra.mxu0 %v16034_v41 }
 0xbd1   :  { %13712 = vmatpush3.msra.mxu1 %v16058_v53  ;;  %13686 = vmatprep.subr.mxu0 %v17387_v37 }
 0xbd2   :  { %13713 = vmatprep.subr.mxu1 %v17387_v37  ;;  %13687 = vmatpush3.msra.mxu0 %v16065_v60 }
 0xbd3   :  { %13714 = vmatpush3.msra.mxu1 %v16075_v40  ;;  %13688 = vmatprep.subr.mxu0 %v17387_v37 }
 0xbd4   :  { %13715 = vmatprep.subr.mxu1 %v17387_v37  ;;  %13689 = vmatpush3.msra.mxu0 %v16082_v0 }
 0xbd5   :  { %13716 = vmatpush3.msra.mxu1 %v16089_v8  ;;  %13717 = vmatprep.mubr.msk.f32.mxu1 %vm14377_vm1, %v17387_v37 }
 0xbd6   :  { %13690 = vmatprep.subr.mxu0 %v17387_v37  ;;  %13718 = vmatmul.mubr.f32.vlgmr.msra.gmra.mxu1 %v16562_v46 }
 0xbd7   :  { %13691 = vmatpush3.msra.mxu0 %v16100_v29  ;;  %13698 = vmatprep.mubr.msk.f32.mxu0 %vm14377_vm1, %v17387_v37 }
 0xbd8   :  { %13692 = vmatprep.subr.mxu0 %v17387_v37  ;;  %13739 = vmatprep.subr.mxu1 %v17387_v37 }
 0xbd9   :  { %13693 = vmatpush3.msra.mxu0 %v16112_v1  ;;  %13740 = vmatpush3.msra.mxu1 %v16079_v57 }
 0xbda   :  { %13694 = vmatprep.subr.mxu0 %v17387_v37  ;;  %13741 = vmatprep.subr.mxu1 %v17387_v37 }
 0xbdb   :  { %13695 = vmatpush3.msra.mxu0 %v16126_v47  ;;  %13742 = vmatpush3.msra.mxu1 %v17410_v33 }
 0xbdc   :  { %13696 = vmatprep.subr.mxu0 %v17387_v37  ;;  %13743 = vmatprep.subr.mxu1 %v17387_v37 }
 0xbdd   :  { %13697 = vmatpush3.msra.mxu0 %v17411_v7  ;;  %13744 = vmatpush3.msra.mxu1 %v17412_v38 }
 0xbde   :  { %13699 = vmatmul.mubr.f32.vlgmr.msra.gmra.mxu0 %v16562_v46  ;;  %13745 = vmatprep.subr.mxu1 %v17387_v37 }
 0xbdf   :  { %13746 = vmatpush3.msra.mxu1 %v17413_v52  ;;  %13720 = vmatprep.subr.mxu0 %v17387_v37 }
 0xbe0   :  { %13747 = vmatprep.subr.mxu1 %v17387_v37  ;;  %13721 = vmatpush3.msra.mxu0 %v15988_v4 }
 0xbe1   :  { %13748 = vmatpush3.msra.mxu1 %v17414_v55  ;;  %13722 = vmatprep.subr.mxu0 %v17387_v37 }
 0xbe2   :  { %13749 = vmatprep.subr.mxu1 %v17387_v37  ;;  %13723 = vmatpush3.msra.mxu0 %v15994_v19 }
 0xbe3   :  { %13750 = vmatpush3.msra.mxu1 %v17415_v32  ;;  %13724 = vmatprep.subr.mxu0 %v17387_v37 }
 0xbe4   :  { %13751 = vmatprep.subr.mxu1 %v17387_v37  ;;  %13725 = vmatpush3.msra.mxu0 %v16015_v15 }
 0xbe5   :  { %13752 = vmatpush3.msra.mxu1 %v17416_v3  ;;  %13726 = vmatprep.subr.mxu0 %v17387_v37 }
 0xbe6   :  { %13753 = vmatprep.subr.mxu1 %v17387_v37  ;;  %13727 = vmatpush3.msra.mxu0 %v16024_v5 }
 0xbe7   :  { %13754 = vmatpush3.msra.mxu1 %v17417_v30  ;;  %13728 = vmatprep.subr.mxu0 %v17387_v37 }
 0xbe8   :  { %13755 = vmatprep.mubr.msk.f32.mxu1 %vm14377_vm1, %v17387_v37  ;;  %13777 = vmatprep.subr.mxu1 %v17387_v37 }
 0xbe9   :  { %13729 = vmatpush3.msra.mxu0 %v16044_v50  ;;  %13736 = vmatprep.mubr.msk.f32.mxu0 %vm14377_vm1, %v17387_v37 }
 0xbea   :  { %13730 = vmatprep.subr.mxu0 %v17387_v37 }
 0xbeb   :  { %13731 = vmatpush3.msra.mxu0 %v16058_v53 }
 0xbec   :  { %13732 = vmatprep.subr.mxu0 %v17387_v37 }
 0xbed   :  { %13733 = vmatpush3.msra.mxu0 %v16075_v40 }
 0xbee   :  { %13734 = vmatprep.subr.mxu0 %v17387_v37 }
 0xbef   :  { %13735 = vmatpush3.msra.mxu0 %v16089_v8 }
 0xbf0   :  { %13758 = vmatprep.subr.mxu0 %v17387_v37 }
 0xc74   :  { %v7931_v43 = vpop.f32.mrf.mxu1 }
 0xc76   :  { %v13643_v45 = vpop.f32.mrf.mxu1 }
 0xc7c   :  { %v7820_v61 = vpop.f32.mrf.mxu0 }
 0xc7d   :  { %v7932_v23 = vadd.f32 %v7931_v43, %v7820_v61 }
 0xc7e   :  { %v13624_v28 = vpop.f32.mrf.mxu0 }
 0xc84   :  { %v8100_v59 = vpop.f32.mrf.mxu1 }
 0xc86   :  { %v13681_v14 = vpop.f32.mrf.mxu1 }
 0xc8d   :  { %v8019_v54 = vpop.f32.mrf.mxu0 }
 0xc8e   :  { %v8020_v36 = vadd.f32 %v8019_v54, %v7932_v23 }
 0xc8f   :  { %v13662_v11 = vpop.f32.mrf.mxu0 }
 0xc90   :  { %v8101_v26 = vadd.f32 %v8100_v59, %v8020_v36 }
 0xc96   :  { %v8274_v20 = vpop.f32.mrf.mxu1 }
 0xc98   :  { %v13719_v58 = vpop.f32.mrf.mxu1 }
 0xc9e   :  { %v8195_v42 = vpop.f32.mrf.mxu0 }
 0xc9f   :  { %v8196_v10 = vadd.f32 %v8195_v42, %v8101_v26 }
 0xca0   :  { %v13700_v44 = vpop.f32.mrf.mxu0 }
 0xca1   :  { %v8275_v27 = vadd.f32 %v8274_v20, %v8196_v10 }
 0xca3   :  { %v8278_v48 = vadd.f32 %v8275_v27, %v16314_v13 }
 0xca5   :  { %14318 = vtanh.f32 %v8278_v48 }
 0xcb2   :  { %v14319_v17 = vpop.eup %14318 }
 0xcb3   :  { %v8281_v62 = vsel %vm877_vm3, %v14319_v17, 0 }
 0xcb4   :  { %v16678_v56 = vand.u32 4294901760, %v8281_v62 }
 0xcb6   :  { %v8357_v46 = vsub.f32 %v8281_v62, %v16678_v56  ;;  %13756 = vmatmul.mubr.f32.vlgmr.msra.gmra.mxu1 %v16678_v56 }
 0xcb7   :  { %13778 = vmatpush3.msra.mxu1 %v15988_v4  ;;  %13793 = vmatprep.mubr.msk.f32.mxu1 %vm14377_vm1, %v17387_v37 }
 0xcb8   :  { %13779 = vmatprep.subr.mxu1 %v17387_v37  ;;  %v8358_v21 = vand.u32 4294901760, %v8357_v46 }
 0xcb9   :  { %13780 = vmatpush3.msra.mxu1 %v15994_v19 }
 0xcba   :  { %13781 = vmatprep.subr.mxu1 %v17387_v37  ;;  %v8359_v13 = vsub.f32 %v8357_v46, %v8358_v21 }
 0xcbb   :  { %13782 = vmatpush3.msra.mxu1 %v16015_v15 }
 0xcbc   :  { %13783 = vmatprep.subr.mxu1 %v17387_v37  ;;  %v8360_v22 = vand.u32 4294901760, %v8359_v13 }
 0xcbd   :  { %13784 = vmatpush3.msra.mxu1 %v16024_v5 }
 0xcbe   :  { %13785 = vmatprep.subr.mxu1 %v17387_v37  ;;  %13737 = vmatmul.mubr.f32.vlgmr.msra.gmra.mxu0 %v8360_v22 }
 0xcbf   :  { %13759 = vmatpush3.msra.mxu0 %v16003_v31  ;;  %13786 = vmatpush3.msra.mxu1 %v16044_v50 }
 0xcc0   :  { %13760 = vmatprep.subr.mxu0 %v17387_v37  ;;  %13787 = vmatprep.subr.mxu1 %v17387_v37 }
 0xcc1   :  { %13761 = vmatpush3.msra.mxu0 %v16013_v9  ;;  %13788 = vmatpush3.msra.mxu1 %v16058_v53 }
 0xcc2   :  { %13762 = vmatprep.subr.mxu0 %v17387_v37  ;;  %13789 = vmatprep.subr.mxu1 %v17387_v37 }
 0xcc3   :  { %13763 = vmatpush3.msra.mxu0 %v16037_v34  ;;  %13790 = vmatpush3.msra.mxu1 %v16075_v40 }
 0xcc4   :  { %13764 = vmatprep.subr.mxu0 %v17387_v37  ;;  %13791 = vmatprep.subr.mxu1 %v17387_v37 }
 0xcc5   :  { %13765 = vmatpush3.msra.mxu0 %v16051_v2  ;;  %13792 = vmatpush3.msra.mxu1 %v16089_v8 }
 0xcc6   :  { %13766 = vmatprep.subr.mxu0 %v17387_v37  ;;  %13794 = vmatmul.mubr.f32.vlgmr.msra.gmra.mxu1 %v8358_v21 }
 0xcc7   :  { %13815 = vmatprep.subr.mxu1 %v17387_v37  ;;  %13767 = vmatpush3.msra.mxu0 %v16073_v49 }
 0xcc8   :  { %13816 = vmatpush3.msra.mxu1 %v15988_v4  ;;  %13768 = vmatprep.subr.mxu0 %v17387_v37 }
 0xcc9   :  { %13817 = vmatprep.subr.mxu1 %v17387_v37  ;;  %13769 = vmatpush3.msra.mxu0 %v16087_v24 }
 0xcca   :  { %13818 = vmatpush3.msra.mxu1 %v15994_v19  ;;  %13770 = vmatprep.subr.mxu0 %v17387_v37 }
 0xccb   :  { %13819 = vmatprep.subr.mxu1 %v17387_v37  ;;  %13771 = vmatpush3.msra.mxu0 %v16103_v25 }
 0xccc   :  { %13820 = vmatpush3.msra.mxu1 %v16015_v15  ;;  %13772 = vmatprep.subr.mxu0 %v17387_v37 }
 0xccd   :  { %13821 = vmatprep.subr.mxu1 %v17387_v37  ;;  %13773 = vmatpush3.msra.mxu0 %v16115_v39 }
 0xcce   :  { %13774 = vmatprep.mubr.msk.f32.mxu0 %vm14377_vm1, %v17387_v37  ;;  %13822 = vmatpush3.msra.mxu1 %v16024_v5 }
 0xccf   :  { %13775 = vmatmul.mubr.f32.vlgmr.msra.gmra.mxu0 %v8357_v46  ;;  %13796 = vmatprep.subr.mxu0 %v17387_v37 }
 0xcd0   :  { %13823 = vmatprep.subr.mxu1 %v17387_v37  ;;  %13797 = vmatpush3.msra.mxu0 %v16022_v63 }
 0xcd1   :  { %13824 = vmatpush3.msra.mxu1 %v16044_v50  ;;  %13798 = vmatprep.subr.mxu0 %v17387_v37 }
 0xcd2   :  { %13825 = vmatprep.subr.mxu1 %v17387_v37  ;;  %13799 = vmatpush3.msra.mxu0 %v16034_v41 }
 0xcd3   :  { %13826 = vmatpush3.msra.mxu1 %v16058_v53  ;;  %13800 = vmatprep.subr.mxu0 %v17387_v37 }
 0xcd4   :  { %13827 = vmatprep.subr.mxu1 %v17387_v37  ;;  %13801 = vmatpush3.msra.mxu0 %v16065_v60 }
 0xcd5   :  { %13828 = vmatpush3.msra.mxu1 %v16075_v40  ;;  %13802 = vmatprep.subr.mxu0 %v17387_v37 }
 0xcd6   :  { %13829 = vmatprep.subr.mxu1 %v17387_v37  ;;  %13803 = vmatpush3.msra.mxu0 %v16082_v0 }
 0xcd7   :  { %13830 = vmatpush3.msra.mxu1 %v16089_v8  ;;  %13831 = vmatprep.mubr.msk.f32.mxu1 %vm14377_vm1, %v17387_v37 }
 0xcd8   :  { %13804 = vmatprep.subr.mxu0 %v17387_v37  ;;  %13832 = vmatmul.mubr.f32.vlgmr.msra.gmra.mxu1 %v16678_v56 }
 0xcd9   :  { %13805 = vmatpush3.msra.mxu0 %v16100_v29  ;;  %13812 = vmatprep.mubr.msk.f32.mxu0 %vm14377_vm1, %v17387_v37 }
 0xcda   :  { %13806 = vmatprep.subr.mxu0 %v17387_v37  ;;  %13853 = vmatprep.subr.mxu1 %v17387_v37 }
 0xcdb   :  { %13807 = vmatpush3.msra.mxu0 %v16112_v1  ;;  %13854 = vmatpush3.msra.mxu1 %v16079_v57 }
 0xcdc   :  { %13808 = vmatprep.subr.mxu0 %v17387_v37  ;;  %13855 = vmatprep.subr.mxu1 %v17387_v37 }
 0xcdd   :  { %13809 = vmatpush3.msra.mxu0 %v16126_v47  ;;  %13856 = vmatpush3.msra.mxu1 %v17410_v33 }
 0xcde   :  { %13810 = vmatprep.subr.mxu0 %v17387_v37  ;;  %13857 = vmatprep.subr.mxu1 %v17387_v37 }
 0xcdf   :  { %13811 = vmatpush3.msra.mxu0 %v17411_v7  ;;  %13858 = vmatpush3.msra.mxu1 %v17412_v38 }
 0xce0   :  { %13813 = vmatmul.mubr.f32.vlgmr.msra.gmra.mxu0 %v16678_v56  ;;  %13859 = vmatprep.subr.mxu1 %v17387_v37 }
 0xce1   :  { %13860 = vmatpush3.msra.mxu1 %v17413_v52  ;;  %13834 = vmatprep.subr.mxu0 %v17387_v37 }
 0xce2   :  { %13861 = vmatprep.subr.mxu1 %v17387_v37  ;;  %13835 = vmatpush3.msra.mxu0 %v15988_v4 }
 0xce3   :  { %13862 = vmatpush3.msra.mxu1 %v17414_v55  ;;  %13836 = vmatprep.subr.mxu0 %v17387_v37 }
 0xce4   :  { %13863 = vmatprep.subr.mxu1 %v17387_v37  ;;  %13837 = vmatpush3.msra.mxu0 %v15994_v19 }
 0xce5   :  { %13864 = vmatpush3.msra.mxu1 %v17415_v32  ;;  %13838 = vmatprep.subr.mxu0 %v17387_v37 }
 0xce6   :  { %13865 = vmatprep.subr.mxu1 %v17387_v37  ;;  %13839 = vmatpush3.msra.mxu0 %v16015_v15 }
 0xce7   :  { %13866 = vmatpush3.msra.mxu1 %v17416_v3  ;;  %13840 = vmatprep.subr.mxu0 %v17387_v37 }
 0xce8   :  { %13867 = vmatprep.subr.mxu1 %v17387_v37  ;;  %13841 = vmatpush3.msra.mxu0 %v16024_v5 }
 0xce9   :  { %13868 = vmatpush3.msra.mxu1 %v17417_v30  ;;  %13842 = vmatprep.subr.mxu0 %v17387_v37 }
 0xcea   :  { %13869 = vmatprep.mubr.msk.f32.mxu1 %vm14377_vm1, %v17387_v37  ;;  %13891 = vmatprep.subr.mxu1 %v17387_v37 }
 0xceb   :  { %13843 = vmatpush3.msra.mxu0 %v16044_v50  ;;  %13850 = vmatprep.mubr.msk.f32.mxu0 %vm14377_vm1, %v17387_v37 }
 0xcec   :  { %13844 = vmatprep.subr.mxu0 %v17387_v37 }
 0xced   :  { %13845 = vmatpush3.msra.mxu0 %v16058_v53 }
 0xcee   :  { %13846 = vmatprep.subr.mxu0 %v17387_v37 }
 0xcef   :  { %13847 = vmatpush3.msra.mxu0 %v16075_v40 }
 0xcf0   :  { %13848 = vmatprep.subr.mxu0 %v17387_v37 }
 0xcf1   :  { %13849 = vmatpush3.msra.mxu0 %v16089_v8 }
 0xcf2   :  { %13872 = vmatprep.subr.mxu0 %v17387_v37 }
 0xd76   :  { %v8473_v6 = vpop.f32.mrf.mxu1 }
 0xd78   :  { %v13757_v51 = vpop.f32.mrf.mxu1 }
 0xd7e   :  { %v8362_v43 = vpop.f32.mrf.mxu0 }
 0xd7f   :  { %v8474_v11 = vadd.f32 %v8473_v6, %v8362_v43 }
 0xd80   :  { %v13738_v45 = vpop.f32.mrf.mxu0 }
 0xd86   :  { %v8642_v61 = vpop.f32.mrf.mxu1 }
 0xd88   :  { %v13795_v28 = vpop.f32.mrf.mxu1 }
 0xd8f   :  { %v8561_v59 = vpop.f32.mrf.mxu0 }
 0xd90   :  { %v8562_v23 = vadd.f32 %v8561_v59, %v8474_v11 }
 0xd91   :  { %v13776_v14 = vpop.f32.mrf.mxu0 }
 0xd92   :  { %v8643_v58 = vadd.f32 %v8642_v61, %v8562_v23 }
 0xd98   :  { %v8816_v54 = vpop.f32.mrf.mxu1 }
 0xd9a   :  { %v13833_v20 = vpop.f32.mrf.mxu1 }
 0xda0   :  { %v8737_v36 = vpop.f32.mrf.mxu0 }
 0xda1   :  { %v8738_v26 = vadd.f32 %v8737_v36, %v8643_v58 }
 0xda2   :  { %v13814_v42 = vpop.f32.mrf.mxu0 }
 0xda3   :  { %v8817_v10 = vadd.f32 %v8816_v54, %v8738_v26 }
 0xda5   :  { %v8820_v44 = vadd.f32 %v8817_v10, %v16317_v18 }
 0xda7   :  { %14320 = vtanh.f32 %v8820_v44 }
 0xdb4   :  { %v14321_v27 = vpop.eup %14320 }
 0xdb5   :  { %v8823_v48 = vsel %vm877_vm3, %v14321_v27, 0 }
 0xdb6   :  { %v16794_v17 = vand.u32 4294901760, %v8823_v48 }
 0xdb8   :  { %v8899_v62 = vsub.f32 %v8823_v48, %v16794_v17  ;;  %13870 = vmatmul.mubr.f32.vlgmr.msra.gmra.mxu1 %v16794_v17 }
 0xdb9   :  { %13892 = vmatpush3.msra.mxu1 %v15988_v4  ;;  %13907 = vmatprep.mubr.msk.f32.mxu1 %vm14377_vm1, %v17387_v37 }
 0xdba   :  { %13893 = vmatprep.subr.mxu1 %v17387_v37  ;;  %v8900_v56 = vand.u32 4294901760, %v8899_v62 }
 0xdbb   :  { %13894 = vmatpush3.msra.mxu1 %v15994_v19 }
 0xdbc   :  { %13895 = vmatprep.subr.mxu1 %v17387_v37  ;;  %v8901_v18 = vsub.f32 %v8899_v62, %v8900_v56 }
 0xdbd   :  { %13896 = vmatpush3.msra.mxu1 %v16015_v15 }
 0xdbe   :  { %13897 = vmatprep.subr.mxu1 %v17387_v37  ;;  %v8902_v46 = vand.u32 4294901760, %v8901_v18 }
 0xdbf   :  { %13898 = vmatpush3.msra.mxu1 %v16024_v5 }
 0xdc0   :  { %13899 = vmatprep.subr.mxu1 %v17387_v37  ;;  %13851 = vmatmul.mubr.f32.vlgmr.msra.gmra.mxu0 %v8902_v46 }
 0xdc1   :  { %13873 = vmatpush3.msra.mxu0 %v16003_v31  ;;  %13900 = vmatpush3.msra.mxu1 %v16044_v50 }
 0xdc2   :  { %13874 = vmatprep.subr.mxu0 %v17387_v37  ;;  %13901 = vmatprep.subr.mxu1 %v17387_v37 }
 0xdc3   :  { %13875 = vmatpush3.msra.mxu0 %v16013_v9  ;;  %13902 = vmatpush3.msra.mxu1 %v16058_v53 }
 0xdc4   :  { %13876 = vmatprep.subr.mxu0 %v17387_v37  ;;  %13903 = vmatprep.subr.mxu1 %v17387_v37 }
 0xdc5   :  { %13877 = vmatpush3.msra.mxu0 %v16037_v34  ;;  %13904 = vmatpush3.msra.mxu1 %v16075_v40 }
 0xdc6   :  { %13878 = vmatprep.subr.mxu0 %v17387_v37  ;;  %13905 = vmatprep.subr.mxu1 %v17387_v37 }
 0xdc7   :  { %13879 = vmatpush3.msra.mxu0 %v16051_v2  ;;  %13906 = vmatpush3.msra.mxu1 %v16089_v8 }
 0xdc8   :  { %13880 = vmatprep.subr.mxu0 %v17387_v37  ;;  %13908 = vmatmul.mubr.f32.vlgmr.msra.gmra.mxu1 %v8900_v56 }
 0xdc9   :  { %13929 = vmatprep.subr.mxu1 %v17387_v37  ;;  %13881 = vmatpush3.msra.mxu0 %v16073_v49 }
 0xdca   :  { %13930 = vmatpush3.msra.mxu1 %v15988_v4  ;;  %13882 = vmatprep.subr.mxu0 %v17387_v37 }
 0xdcb   :  { %13931 = vmatprep.subr.mxu1 %v17387_v37  ;;  %13883 = vmatpush3.msra.mxu0 %v16087_v24 }
 0xdcc   :  { %13932 = vmatpush3.msra.mxu1 %v15994_v19  ;;  %13884 = vmatprep.subr.mxu0 %v17387_v37 }
 0xdcd   :  { %13933 = vmatprep.subr.mxu1 %v17387_v37  ;;  %13885 = vmatpush3.msra.mxu0 %v16103_v25 }
 0xdce   :  { %13934 = vmatpush3.msra.mxu1 %v16015_v15  ;;  %13886 = vmatprep.subr.mxu0 %v17387_v37 }
 0xdcf   :  { %13935 = vmatprep.subr.mxu1 %v17387_v37  ;;  %13887 = vmatpush3.msra.mxu0 %v16115_v39 }
 0xdd0   :  { %13888 = vmatprep.mubr.msk.f32.mxu0 %vm14377_vm1, %v17387_v37  ;;  %13936 = vmatpush3.msra.mxu1 %v16024_v5 }
 0xdd1   :  { %13889 = vmatmul.mubr.f32.vlgmr.msra.gmra.mxu0 %v8899_v62  ;;  %13910 = vmatprep.subr.mxu0 %v17387_v37 }
 0xdd2   :  { %13937 = vmatprep.subr.mxu1 %v17387_v37  ;;  %13911 = vmatpush3.msra.mxu0 %v16022_v63 }
 0xdd3   :  { %13938 = vmatpush3.msra.mxu1 %v16044_v50  ;;  %13912 = vmatprep.subr.mxu0 %v17387_v37 }
 0xdd4   :  { %13939 = vmatprep.subr.mxu1 %v17387_v37  ;;  %13913 = vmatpush3.msra.mxu0 %v16034_v41 }
 0xdd5   :  { %13940 = vmatpush3.msra.mxu1 %v16058_v53  ;;  %13914 = vmatprep.subr.mxu0 %v17387_v37 }
 0xdd6   :  { %13941 = vmatprep.subr.mxu1 %v17387_v37  ;;  %13915 = vmatpush3.msra.mxu0 %v16065_v60 }
 0xdd7   :  { %13942 = vmatpush3.msra.mxu1 %v16075_v40  ;;  %13916 = vmatprep.subr.mxu0 %v17387_v37 }
 0xdd8   :  { %13943 = vmatprep.subr.mxu1 %v17387_v37  ;;  %13917 = vmatpush3.msra.mxu0 %v16082_v0 }
 0xdd9   :  { %13944 = vmatpush3.msra.mxu1 %v16089_v8  ;;  %13945 = vmatprep.mubr.msk.f32.mxu1 %vm14377_vm1, %v17387_v37 }
 0xdda   :  { %13918 = vmatprep.subr.mxu0 %v17387_v37  ;;  %13946 = vmatmul.mubr.f32.vlgmr.msra.gmra.mxu1 %v16794_v17 }
 0xddb   :  { %13919 = vmatpush3.msra.mxu0 %v16100_v29  ;;  %13926 = vmatprep.mubr.msk.f32.mxu0 %vm14377_vm1, %v17387_v37 }
 0xddc   :  { %13920 = vmatprep.subr.mxu0 %v17387_v37  ;;  %13967 = vmatprep.subr.mxu1 %v17387_v37 }
 0xddd   :  { %13921 = vmatpush3.msra.mxu0 %v16112_v1  ;;  %13968 = vmatpush3.msra.mxu1 %v16079_v57 }
 0xdde   :  { %13922 = vmatprep.subr.mxu0 %v17387_v37  ;;  %13969 = vmatprep.subr.mxu1 %v17387_v37 }
 0xddf   :  { %13923 = vmatpush3.msra.mxu0 %v16126_v47  ;;  %13970 = vmatpush3.msra.mxu1 %v17410_v33 }
 0xde0   :  { %13924 = vmatprep.subr.mxu0 %v17387_v37  ;;  %13971 = vmatprep.subr.mxu1 %v17387_v37 }
 0xde1   :  { %13925 = vmatpush3.msra.mxu0 %v17411_v7  ;;  %13972 = vmatpush3.msra.mxu1 %v17412_v38 }
 0xde2   :  { %13927 = vmatmul.mubr.f32.vlgmr.msra.gmra.mxu0 %v16794_v17  ;;  %13973 = vmatprep.subr.mxu1 %v17387_v37 }
 0xde3   :  { %13974 = vmatpush3.msra.mxu1 %v17413_v52  ;;  %13948 = vmatprep.subr.mxu0 %v17387_v37 }
 0xde4   :  { %13975 = vmatprep.subr.mxu1 %v17387_v37  ;;  %13949 = vmatpush3.msra.mxu0 %v15988_v4 }
 0xde5   :  { %13976 = vmatpush3.msra.mxu1 %v17414_v55  ;;  %13950 = vmatprep.subr.mxu0 %v17387_v37 }
 0xde6   :  { %13977 = vmatprep.subr.mxu1 %v17387_v37  ;;  %13951 = vmatpush3.msra.mxu0 %v15994_v19 }
 0xde7   :  { %13978 = vmatpush3.msra.mxu1 %v17415_v32  ;;  %13952 = vmatprep.subr.mxu0 %v17387_v37 }
 0xde8   :  { %13979 = vmatprep.subr.mxu1 %v17387_v37  ;;  %13953 = vmatpush3.msra.mxu0 %v16015_v15 }
 0xde9   :  { %13980 = vmatpush3.msra.mxu1 %v17416_v3  ;;  %13954 = vmatprep.subr.mxu0 %v17387_v37 }
 0xdea   :  { %13981 = vmatprep.subr.mxu1 %v17387_v37  ;;  %13955 = vmatpush3.msra.mxu0 %v16024_v5 }
 0xdeb   :  { %13982 = vmatpush3.msra.mxu1 %v17417_v30  ;;  %13956 = vmatprep.subr.mxu0 %v17387_v37 }
 0xdec   :  { %13983 = vmatprep.mubr.msk.f32.mxu1 %vm14377_vm1, %v17387_v37  ;;  %14005 = vmatprep.subr.mxu1 %v17387_v37 }
 0xded   :  { %13957 = vmatpush3.msra.mxu0 %v16044_v50  ;;  %13964 = vmatprep.mubr.msk.f32.mxu0 %vm14377_vm1, %v17387_v37 }
 0xdee   :  { %13958 = vmatprep.subr.mxu0 %v17387_v37 }
 0xdef   :  { %13959 = vmatpush3.msra.mxu0 %v16058_v53 }
 0xdf0   :  { %13960 = vmatprep.subr.mxu0 %v17387_v37 }
 0xdf1   :  { %13961 = vmatpush3.msra.mxu0 %v16075_v40 }
 0xdf2   :  { %13962 = vmatprep.subr.mxu0 %v17387_v37 }
 0xdf3   :  { %13963 = vmatpush3.msra.mxu0 %v16089_v8 }
 0xdf4   :  { %13986 = vmatprep.subr.mxu0 %v17387_v37 }
 0xe78   :  { %v9015_v21 = vpop.f32.mrf.mxu1 }
 0xe7a   :  { %v13871_v13 = vpop.f32.mrf.mxu1 }
 0xe80   :  { %v8904_v22 = vpop.f32.mrf.mxu0 }
 0xe81   :  { %v9016_v59 = vadd.f32 %v9015_v21, %v8904_v22 }
 0xe82   :  { %v13852_v6 = vpop.f32.mrf.mxu0 }
 0xe88   :  { %v9184_v51 = vpop.f32.mrf.mxu1 }
 0xe8a   :  { %v13909_v43 = vpop.f32.mrf.mxu1 }
 0xe91   :  { %v9103_v45 = vpop.f32.mrf.mxu0 }
 0xe92   :  { %v9104_v54 = vadd.f32 %v9103_v45, %v9016_v59 }
 0xe93   :  { %v13890_v61 = vpop.f32.mrf.mxu0 }
 0xe94   :  { %v9185_v11 = vadd.f32 %v9184_v51, %v9104_v54 }
 0xe9a   :  { %v9358_v28 = vpop.f32.mrf.mxu1 }
 0xe9c   :  { %v13947_v14 = vpop.f32.mrf.mxu1 }
 0xea2   :  { %v9279_v20 = vpop.f32.mrf.mxu0 }
 0xea3   :  { %v9280_v23 = vadd.f32 %v9279_v20, %v9185_v11 }
 0xea4   :  { %v13928_v58 = vpop.f32.mrf.mxu0 }
 0xea5   :  { %v9359_v36 = vadd.f32 %v9358_v28, %v9280_v23 }
 0xea7   :  { %v9362_v26 = vadd.f32 %v9359_v36, %v16311_v35 }
 0xea9   :  { %14322 = vtanh.f32 %v9362_v26 }
 0xeb6   :  { %v14323_v42 = vpop.eup %14322 }
 0xeb7   :  { %v9365_v10 = vsel %vm877_vm3, %v14323_v42, 0 }
 0xeb8   :  { %v16910_v44 = vand.u32 4294901760, %v9365_v10 }
 0xeba   :  { %v9441_v27 = vsub.f32 %v9365_v10, %v16910_v44  ;;  %13984 = vmatmul.mubr.f32.vlgmr.msra.gmra.mxu1 %v16910_v44 }
 0xebb   :  { %14006 = vmatpush3.msra.mxu1 %v15988_v4  ;;  %14021 = vmatprep.mubr.msk.f32.mxu1 %vm14377_vm1, %v17387_v37 }
 0xebc   :  { %14007 = vmatprep.subr.mxu1 %v17387_v37  ;;  %v9442_v48 = vand.u32 4294901760, %v9441_v27 }
 0xebd   :  { %14008 = vmatpush3.msra.mxu1 %v15994_v19 }
 0xebe   :  { %14009 = vmatprep.subr.mxu1 %v17387_v37  ;;  %v9443_v35 = vsub.f32 %v9441_v27, %v9442_v48 }
 0xebf   :  { %14010 = vmatpush3.msra.mxu1 %v16015_v15 }
 0xec0   :  { %14011 = vmatprep.subr.mxu1 %v17387_v37  ;;  %v9444_v17 = vand.u32 4294901760, %v9443_v35 }
 0xec1   :  { %14012 = vmatpush3.msra.mxu1 %v16024_v5 }
 0xec2   :  { %14013 = vmatprep.subr.mxu1 %v17387_v37  ;;  %13965 = vmatmul.mubr.f32.vlgmr.msra.gmra.mxu0 %v9444_v17 }
 0xec3   :  { %13987 = vmatpush3.msra.mxu0 %v16003_v31  ;;  %14014 = vmatpush3.msra.mxu1 %v16044_v50 }
 0xec4   :  { %13988 = vmatprep.subr.mxu0 %v17387_v37  ;;  %14015 = vmatprep.subr.mxu1 %v17387_v37 }
 0xec5   :  { %13989 = vmatpush3.msra.mxu0 %v16013_v9  ;;  %14016 = vmatpush3.msra.mxu1 %v16058_v53 }
 0xec6   :  { %13990 = vmatprep.subr.mxu0 %v17387_v37  ;;  %14017 = vmatprep.subr.mxu1 %v17387_v37 }
 0xec7   :  { %13991 = vmatpush3.msra.mxu0 %v16037_v34  ;;  %14018 = vmatpush3.msra.mxu1 %v16075_v40 }
 0xec8   :  { %13992 = vmatprep.subr.mxu0 %v17387_v37  ;;  %14019 = vmatprep.subr.mxu1 %v17387_v37 }
 0xec9   :  { %13993 = vmatpush3.msra.mxu0 %v16051_v2  ;;  %14020 = vmatpush3.msra.mxu1 %v16089_v8 }
 0xeca   :  { %13994 = vmatprep.subr.mxu0 %v17387_v37  ;;  %14022 = vmatmul.mubr.f32.vlgmr.msra.gmra.mxu1 %v9442_v48 }
 0xecb   :  { %14043 = vmatprep.subr.mxu1 %v17387_v37  ;;  %13995 = vmatpush3.msra.mxu0 %v16073_v49 }
 0xecc   :  { %14044 = vmatpush3.msra.mxu1 %v15988_v4  ;;  %13996 = vmatprep.subr.mxu0 %v17387_v37 }
 0xecd   :  { %14045 = vmatprep.subr.mxu1 %v17387_v37  ;;  %13997 = vmatpush3.msra.mxu0 %v16087_v24 }
 0xece   :  { %14046 = vmatpush3.msra.mxu1 %v15994_v19  ;;  %13998 = vmatprep.subr.mxu0 %v17387_v37 }
 0xecf   :  { %14047 = vmatprep.subr.mxu1 %v17387_v37  ;;  %13999 = vmatpush3.msra.mxu0 %v16103_v25 }
 0xed0   :  { %14048 = vmatpush3.msra.mxu1 %v16015_v15  ;;  %14000 = vmatprep.subr.mxu0 %v17387_v37 }
 0xed1   :  { %14049 = vmatprep.subr.mxu1 %v17387_v37  ;;  %14001 = vmatpush3.msra.mxu0 %v16115_v39 }
 0xed2   :  { %14002 = vmatprep.mubr.msk.f32.mxu0 %vm14377_vm1, %v17387_v37  ;;  %14050 = vmatpush3.msra.mxu1 %v16024_v5 }
 0xed3   :  { %14003 = vmatmul.mubr.f32.vlgmr.msra.gmra.mxu0 %v9441_v27  ;;  %14024 = vmatprep.subr.mxu0 %v17387_v37 }
 0xed4   :  { %14051 = vmatprep.subr.mxu1 %v17387_v37  ;;  %14025 = vmatpush3.msra.mxu0 %v16022_v63 }
 0xed5   :  { %14052 = vmatpush3.msra.mxu1 %v16044_v50  ;;  %14026 = vmatprep.subr.mxu0 %v17387_v37 }
 0xed6   :  { %14053 = vmatprep.subr.mxu1 %v17387_v37  ;;  %14027 = vmatpush3.msra.mxu0 %v16034_v41 }
 0xed7   :  { %14054 = vmatpush3.msra.mxu1 %v16058_v53  ;;  %14028 = vmatprep.subr.mxu0 %v17387_v37 }
 0xed8   :  { %14055 = vmatprep.subr.mxu1 %v17387_v37  ;;  %14029 = vmatpush3.msra.mxu0 %v16065_v60 }
 0xed9   :  { %14056 = vmatpush3.msra.mxu1 %v16075_v40  ;;  %14030 = vmatprep.subr.mxu0 %v17387_v37 }
 0xeda   :  { %14057 = vmatprep.subr.mxu1 %v17387_v37  ;;  %14031 = vmatpush3.msra.mxu0 %v16082_v0 }
 0xedb   :  { %14058 = vmatpush3.msra.mxu1 %v16089_v8  ;;  %14059 = vmatprep.mubr.msk.f32.mxu1 %vm14377_vm1, %v17387_v37 }
 0xedc   :  { %14032 = vmatprep.subr.mxu0 %v17387_v37  ;;  %14060 = vmatmul.mubr.f32.vlgmr.msra.gmra.mxu1 %v16910_v44 }
 0xedd   :  { %14033 = vmatpush3.msra.mxu0 %v16100_v29  ;;  %14040 = vmatprep.mubr.msk.f32.mxu0 %vm14377_vm1, %v17387_v37 }
 0xede   :  { %14034 = vmatprep.subr.mxu0 %v17387_v37  ;;  %14081 = vmatprep.subr.mxu1 %v17387_v37 }
 0xedf   :  { %14035 = vmatpush3.msra.mxu0 %v16112_v1  ;;  %14082 = vmatpush3.msra.mxu1 %v16079_v57 }
 0xee0   :  { %14036 = vmatprep.subr.mxu0 %v17387_v37  ;;  %14083 = vmatprep.subr.mxu1 %v17387_v37 }
 0xee1   :  { %14037 = vmatpush3.msra.mxu0 %v16126_v47  ;;  %14084 = vmatpush3.msra.mxu1 %v17410_v33 }
 0xee2   :  { %14038 = vmatprep.subr.mxu0 %v17387_v37  ;;  %14085 = vmatprep.subr.mxu1 %v17387_v37 }
 0xee3   :  { %14039 = vmatpush3.msra.mxu0 %v17411_v7  ;;  %14086 = vmatpush3.msra.mxu1 %v17412_v38 }
 0xee4   :  { %14041 = vmatmul.mubr.f32.vlgmr.msra.gmra.mxu0 %v16910_v44  ;;  %14087 = vmatprep.subr.mxu1 %v17387_v37 }
 0xee5   :  { %14088 = vmatpush3.msra.mxu1 %v17413_v52  ;;  %14062 = vmatprep.subr.mxu0 %v17387_v37 }
 0xee6   :  { %14089 = vmatprep.subr.mxu1 %v17387_v37  ;;  %14063 = vmatpush3.msra.mxu0 %v15988_v4 }
 0xee7   :  { %14090 = vmatpush3.msra.mxu1 %v17414_v55  ;;  %14064 = vmatprep.subr.mxu0 %v17387_v37 }
 0xee8   :  { %14091 = vmatprep.subr.mxu1 %v17387_v37  ;;  %14065 = vmatpush3.msra.mxu0 %v15994_v19 }
 0xee9   :  { %14092 = vmatpush3.msra.mxu1 %v17415_v32  ;;  %14066 = vmatprep.subr.mxu0 %v17387_v37 }
 0xeea   :  { %14093 = vmatprep.subr.mxu1 %v17387_v37  ;;  %14067 = vmatpush3.msra.mxu0 %v16015_v15 }
 0xeeb   :  { %14094 = vmatpush3.msra.mxu1 %v17416_v3  ;;  %14068 = vmatprep.subr.mxu0 %v17387_v37 }
 0xeec   :  { %14095 = vmatprep.subr.mxu1 %v17387_v37  ;;  %14069 = vmatpush3.msra.mxu0 %v16024_v5 }
 0xeed   :  { %14096 = vmatpush3.msra.mxu1 %v17417_v30  ;;  %14070 = vmatprep.subr.mxu0 %v17387_v37 }
 0xeee   :  { %14097 = vmatprep.mubr.msk.f32.mxu1 %vm14377_vm1, %v17387_v37  ;;  %14119 = vmatprep.subr.mxu1 %v17387_v37 }
 0xeef   :  { %14071 = vmatpush3.msra.mxu0 %v16044_v50  ;;  %14078 = vmatprep.mubr.msk.f32.mxu0 %vm14377_vm1, %v17387_v37 }
 0xef0   :  { %14072 = vmatprep.subr.mxu0 %v17387_v37 }
 0xef1   :  { %14073 = vmatpush3.msra.mxu0 %v16058_v53 }
 0xef2   :  { %14074 = vmatprep.subr.mxu0 %v17387_v37 }
 0xef3   :  { %14075 = vmatpush3.msra.mxu0 %v16075_v40 }
 0xef4   :  { %14076 = vmatprep.subr.mxu0 %v17387_v37 }
 0xef5   :  { %14077 = vmatpush3.msra.mxu0 %v16089_v8 }
 0xef6   :  { %14100 = vmatprep.subr.mxu0 %v17387_v37 }
 0xf7a   :  { %v9557_v57 = vpop.f32.mrf.mxu1 }
 0xf7c   :  { %v13985_v33 = vpop.f32.mrf.mxu1 }
 0xf82   :  { %v9446_v38 = vpop.f32.mrf.mxu0 }
 0xf83   :  { %v9558_v56 = vadd.f32 %v9557_v57, %v9446_v38 }
 0xf84   :  { %v13966_v52 = vpop.f32.mrf.mxu0 }
 0xf8a   :  { %v9726_v55 = vpop.f32.mrf.mxu1 }
 0xf8c   :  { %v14023_v32 = vpop.f32.mrf.mxu1 }
 0xf93   :  { %v9645_v3 = vpop.f32.mrf.mxu0 }
 0xf94   :  { %v9646_v46 = vadd.f32 %v9645_v3, %v9558_v56 }
 0xf95   :  { %v14004_v30 = vpop.f32.mrf.mxu0 }
 0xf96   :  { %v9727_v21 = vadd.f32 %v9726_v55, %v9646_v46 }
 0xf9c   :  { %v9900_v62 = vpop.f32.mrf.mxu1 }
 0xf9e   :  { %v14061_v18 = vpop.f32.mrf.mxu1 }
 0xfa4   :  { %v9821_v13 = vpop.f32.mrf.mxu0 }
 0xfa5   :  { %v9822_v22 = vadd.f32 %v9821_v13, %v9727_v21 }
 0xfa6   :  { %v14042_v6 = vpop.f32.mrf.mxu0 }
 0xfa7   :  { %v9901_v51 = vadd.f32 %v9900_v62, %v9822_v22 }
 0xfa9   :  { %v9904_v43 = vadd.f32 %v9901_v51, %v16326_v16 }
 0xfab   :  { %14324 = vtanh.f32 %v9904_v43 }
 0xfb8   :  { %v14325_v45 = vpop.eup %14324 }
 0xfb9   :  { %v9907_v61 = vsel %vm877_vm3, %v14325_v45, 0 }
 0xfba   :  { %v17026_v28 = vand.u32 4294901760, %v9907_v61 }
 0xfbc   :  { %v9983_v59 = vsub.f32 %v9907_v61, %v17026_v28  ;;  %14098 = vmatmul.mubr.f32.vlgmr.msra.gmra.mxu1 %v17026_v28 }
 0xfbd   :  { %14120 = vmatpush3.msra.mxu1 %v15988_v4  ;;  %14135 = vmatprep.mubr.msk.f32.mxu1 %vm14377_vm1, %v17387_v37 }
 0xfbe   :  { %14121 = vmatprep.subr.mxu1 %v17387_v37  ;;  %v9984_v14 = vand.u32 4294901760, %v9983_v59 }
 0xfbf   :  { %14122 = vmatpush3.msra.mxu1 %v15994_v19 }
 0xfc0   :  { %14123 = vmatprep.subr.mxu1 %v17387_v37  ;;  %v9985_v16 = vsub.f32 %v9983_v59, %v9984_v14 }
 0xfc1   :  { %14124 = vmatpush3.msra.mxu1 %v16015_v15 }
 0xfc2   :  { %14125 = vmatprep.subr.mxu1 %v17387_v37  ;;  %v9986_v54 = vand.u32 4294901760, %v9985_v16 }
 0xfc3   :  { %14126 = vmatpush3.msra.mxu1 %v16024_v5 }
 0xfc4   :  { %14127 = vmatprep.subr.mxu1 %v17387_v37  ;;  %14079 = vmatmul.mubr.f32.vlgmr.msra.gmra.mxu0 %v9986_v54 }
 0xfc5   :  { %14101 = vmatpush3.msra.mxu0 %v16003_v31  ;;  %14128 = vmatpush3.msra.mxu1 %v16044_v50  ;;  %v10454_v31 = vld [vmem:[%s17324_s7 + $0x30] sm:$0xff] }
 0xfc6   :  { %14102 = vmatprep.subr.mxu0 %v17387_v37  ;;  %14129 = vmatprep.subr.mxu1 %v17387_v37 }
 0xfc7   :  { %14103 = vmatpush3.msra.mxu0 %v16013_v9  ;;  %14130 = vmatpush3.msra.mxu1 %v16058_v53 }
 0xfc8   :  { %14104 = vmatprep.subr.mxu0 %v17387_v37  ;;  %14131 = vmatprep.subr.mxu1 %v17387_v37 }
 0xfc9   :  { %14105 = vmatpush3.msra.mxu0 %v16037_v34  ;;  %14132 = vmatpush3.msra.mxu1 %v16075_v40 }
 0xfca   :  { %14106 = vmatprep.subr.mxu0 %v17387_v37  ;;  %14133 = vmatprep.subr.mxu1 %v17387_v37 }
 0xfcb   :  { %14107 = vmatpush3.msra.mxu0 %v16051_v2  ;;  %14134 = vmatpush3.msra.mxu1 %v16089_v8 }
 0xfcc   :  { %14108 = vmatprep.subr.mxu0 %v17387_v37  ;;  %14136 = vmatmul.mubr.f32.vlgmr.msra.gmra.mxu1 %v9984_v14 }
 0xfcd   :  { %14157 = vmatprep.subr.mxu1 %v17387_v37  ;;  %14109 = vmatpush3.msra.mxu0 %v16073_v49 }
 0xfce   :  { %14158 = vmatpush3.msra.mxu1 %v15988_v4  ;;  %14110 = vmatprep.subr.mxu0 %v17387_v37  ;;  %v10455_v4 = vld [vmem:[%s17324_s7 + $0x38] sm:$0xff] }
 0xfcf   :  { %14159 = vmatprep.subr.mxu1 %v17387_v37  ;;  %14111 = vmatpush3.msra.mxu0 %v16087_v24 }
 0xfd0   :  { %14160 = vmatpush3.msra.mxu1 %v15994_v19  ;;  %14112 = vmatprep.subr.mxu0 %v17387_v37  ;;  %v17111_v19 = vand.u32 4294901760, %v10455_v4 }
 0xfd1   :  { %14161 = vmatprep.subr.mxu1 %v17387_v37  ;;  %14113 = vmatpush3.msra.mxu0 %v16103_v25 }
 0xfd2   :  { %14162 = vmatpush3.msra.mxu1 %v16015_v15  ;;  %14114 = vmatprep.subr.mxu0 %v17387_v37  ;;  %v17117_v9 = vsub.f32 %v10455_v4, %v17111_v19  ;;  %v17119_v15 = vand.u32 4294901760, %v10454_v31 }
 0xfd3   :  { %14163 = vmatprep.subr.mxu1 %v17387_v37  ;;  %14115 = vmatpush3.msra.mxu0 %v16115_v39  ;;  %v10449_v39 = vld [vmem:[%s17324_s7 + $0x8] sm:$0xff] }
 0xfd4   :  { %14116 = vmatprep.mubr.msk.f32.mxu0 %vm14377_vm1, %v17387_v37  ;;  %14164 = vmatpush3.msra.mxu1 %v16024_v5  ;;  %v10568_v5 = vand.u32 4294901760, %v17117_v9  ;;  %v17181_v36 = vand.u32 4294901760, %v10449_v39 }
 0xfd5   :  { %14117 = vmatmul.mubr.f32.vlgmr.msra.gmra.mxu0 %v9983_v59  ;;  %14138 = vmatprep.subr.mxu0 %v17387_v37 }
 0xfd6   :  { %14165 = vmatprep.subr.mxu1 %v17387_v37  ;;  %14139 = vmatpush3.msra.mxu0 %v16022_v63  ;;  %v10453_v63 = vld [vmem:[%s17324_s7 + $0x28] sm:$0xff]  ;;  %v10569_v2 = vsub.f32 %v17117_v9, %v10568_v5  ;;  %v17196_v48 = vsub.f32 %v10449_v39, %v17181_v36 }
 0xfd7   :  { %14166 = vmatpush3.msra.mxu1 %v16044_v50  ;;  %14140 = vmatprep.subr.mxu0 %v17387_v37  ;;  %v17130_v34 = vand.u32 4294901760, %v10453_v63  ;;  %v10452_v50 = vld [vmem:[%s17324_s7 + $0x20] sm:$0xff] }
 0xfd8   :  { %14167 = vmatprep.subr.mxu1 %v17387_v37  ;;  %14141 = vmatpush3.msra.mxu0 %v16034_v41  ;;  %v17128_v41 = vsub.f32 %v10454_v31, %v17119_v15  ;;  %v17144_v49 = vand.u32 4294901760, %v10452_v50  ;;  %v10610_v38 = vand.u32 4294901760, %v17196_v48 }
 0xfd9   :  { %14168 = vmatpush3.msra.mxu1 %v16058_v53  ;;  %14142 = vmatprep.subr.mxu0 %v17387_v37 }
 0xfda   :  { %14169 = vmatprep.subr.mxu1 %v17387_v37  ;;  %14143 = vmatpush3.msra.mxu0 %v16065_v60  ;;  %v10575_v53 = vand.u32 4294901760, %v17128_v41  ;;  %v17142_v60 = vsub.f32 %v10453_v63, %v17130_v34  ;;  %v10611_v3 = vsub.f32 %v17196_v48, %v10610_v38 }
 0xfdb   :  { %14170 = vmatpush3.msra.mxu1 %v16075_v40  ;;  %14144 = vmatprep.subr.mxu0 %v17387_v37  ;;  %v10451_v40 = vld [vmem:[%s17324_s7 + $0x18] sm:$0xff] }
 0xfdc   :  { %14171 = vmatprep.subr.mxu1 %v17387_v37  ;;  %14145 = vmatpush3.msra.mxu0 %v16082_v0  ;;  %v10570_v0 = vand.u32 4294901760, %v10569_v2  ;;  %v10576_v24 = vsub.f32 %v17128_v41, %v10575_v53  ;;  %v17159_v25 = vand.u32 4294901760, %v10451_v40  ;;  %v10612_v56 = vand.u32 4294901760, %v10611_v3 }
 0xfdd   :  { %14172 = vmatpush3.msra.mxu1 %v16089_v8  ;;  %14173 = vmatprep.mubr.msk.f32.mxu1 %vm14377_vm1, %v17387_v37  ;;  %v10582_v8 = vand.u32 4294901760, %v17142_v60 }
 0xfde   :  { %14146 = vmatprep.subr.mxu0 %v17387_v37  ;;  %14174 = vmatmul.mubr.f32.vlgmr.msra.gmra.mxu1 %v17026_v28  ;;  %v17179_v58 = vsub.f32 %v10451_v40, %v17159_v25 }
 0xfdf   :  { %14147 = vmatpush3.msra.mxu0 %v16100_v29  ;;  %14154 = vmatprep.mubr.msk.f32.mxu0 %vm14377_vm1, %v17387_v37  ;;  %v17156_v29 = vsub.f32 %v10452_v50, %v17144_v49  ;;  %v10583_v11 = vsub.f32 %v17142_v60, %v10582_v8 }
 0xfe0   :  { %14148 = vmatprep.subr.mxu0 %v17387_v37  ;;  %14195 = vmatprep.subr.mxu1 %v17387_v37  ;;  %v10596_v27 = vand.u32 4294901760, %v17179_v58 }
 0xfe1   :  { %14149 = vmatpush3.msra.mxu0 %v16112_v1  ;;  %14211 = vmatprep.mubr.msk.f32.mxu1 %vm14377_vm1, %v17387_v37  ;;  %v10450_v1 = vld [vmem:[%s17324_s7 + $0x10] sm:$0xff]  ;;  %v10589_v20 = vand.u32 4294901760, %v17156_v29  ;;  %v10584_v42 = vand.u32 4294901760, %v10583_v11 }
 0xfe2   :  { %14150 = vmatprep.subr.mxu0 %v17387_v37  ;;  %14196 = vmatpush3.msra.mxu1 %v10570_v0  ;;  %v17175_v23 = vand.u32 4294901760, %v10450_v1  ;;  %v10597_v33 = vsub.f32 %v17179_v58, %v10596_v27 }
 0xfe3   :  { %14151 = vmatpush3.msra.mxu0 %v16126_v47  ;;  %v10448_v47 = vld [vmem:[%s17324_s7] sm:$0xff]  ;;  %14197 = vmatprep.subr.mxu1 %v17387_v37  ;;  %v10590_v10 = vsub.f32 %v17156_v29, %v10589_v20 }
 0xfe4   :  { %14152 = vmatprep.subr.mxu0 %v17387_v37  ;;  %v17183_v26 = vand.u32 4294901760, %v10448_v47  ;;  %v17190_v44 = vsub.f32 %v10450_v1, %v17175_v23  ;;  %v10598_v32 = vand.u32 4294901760, %v10597_v33 }
 0xfe5   :  { %14153 = vmatpush3.msra.mxu0 %v17411_v7  ;;  %v10577_v7 = vand.u32 4294901760, %v10576_v24  ;;  %v10591_v17 = vand.u32 4294901760, %v10590_v10 }
 0xfe6   :  { %14155 = vmatmul.mubr.f32.vlgmr.msra.gmra.mxu0 %v17026_v28  ;;  %14176 = vmatprep.subr.mxu0 %v17387_v37  ;;  %v17199_v35 = vsub.f32 %v10448_v47, %v17183_v26  ;;  %v10603_v57 = vand.u32 4294901760, %v17190_v44 }
 0xfe7   :  { %14192 = vmatprep.mubr.msk.f32.mxu0 %vm14377_vm1, %v17387_v37  ;;  %14177 = vmatpush3.msra.mxu0 %v17111_v19 }
 0xfe8   :  { %14178 = vmatprep.subr.mxu0 %v17387_v37  ;;  %14198 = vmatpush3.msra.mxu1 %v10577_v7  ;;  %v10617_v52 = vand.u32 4294901760, %v17199_v35  ;;  %v10604_v55 = vsub.f32 %v17190_v44, %v10603_v57 }
 0xfe9   :  { %14179 = vmatpush3.msra.mxu0 %v17119_v15  ;;  %14199 = vmatprep.subr.mxu1 %v17387_v37 }
 0xfea   :  { %14180 = vmatprep.subr.mxu0 %v17387_v37  ;;  %14200 = vmatpush3.msra.mxu1 %v10584_v42  ;;  %v10618_v30 = vsub.f32 %v17199_v35, %v10617_v52  ;;  %v10605_v62 = vand.u32 4294901760, %v10604_v55 }
 0xfeb   :  { %14181 = vmatpush3.msra.mxu0 %v17130_v34  ;;  %14201 = vmatprep.subr.mxu1 %v17387_v37 }
 0xfec   :  { %14182 = vmatprep.subr.mxu0 %v17387_v37  ;;  %14202 = vmatpush3.msra.mxu1 %v10591_v17  ;;  %v10619_v18 = vand.u32 4294901760, %v10618_v30 }
 0xfed   :  { %14183 = vmatpush3.msra.mxu0 %v17144_v49  ;;  %14203 = vmatprep.subr.mxu1 %v17387_v37 }
 0xfee   :  { %14184 = vmatprep.subr.mxu0 %v17387_v37  ;;  %14204 = vmatpush3.msra.mxu1 %v10598_v32 }
 0xfef   :  { %14185 = vmatpush3.msra.mxu0 %v17159_v25  ;;  %14205 = vmatprep.subr.mxu1 %v17387_v37 }
 0xff0   :  { %14186 = vmatprep.subr.mxu0 %v17387_v37  ;;  %14206 = vmatpush3.msra.mxu1 %v10605_v62 }
 0xff1   :  { %14187 = vmatpush3.msra.mxu0 %v17175_v23  ;;  %14207 = vmatprep.subr.mxu1 %v17387_v37 }
 0xff2   :  { %14188 = vmatprep.subr.mxu0 %v17387_v37  ;;  %14208 = vmatpush3.msra.mxu1 %v10612_v56 }
 0xff3   :  { %14189 = vmatpush3.msra.mxu0 %v17181_v36  ;;  %14209 = vmatprep.subr.mxu1 %v17387_v37 }
 0xff4   :  { %14190 = vmatprep.subr.mxu0 %v17387_v37  ;;  %14210 = vmatpush3.msra.mxu1 %v10619_v18 }
 0xff5   :  { %14191 = vmatpush3.msra.mxu0 %v17183_v26  ;;  %14233 = vmatprep.subr.mxu1 %v17387_v37 }
 0xff6   :  { %14214 = vmatprep.subr.mxu0 %v17387_v37 }
0x107c   :  { %v10099_v46 = vpop.f32.mrf.mxu1 }
0x107e   :  { %v14099_v21 = vpop.f32.mrf.mxu1 }
0x1084   :  { %v9988_v13 = vpop.f32.mrf.mxu0 }
0x1085   :  { %v10100_v28 = vadd.f32 %v10099_v46, %v9988_v13 }
0x1086   :  { %v14080_v22 = vpop.f32.mrf.mxu0 }
0x108c   :  { %v10268_v6 = vpop.f32.mrf.mxu1 }
0x108e   :  { %v14137_v51 = vpop.f32.mrf.mxu1 }
0x1095   :  { %v10187_v43 = vpop.f32.mrf.mxu0 }
0x1096   :  { %v10188_v14 = vadd.f32 %v10187_v43, %v10100_v28 }
0x1097   :  { %v14118_v45 = vpop.f32.mrf.mxu0 }
0x1098   :  { %v10269_v16 = vadd.f32 %v10268_v6, %v10188_v14 }
0x109e   :  { %v10442_v61 = vpop.f32.mrf.mxu1 }
0x10a0   :  { %v14175_v59 = vpop.f32.mrf.mxu1 }
0x10a6   :  { %v10363_v54 = vpop.f32.mrf.mxu0 }
0x10a7   :  { %v10364_v4 = vadd.f32 %v10363_v54, %v10269_v16 }
0x10a8   :  { %v14156_v31 = vpop.f32.mrf.mxu0 }
0x10a9   :  { %v10443_v63 = vadd.f32 %v10442_v61, %v10364_v4 }
0x10ab   :  { %v10446_v50 = vadd.f32 %v10443_v63, %v16320_v12 }
0x10ad   :  { %14326 = vtanh.f32 %v10446_v50 }
0x10ba   :  { %v14327_v2 = vpop.eup %14326 }
0x10bb   :  { %v10464_v40 = vsel %vm877_vm3, %v14327_v2, 0 }
0x10bc   :  { %v17230_v0 = vand.u32 4294901760, %v10464_v40 }
0x10be   :  { %v10540_v24 = vsub.f32 %v10464_v40, %v17230_v0  ;;  %14212 = vmatmul.mubr.f32.vlgmr.msra.gmra.mxu1 %v17230_v0 }
0x10bf   :  { %14234 = vmatpush3.msra.mxu1 %v17111_v19  ;;  %14249 = vmatprep.mubr.msk.f32.mxu1 %vm14377_vm1, %v17387_v37 }
0x10c0   :  { %14235 = vmatprep.subr.mxu1 %v17387_v37  ;;  %v10541_v1 = vand.u32 4294901760, %v10540_v24 }
0x10c1   :  { %14236 = vmatpush3.msra.mxu1 %v17119_v15 }
0x10c2   :  { %14237 = vmatprep.subr.mxu1 %v17387_v37  ;;  %v10542_v12 = vsub.f32 %v10540_v24, %v10541_v1 }
0x10c3   :  { %14238 = vmatpush3.msra.mxu1 %v17130_v34 }
0x10c4   :  { %14239 = vmatprep.subr.mxu1 %v17387_v37  ;;  %v10543_v39 = vand.u32 4294901760, %v10542_v12 }
0x10c5   :  { %14240 = vmatpush3.msra.mxu1 %v17144_v49 }
0x10c6   :  { %14241 = vmatprep.subr.mxu1 %v17387_v37  ;;  %14193 = vmatmul.mubr.f32.vlgmr.msra.gmra.mxu0 %v10543_v39 }
0x10c7   :  { %14215 = vmatpush3.msra.mxu0 %v17117_v9  ;;  %14242 = vmatpush3.msra.mxu1 %v17159_v25 }
0x10c8   :  { %14216 = vmatprep.subr.mxu0 %v17387_v37  ;;  %14243 = vmatprep.subr.mxu1 %v17387_v37 }
0x10c9   :  { %14217 = vmatpush3.msra.mxu0 %v17128_v41  ;;  %14244 = vmatpush3.msra.mxu1 %v17175_v23 }
0x10ca   :  { %14218 = vmatprep.subr.mxu0 %v17387_v37  ;;  %14245 = vmatprep.subr.mxu1 %v17387_v37 }
0x10cb   :  { %14219 = vmatpush3.msra.mxu0 %v17142_v60  ;;  %14246 = vmatpush3.msra.mxu1 %v17181_v36 }
0x10cc   :  { %14220 = vmatprep.subr.mxu0 %v17387_v37  ;;  %14247 = vmatprep.subr.mxu1 %v17387_v37 }
0x10cd   :  { %14221 = vmatpush3.msra.mxu0 %v17156_v29  ;;  %14248 = vmatpush3.msra.mxu1 %v17183_v26 }
0x10ce   :  { %14222 = vmatprep.subr.mxu0 %v17387_v37  ;;  %14250 = vmatmul.mubr.f32.vlgmr.msra.gmra.mxu1 %v10541_v1 }
0x10cf   :  { %14271 = vmatprep.subr.mxu1 %v17387_v37  ;;  %14223 = vmatpush3.msra.mxu0 %v17179_v58 }
0x10d0   :  { %14272 = vmatpush3.msra.mxu1 %v17111_v19  ;;  %14224 = vmatprep.subr.mxu0 %v17387_v37 }
0x10d1   :  { %14273 = vmatprep.subr.mxu1 %v17387_v37  ;;  %14225 = vmatpush3.msra.mxu0 %v17190_v44 }
0x10d2   :  { %14274 = vmatpush3.msra.mxu1 %v17119_v15  ;;  %14226 = vmatprep.subr.mxu0 %v17387_v37 }
0x10d3   :  { %14275 = vmatprep.subr.mxu1 %v17387_v37  ;;  %14227 = vmatpush3.msra.mxu0 %v17196_v48 }
0x10d4   :  { %14276 = vmatpush3.msra.mxu1 %v17130_v34  ;;  %14228 = vmatprep.subr.mxu0 %v17387_v37 }
0x10d5   :  { %14277 = vmatprep.subr.mxu1 %v17387_v37  ;;  %14229 = vmatpush3.msra.mxu0 %v17199_v35 }
0x10d6   :  { %14230 = vmatprep.mubr.msk.f32.mxu0 %vm14377_vm1, %v17387_v37  ;;  %14278 = vmatpush3.msra.mxu1 %v17144_v49  ;;  %v11013_v49 = vld [vmem:[#allocation4] ss:$0 sm:$0xff] }
0x10d7   :  { %14231 = vmatmul.mubr.f32.vlgmr.msra.gmra.mxu0 %v10540_v24  ;;  %14252 = vmatprep.subr.mxu0 %v17387_v37 }
0x10d8   :  { %14279 = vmatprep.subr.mxu1 %v17387_v37  ;;  %14253 = vmatpush3.msra.mxu0 %v10568_v5 }
0x10d9   :  { %14280 = vmatpush3.msra.mxu1 %v17159_v25  ;;  %14254 = vmatprep.subr.mxu0 %v17387_v37 }
0x10da   :  { %14281 = vmatprep.subr.mxu1 %v17387_v37  ;;  %14255 = vmatpush3.msra.mxu0 %v10575_v53 }
0x10db   :  { %14282 = vmatpush3.msra.mxu1 %v17175_v23  ;;  %14256 = vmatprep.subr.mxu0 %v17387_v37 }
0x10dc   :  { %14283 = vmatprep.subr.mxu1 %v17387_v37  ;;  %14257 = vmatpush3.msra.mxu0 %v10582_v8 }
0x10dd   :  { %14284 = vmatpush3.msra.mxu1 %v17181_v36  ;;  %14258 = vmatprep.subr.mxu0 %v17387_v37 }
0x10de   :  { %14285 = vmatprep.subr.mxu1 %v17387_v37  ;;  %14259 = vmatpush3.msra.mxu0 %v10589_v20 }
0x10df   :  { %14286 = vmatpush3.msra.mxu1 %v17183_v26  ;;  %14287 = vmatprep.mubr.msk.f32.mxu1 %vm14377_vm1, %v17387_v37 }
0x10e0   :  { %14260 = vmatprep.subr.mxu0 %v17387_v37  ;;  %14288 = vmatmul.mubr.f32.vlgmr.msra.gmra.mxu1 %v17230_v0 }
0x10e1   :  { %14261 = vmatpush3.msra.mxu0 %v10596_v27  ;;  %14268 = vmatprep.mubr.msk.f32.mxu0 %vm14377_vm1, %v17387_v37 }
0x10e2   :  { %14262 = vmatprep.subr.mxu0 %v17387_v37 }
0x10e3   :  { %14263 = vmatpush3.msra.mxu0 %v10603_v57 }
0x10e4   :  { %14264 = vmatprep.subr.mxu0 %v17387_v37 }
0x10e5   :  { %14265 = vmatpush3.msra.mxu0 %v10610_v38 }
0x10e6   :  { %14266 = vmatprep.subr.mxu0 %v17387_v37 }
0x10e7   :  { %14267 = vmatpush3.msra.mxu0 %v10617_v52 }
0x10e8   :  { %14269 = vmatmul.mubr.f32.vlgmr.msra.gmra.mxu0 %v17230_v0 }
0x117e   :  { %v10656_v19 = vpop.f32.mrf.mxu1 }
0x1180   :  { %v14213_v9 = vpop.f32.mrf.mxu1 }
0x1186   :  { %v10545_v15 = vpop.f32.mrf.mxu0 }
0x1187   :  { %v10546_v8 = vadd.f32 %v11013_v49, %v10545_v15 }
0x1188   :  { %v14194_v5 = vpop.f32.mrf.mxu0 }
0x1189   :  { %v10657_v25 = vadd.f32 %v10656_v19, %v10546_v8 }
0x118e   :  { %v10825_v41 = vpop.f32.mrf.mxu1 }
0x1190   :  { %v14251_v34 = vpop.f32.mrf.mxu1 }
0x1197   :  { %v10744_v53 = vpop.f32.mrf.mxu0 }
0x1198   :  { %v10745_v7 = vadd.f32 %v10744_v53, %v10657_v25 }
0x1199   :  { %v14232_v60 = vpop.f32.mrf.mxu0 }
0x119a   :  { %v10826_v37 = vadd.f32 %v10825_v41, %v10745_v7 }
0x11a0   :  { %v10999_v29 = vpop.f32.mrf.mxu1 }
0x11a2   :  { %v14289_v47 = vpop.f32.mrf.mxu1 }
0x11a8   :  { %v10920_v11 = vpop.f32.mrf.mxu0 }
0x11a9   :  { %v10921_v20 = vadd.f32 %v10920_v11, %v10826_v37 }
0x11aa   :  { %v14270_v23 = vpop.f32.mrf.mxu0 }
0x11ab   :  { %v11000_v58 = vadd.f32 %v10999_v29, %v10921_v20 }
0x11ad   :  { %11004 = vst.msk [vmem:[%s17326_s9] sm:$0xff] %vm11003_vm4, %v11000_v58 }
0x11ae   :  { %11009 = vsyncpa [#allocation3], 1 }
0x11af   :  { %11010 = vsyncpa [#allocation5], 1 }

</bundles_post_ra>
